<compile_context>
chip_gen: v5e
topology: v5e:2x2
jax: 0.10.0
libtpu: 0.0.40
codegen_flags: <defaults>
</compile_context>

<pallas_src>
import functools

import jax
import jax.numpy as jnp
from jax import lax
from jax.experimental import pallas as pl
from jax.experimental.pallas import tpu as pltpu

LANES = 128                 # output channels padded to this many lanes (lane-dense stores)
BN_EPS = 1e-5
MXU_DTYPE = jnp.bfloat16    # matmul input / inter-stage activation dtype (f32 accumulate)


def _round_up(x, m):
    return (x + m - 1) // m * m


def _pad_last(a, target):
    pad = target - a.shape[-1]
    if pad == 0:
        return a
    return jnp.pad(a, [(0, 0)] * (a.ndim - 1) + [(0, pad)])


# ----------------------------- Pallas kernels ------------------------------ #

def _matmul_bias_kernel(x_ref, w_ref, b_ref, o_ref):
    # 1x1 conv as a row-tiled matmul + bias (MXU, bf16 in / f32 accumulate).
    x = x_ref[...].astype(MXU_DTYPE)
    o_ref[...] = jnp.dot(x, w_ref[...], preferred_element_type=jnp.float32) + b_ref[...]


def _make_conv3x3_kernel(group_channels, w2p, rows_out_blk, rows_stat, valid_w,
                         rows_valid, rb):
    """3x3 valid conv (flattened-rows im2col) + bias + ReLU + in-kernel mask + BN partial
    sums, for `len(group_channels)` fused input groups (channel-concat fused into the
    matmuls).  All static shape parameters are Python ints closed over at trace time."""
    n_groups = len(group_channels)

    def kernel(*refs):
        x_refs = refs[:n_groups]                    # (rows_in_blk, c_g)    bf16
        w_refs = refs[n_groups:2 * n_groups]        # (9, c_g, Cpad)        bf16
        b_ref = refs[2 * n_groups]                  # (1, Cpad)             f32
        y_ref = refs[2 * n_groups + 1]              # (rows_out_blk, Cpad)  bf16
        st_ref = refs[2 * n_groups + 2]             # (2, Cpad)             f32

        blk = pl.program_id(1)

        acc = None
        for g in range(n_groups):
            for tap in range(9):
                di, dj = divmod(tap, 3)
                off = di * w2p + dj                 # static; di*w2p is 8-aligned
                lhs = x_refs[g][off:off + rows_out_blk, :]      # bf16, no per-tap cast
                part = jnp.dot(lhs, w_refs[g][tap],
                               preferred_element_type=jnp.float32)
                acc = part if acc is None else acc + part       # init from first tap

        y = jnp.maximum(acc + b_ref[...], 0.0)

        # In-kernel validity mask: column (flat index mod row-stride) and global-row bound.
        local = lax.broadcasted_iota(jnp.int32, (rows_out_blk, 1), 0)
        ok = ((local % w2p) < valid_w) & ((local + blk * rb) < rows_valid)
        y = jnp.where(ok, y, 0.0)

        y_ref[...] = y.astype(y_ref.dtype)

        # BN partial sums over the non-halo rows only (halo rows are duplicates).
        ys = y[:rows_stat]
        st_ref[0:1, :] = jnp.sum(ys, axis=0, keepdims=True)
        st_ref[1:2, :] = jnp.sum(ys * ys, axis=0, keepdims=True)

    return kernel


# --------------------------- pallas_call wrappers --------------------------- #

def conv1x1(x2d, w, b, *, tile_rows=1024):
    """(rows, Cin_p) @ (Cin_p, Cpad) + bias, row-tiled and pipelined."""
    rows, cin = x2d.shape
    cpad = w.shape[1]
    tm = int(min(tile_rows, _round_up(rows, 8)))
    rows_p = _round_up(rows, tm)
    if rows_p != rows:
        x2d = jnp.pad(x2d, ((0, rows_p - rows), (0, 0)))
    out = pl.pallas_call(
        _matmul_bias_kernel,
        out_shape=jax.ShapeDtypeStruct((rows_p, cpad), jnp.float32),
        grid=(rows_p // tm,),
        in_specs=[pl.BlockSpec((tm, cin), lambda i: (i, 0)),
                  pl.BlockSpec((cin, cpad), lambda i: (0, 0)),
                  pl.BlockSpec((1, cpad), lambda i: (0, 0))],
        out_specs=pl.BlockSpec((tm, cpad), lambda i: (i, 0)),
        compiler_params=pltpu.CompilerParams(dimension_semantics=("parallel",)),
    )(x2d, w, b)
    return out[:rows]


def conv3x3_block_stage(x_groups, w_groups, b, *, w2p, rb, halo, valid_w, rows_valid):
    """One ConvBlock stage: 3x3 valid conv + bias + ReLU + masked BN partial sums, tiled
    over a (batch, row-block) parallel grid.

    x_groups[i]: (N, NB, rows_in_blk, c_i) bf16 blocked flattened rows (halo included).
    w_groups[i]: (9, c_i, Cpad) bf16.   b: (1, Cpad) f32.
    Returns y (N, NB, rows_in_blk - halo, Cpad) bf16 and stats (N, NB, 2, Cpad) f32; the
    stats are sums over the first rb (non-halo) masked output rows of each block."""
    n, nb, rows_in_blk, _ = x_groups[0].shape
    cpad = w_groups[0].shape[-1]
    rows_out_blk = rows_in_blk - halo
    assert rb % w2p == 0 and halo >= 2 * w2p + 2 and rows_out_blk >= rb
    group_c = [g.shape[-1] for g in x_groups]

    kernel = _make_conv3x3_kernel(group_c, w2p, rows_out_blk, rb, valid_w, rows_valid, rb)

    in_specs = (
        [pl.BlockSpec((None, None, rows_in_blk, c), lambda i, j: (i, j, 0, 0))
         for c in group_c]
        + [pl.BlockSpec((9, c, cpad), lambda i, j: (0, 0, 0)) for c in group_c]
        + [pl.BlockSpec((1, cpad), lambda i, j: (0, 0))])
    out_specs = (
        pl.BlockSpec((None, None, rows_out_blk, cpad), lambda i, j: (i, j, 0, 0)),
        pl.BlockSpec((None, None, 2, cpad), lambda i, j: (i, j, 0, 0)))
    out_shape = (jax.ShapeDtypeStruct((n, nb, rows_out_blk, cpad), MXU_DTYPE),
                 jax.ShapeDtypeStruct((n, nb, 2, cpad), jnp.float32))

    # VMEM budget: bf16 inputs/outputs double-buffered + f32 accumulator + resident weights.
    est = sum(g.shape[2] * g.shape[3] * 2 for g in x_groups) * 2
    est += sum(int(w.size) * 2 for w in w_groups) * 2
    est += rows_out_blk * cpad * (2 * 2 + 4) + 4 * cpad * 4
    vmem_limit = int(min(56 * 2**20, max(32 * 2**20, 2 * est)))   # stays under v7x 64 MiB

    return pl.pallas_call(
        kernel,
        out_shape=out_shape,
        grid=(n, nb),
        in_specs=in_specs,
        out_specs=out_specs,
        compiler_params=pltpu.CompilerParams(
            dimension_semantics=("parallel", "parallel"),
            vmem_limit_bytes=vmem_limit),
    )(*x_groups, *w_groups, b)


# ------------------------------- JAX glue ---------------------------------- #

def bilinear_upsample_2x(x):
    """x: (N, H, W, C). nn.Upsample(scale_factor=2, bilinear, align_corners=False)."""
    def up_axis(a, axis):
        nax = a.shape[axis]
        prev = jnp.concatenate([lax.slice_in_dim(a, 0, 1, axis=axis),
                                lax.slice_in_dim(a, 0, nax - 1, axis=axis)], axis=axis)
        nxt = jnp.concatenate([lax.slice_in_dim(a, 1, nax, axis=axis),
                               lax.slice_in_dim(a, nax - 1, nax, axis=axis)], axis=axis)
        even = 0.25 * prev + 0.75 * a
        odd = 0.75 * a + 0.25 * nxt
        stacked = jnp.stack([even, odd], axis=axis + 1)
        new_shape = list(a.shape)
        new_shape[axis] = 2 * nax
        return stacked.reshape(new_shape)
    return up_axis(up_axis(x, 1), 2)


def center_crop_nhwc(a, th, tw):
    h, w = a.shape[1], a.shape[2]
    dh = (h - th) // 2
    dw = (w - tw) // 2
    return a[:, dh:dh + th, dw:dw + tw, :]


def _block_rows_with_halo(x_flat, nb, rb, rows_in_blk):
    """(N, R, C) -> (N, NB, rows_in_blk, C); block j holds rows [j*rb, j*rb+rows_in_blk),
    zero beyond R (halo duplicated in HBM once, read-only inputs)."""
    n, r, c = x_flat.shape
    need = (nb - 1) * rb + rows_in_blk
    if need > r:
        x_flat = jnp.pad(x_flat, ((0, 0), (0, need - r), (0, 0)))
    idx = (jnp.arange(nb, dtype=jnp.int32)[:, None] * rb
           + jnp.arange(rows_in_blk, dtype=jnp.int32)[None, :])
    return jnp.take(x_flat, idx, axis=1)


def _bn_affine(stats, gamma, beta, count):
    """stats: (N, NB, 2, Cpad) per-block [sum, sumsq] -> global scale/shift (batch stats,
    biased variance, eps=1e-5)."""
    total = jnp.sum(stats, axis=(0, 1))                 # (2, Cpad)
    mean = total[0:1] / count
    var = jnp.maximum(total[1:2] / count - mean * mean, 0.0)
    scale = gamma * lax.rsqrt(var + BN_EPS)
    shift = beta - mean * scale
    return scale, shift


def _pick_block_rows(w2p, h_out, c0_sum, cpad, budget_bytes=20 * 2**20):
    """Largest image-rows-per-block K whose per-grid-step VMEM estimate fits the budget."""
    halo = 2 * w2p + 8
    def est(k):
        rb = k * w2p
        s0 = (rb + 2 * halo) * c0_sum * 2 * 2 + (rb + halo) * cpad * (2 * 2 + 4)
        s1 = (rb + halo) * cpad * 2 * 2 + rb * cpad * (2 * 2 + 4)
        return max(s0, s1)
    k = max(1, min(h_out, 64))
    while k > 1 and est(k) > budget_bytes:
        k -= 1
    return k


def init_params(key, in_channels, out_channels):
    ks = jax.random.split(key, 10)
    p = {}
    # up: Conv2d(in_channels, out_channels, 1) — (Cin, Cout)
    p["w_up"] = 0.1 * jax.random.normal(ks[0], (in_channels, out_channels), jnp.float32)
    p["b_up"] = 0.1 * jax.random.normal(ks[1], (1, out_channels), jnp.float32)
    # ConvBlock conv 0: Conv2d(in_channels, out_channels, 3) — (tap, Cin_concat, Cout)
    p["w0"] = 0.1 * jax.random.normal(ks[2], (9, in_channels, out_channels), jnp.float32)
    p["b0"] = 0.1 * jax.random.normal(ks[3], (1, out_channels), jnp.float32)
    p["g0"] = 1.0 + 0.1 * jax.random.normal(ks[4], (1, out_channels), jnp.float32)
    p["beta0"] = 0.1 * jax.random.normal(ks[5], (1, out_channels), jnp.float32)
    # ConvBlock conv 1: Conv2d(out_channels, out_channels, 3)
    p["w1"] = 0.1 * jax.random.normal(ks[6], (9, out_channels, out_channels), jnp.float32)
    p["b1"] = 0.1 * jax.random.normal(ks[7], (1, out_channels), jnp.float32)
    p["g1"] = 1.0 + 0.1 * jax.random.normal(ks[8], (1, out_channels), jnp.float32)
    p["beta1"] = 0.1 * jax.random.normal(ks[9], (1, out_channels), jnp.float32)
    return p


def deconv_block_forward(params, accross, x, *, block_rows=None):
    """accross: (N, Cacc, Ha, Wa), x: (N, Cin, H, W), NCHW f32. Returns NCHW f32 output."""
    n, cin, h, w = x.shape
    cacc = accross.shape[1]
    cout = params["w_up"].shape[1]
    cpad = _round_up(cout, LANES)

    h2, w2 = 2 * h, 2 * w
    w2p = _round_up(w2, 8)            # flattened row stride (8-aligned for the tap slices)
    h0, vw0 = h2 - 2, w2 - 2          # conv0 valid output extent
    h1, vw1 = h0 - 2, vw0 - 2         # conv1 valid output extent
    halo = 2 * w2p + 8                # >= 3x3 tap reach (2*w2p+2), padded to sublane mult

    cs_p = _round_up(cacc, 16)        # skip-group channels (lane dim, zero padded)
    cu_p = _round_up(cout, 16)        # upsample-group channels
    cin_p = _round_up(cin, 8)

    k_rows = block_rows or _pick_block_rows(w2p, h0, cs_p + cu_p, cpad)
    k_rows = max(1, min(int(k_rows), h0))
    nb = (h0 + k_rows - 1) // k_rows
    rb = k_rows * w2p                 # output flat rows per block (multiple of w2p)

    # ---- parameter prep: zero-pad contraction / lane dims, bf16 for the MXU ----
    w_up = jnp.pad(params["w_up"], ((0, cin_p - cin), (0, cpad - cout))).astype(MXU_DTYPE)
    b_up = _pad_last(params["b_up"], cpad)
    w0 = params["w0"]                                      # (9, cacc + cout, cout)
    w0_skip = jnp.pad(w0[:, :cacc, :],
                      ((0, 0), (0, cs_p - cacc), (0, cpad - cout))).astype(MXU_DTYPE)
    w0_up = jnp.pad(w0[:, cacc:, :],
                    ((0, 0), (0, cu_p - cout), (0, cpad - cout))).astype(MXU_DTYPE)
    b0 = _pad_last(params["b0"], cpad)
    g0, beta0 = _pad_last(params["g0"], cpad), _pad_last(params["beta0"], cpad)
    w1_f32 = jnp.pad(params["w1"], ((0, 0), (0, cpad - cout), (0, cpad - cout)))
    b1 = _pad_last(params["b1"], cpad)
    g1, beta1 = _pad_last(params["g1"], cpad), _pad_last(params["beta1"], cpad)

    # ---- 1x1 conv BEFORE the upsample (exact commute), bilinear x2 in JAX ----
    x_nhwc = jnp.transpose(x, (0, 2, 3, 1))
    if cin_p != cin:
        x_nhwc = jnp.pad(x_nhwc, ((0, 0), (0, 0), (0, 0), (0, cin_p - cin)))
    y1x1 = conv1x1(x_nhwc.reshape(n * h * w, cin_p), w_up, b_up)
    y1x1 = y1x1[:, :cout].reshape(n, h, w, cout)
    up = bilinear_upsample_2x(y1x1).astype(MXU_DTYPE)      # (N, 2H, 2W, Cout) bf16
    # TODO(synk): fuse the 2x bilinear upsample into conv0 (expand in VMEM) to avoid the
    #             4x-sized upsampled tensor in HBM.

    acc_nhwc = jnp.transpose(accross, (0, 2, 3, 1))
    skip = center_crop_nhwc(acc_nhwc, h2, w2).astype(MXU_DTYPE)

    def to_blocked(a, c_to):
        a = jnp.pad(a, ((0, 0), (0, 0), (0, w2p - w2), (0, c_to - a.shape[-1])))
        a = a.reshape(n, h2 * w2p, c_to)
        return _block_rows_with_halo(a, nb, rb, rb + 2 * halo)

    skip_blk = to_blocked(skip, cs_p)
    up_blk = to_blocked(up, cu_p)

    # ---- conv0: fused concat + conv + bias + ReLU + BN0 partial stats (blocked grid) ----
    y0, st0 = conv3x3_block_stage(
        [skip_blk, up_blk], [w0_skip, w0_up], b0,
        w2p=w2p, rb=rb, halo=halo, valid_w=vw0, rows_valid=h0 * w2p)
    scale0, shift0 = _bn_affine(st0, g0, beta0, float(n * h0 * vw0))

    # Fold BN0 into conv1's weights/bias (exact: conv1's valid outputs only read conv0's
    # valid, unmasked outputs, so the masked zeros never see shift0).
    w1_eff = (w1_f32 * scale0[0][None, :, None]).astype(MXU_DTYPE)
    b1_eff = b1 + shift0 @ jnp.sum(w1_f32, axis=0)

    # ---- conv1: conv + bias + ReLU + BN1 partial stats; y0 consumed in its blocked form ----
    y1, st1 = conv3x3_block_stage(
        [y0], [w1_eff], b1_eff,
        w2p=w2p, rb=rb, halo=halo, valid_w=vw1, rows_valid=h1 * w2p)
    scale1, shift1 = _bn_affine(st1, g1, beta1, float(n * h1 * vw1))

    # ---- BN1 fused into the valid-region extraction (XLA fuses the FMA into the copy) ----
    out = y1.reshape(n, nb * k_rows, w2p, cpad)[:, :h1, :vw1, :cout].astype(jnp.float32)
    out = out * scale1[0, :cout] + shift1[0, :cout]
    return jnp.transpose(out, (0, 3, 1, 2))


if __name__ == "__main__":
    key = jax.random.PRNGKey(0)
    k_acc, k_x, k_p = jax.random.split(key, 3)

    N = 2
    in_channels = 8          # channels of x (and of the concat fed to the ConvBlock)
    out_channels = 4
    skip_channels = in_channels - out_channels
    H = W = 8                # x spatial size -> upsampled to 16x16
    Ha = Wa = 20             # skip-connection spatial size (center-cropped to 16x16)

    x = jax.random.normal(k_x, (N, in_channels, H, W), jnp.float32)
    accross = jax.random.normal(k_acc, (N, skip_channels, Ha, Wa), jnp.float32)
    params = init_params(k_p, in_channels, out_channels)

    # block_rows=8 image rows per block -> two row blocks per image, so the
    # (batch, row-block) parallel grid is actually exercised at this small size.
    fwd = jax.jit(functools.partial(deconv_block_forward, block_rows=8))
    out = jax.block_until_ready(fwd(params, accross, x))

    expected = (N, out_channels, 2 * H - 4, 2 * W - 4)   # two valid 3x3 convs
    assert out.shape == expected, (out.shape, expected)
    assert bool(jnp.all(jnp.isfinite(out)))
    print("KERNEL_OK")
</pallas_src>

<mosaic_0001>
module attributes {stable_mosaic.version = 11 : i64} {
  func.func @_matmul_bias_kernel(%arg0: i32, %arg1: memref<128x8xf32, #tpu.memory_space<vmem>>, %arg2: memref<8x128xbf16, #tpu.memory_space<vmem>>, %arg3: memref<1x128xf32, #tpu.memory_space<vmem>>, %arg4: memref<128x128xf32, #tpu.memory_space<vmem>>) attributes {dimension_semantics = [#tpu.dimension_semantics<parallel>], iteration_bounds = array<i64: 1>, scalar_prefetch = 0 : i64, scratch_operands = 0 : i64, tpu.core_type = #tpu.core_type<tc>, window_params = [{transform_indices = @transform_0, window_bounds = array<i64: 128, 8>}, {pipeline_mode = #tpu.pipeline_mode<synchronous>, transform_indices = @transform_1, window_bounds = array<i64: 8, 128>}, {pipeline_mode = #tpu.pipeline_mode<synchronous>, transform_indices = @transform_2, window_bounds = array<i64: 1, 128>}, {transform_indices = @transform_3, window_bounds = array<i64: 128, 128>}]} {
    %c0 = arith.constant 0 : index
    %c0_0 = arith.constant 0 : index
    %0 = vector.load %arg1[%c0, %c0_0] : memref<128x8xf32, #tpu.memory_space<vmem>>, vector<128x8xf32>
    %1 = arith.truncf %0 : vector<128x8xf32> to vector<128x8xbf16>
    %c0_1 = arith.constant 0 : index
    %c0_2 = arith.constant 0 : index
    %2 = vector.load %arg2[%c0_1, %c0_2] : memref<8x128xbf16, #tpu.memory_space<vmem>>, vector<8x128xbf16>
    %cst = arith.constant dense<0.000000e+00> : vector<128x128xf32>
    %3 = tpu.matmul %1, %2, %cst {dimension_numbers = #tpu.dot_dimension_numbers<[1], [0], [0], [1], [0, 0, 1, 1], [], []>} : vector<128x8xbf16>, vector<8x128xbf16>, vector<128x128xf32> -> vector<128x128xf32>
    %c0_3 = arith.constant 0 : index
    %c0_4 = arith.constant 0 : index
    %4 = vector.load %arg3[%c0_3, %c0_4] : memref<1x128xf32, #tpu.memory_space<vmem>>, vector<1x128xf32>
    %5 = vector.broadcast %4 : vector<1x128xf32> to vector<128x128xf32>
    %6 = arith.addf %3, %5 : vector<128x128xf32>
    %c0_5 = arith.constant 0 : index
    %c0_6 = arith.constant 0 : index
    %7 = vector.load %arg4[%c0_5, %c0_6] : memref<128x128xf32, #tpu.memory_space<vmem>>, vector<128x128xf32>
    tpu.vector_store %arg4[%c0_5, %c0_6], %6 {strides = array<i32>} : memref<128x128xf32, #tpu.memory_space<vmem>>, vector<128x128xf32>,
    return
  }
  func.func @transform_0(%arg0: i32) -> (i32, i32) {
    %c0_i32 = arith.constant 0 : i32
    %c0_i32_0 = arith.constant 0 : i32
    return %arg0, %c0_i32 : i32, i32
  }
  func.func @transform_1(%arg0: i32) -> (i32, i32) {
    %c0_i32 = arith.constant 0 : i32
    %c0_i32_0 = arith.constant 0 : i32
    %c0_i32_1 = arith.constant 0 : i32
    return %c0_i32, %c0_i32_0 : i32, i32
  }
  func.func @transform_2(%arg0: i32) -> (i32, i32) {
    %c0_i32 = arith.constant 0 : i32
    %c0_i32_0 = arith.constant 0 : i32
    %c0_i32_1 = arith.constant 0 : i32
    return %c0_i32, %c0_i32_0 : i32, i32
  }
  func.func @transform_3(%arg0: i32) -> (i32, i32) {
    %c0_i32 = arith.constant 0 : i32
    %c0_i32_0 = arith.constant 0 : i32
    return %arg0, %c0_i32 : i32, i32
  }
}

module attributes {stable_mosaic.version = 11 : i64} {
  func.func @kernel(%arg0: i32, %arg1: i32, %arg2: memref<1x1x208x16xbf16, #tpu.memory_space<vmem>>, %arg3: memref<1x1x208x16xbf16, #tpu.memory_space<vmem>>, %arg4: memref<9x16x128xbf16, #tpu.memory_space<vmem>>, %arg5: memref<9x16x128xbf16, #tpu.memory_space<vmem>>, %arg6: memref<1x128xf32, #tpu.memory_space<vmem>>, %arg7: memref<1x1x168x128xbf16, #tpu.memory_space<vmem>>, %arg8: memref<1x1x2x128xf32, #tpu.memory_space<vmem>>) attributes {dimension_semantics = [#tpu.dimension_semantics<parallel>, #tpu.dimension_semantics<parallel>], iteration_bounds = array<i64: 2, 2>, scalar_prefetch = 0 : i64, scratch_operands = 0 : i64, tpu.core_type = #tpu.core_type<tc>, window_params = [{transform_indices = @transform_0, window_bounds = array<i64: 1, 1, 208, 16>}, {transform_indices = @transform_1, window_bounds = array<i64: 1, 1, 208, 16>}, {pipeline_mode = #tpu.pipeline_mode<synchronous>, transform_indices = @transform_2, window_bounds = array<i64: 9, 16, 128>}, {pipeline_mode = #tpu.pipeline_mode<synchronous>, transform_indices = @transform_3, window_bounds = array<i64: 9, 16, 128>}, {pipeline_mode = #tpu.pipeline_mode<synchronous>, transform_indices = @transform_4, window_bounds = array<i64: 1, 128>}, {transform_indices = @transform_5, window_bounds = array<i64: 1, 1, 168, 128>}, {transform_indices = @transform_6, window_bounds = array<i64: 1, 1, 2, 128>}]} {
    %c0 = arith.constant 0 : index
    %c0_0 = arith.constant 0 : index
    %c0_1 = arith.constant 0 : index
    %c0_2 = arith.constant 0 : index
    %0 = vector.load %arg2[%c0, %c0_0, %c0_1, %c0_2] : memref<1x1x208x16xbf16, #tpu.memory_space<vmem>>, vector<1x1x168x16xbf16>
    %1 = vector.shape_cast %0 : vector<1x1x168x16xbf16> to vector<168x16xbf16>
    %c0_3 = arith.constant 0 : index
    %c0_4 = arith.constant 0 : index
    %c0_5 = arith.constant 0 : index
    %2 = vector.load %arg4[%c0_3, %c0_4, %c0_5] : memref<9x16x128xbf16, #tpu.memory_space<vmem>>, vector<1x16x128xbf16>
    %3 = vector.shape_cast %2 : vector<1x16x128xbf16> to vector<16x128xbf16>
    %cst = arith.constant dense<0.000000e+00> : vector<168x128xf32>
    %4 = tpu.matmul %1, %3, %cst {dimension_numbers = #tpu.dot_dimension_numbers<[1], [0], [0], [1], [0, 0, 1, 1], [], []>} : vector<168x16xbf16>, vector<16x128xbf16>, vector<168x128xf32> -> vector<168x128xf32>
    %c0_6 = arith.constant 0 : index
    %c0_7 = arith.constant 0 : index
    %c1 = arith.constant 1 : index
    %c0_8 = arith.constant 0 : index
    %5 = vector.load %arg2[%c0_6, %c0_7, %c1, %c0_8] : memref<1x1x208x16xbf16, #tpu.memory_space<vmem>>, vector<1x1x168x16xbf16>
    %6 = vector.shape_cast %5 : vector<1x1x168x16xbf16> to vector<168x16xbf16>
    %c1_9 = arith.constant 1 : index
    %c0_10 = arith.constant 0 : index
    %c0_11 = arith.constant 0 : index
    %7 = vector.load %arg4[%c1_9, %c0_10, %c0_11] : memref<9x16x128xbf16, #tpu.memory_space<vmem>>, vector<1x16x128xbf16>
    %8 = vector.shape_cast %7 : vector<1x16x128xbf16> to vector<16x128xbf16>
    %cst_12 = arith.constant dense<0.000000e+00> : vector<168x128xf32>
    %9 = tpu.matmul %6, %8, %cst_12 {dimension_numbers = #tpu.dot_dimension_numbers<[1], [0], [0], [1], [0, 0, 1, 1], [], []>} : vector<168x16xbf16>, vector<16x128xbf16>, vector<168x128xf32> -> vector<168x128xf32>
    %10 = arith.addf %4, %9 : vector<168x128xf32>
    %c0_13 = arith.constant 0 : index
    %c0_14 = arith.constant 0 : index
    %c2 = arith.constant 2 : index
    %c0_15 = arith.constant 0 : index
    %11 = vector.load %arg2[%c0_13, %c0_14, %c2, %c0_15] : memref<1x1x208x16xbf16, #tpu.memory_space<vmem>>, vector<1x1x168x16xbf16>
    %12 = vector.shape_cast %11 : vector<1x1x168x16xbf16> to vector<168x16xbf16>
    %c2_16 = arith.constant 2 : index
    %c0_17 = arith.constant 0 : index
    %c0_18 = arith.constant 0 : index
    %13 = vector.load %arg4[%c2_16, %c0_17, %c0_18] : memref<9x16x128xbf16, #tpu.memory_space<vmem>>, vector<1x16x128xbf16>
    %14 = vector.shape_cast %13 : vector<1x16x128xbf16> to vector<16x128xbf16>
    %cst_19 = arith.constant dense<0.000000e+00> : vector<168x128xf32>
    %15 = tpu.matmul %12, %14, %cst_19 {dimension_numbers = #tpu.dot_dimension_numbers<[1], [0], [0], [1], [0, 0, 1, 1], [], []>} : vector<168x16xbf16>, vector<16x128xbf16>, vector<168x128xf32> -> vector<168x128xf32>
    %16 = arith.addf %10, %15 : vector<168x128xf32>
    %c0_20 = arith.constant 0 : index
    %c0_21 = arith.constant 0 : index
    %c16 = arith.constant 16 : index
    %c0_22 = arith.constant 0 : index
    %17 = vector.load %arg2[%c0_20, %c0_21, %c16, %c0_22] : memref<1x1x208x16xbf16, #tpu.memory_space<vmem>>, vector<1x1x168x16xbf16>
    %18 = vector.shape_cast %17 : vector<1x1x168x16xbf16> to vector<168x16xbf16>
    %c3 = arith.constant 3 : index
    %c0_23 = arith.constant 0 : index
    %c0_24 = arith.constant 0 : index
    %19 = vector.load %arg4[%c3, %c0_23, %c0_24] : memref<9x16x128xbf16, #tpu.memory_space<vmem>>, vector<1x16x128xbf16>
    %20 = vector.shape_cast %19 : vector<1x16x128xbf16> to vector<16x128xbf16>
    %cst_25 = arith.constant dense<0.000000e+00> : vector<168x128xf32>
    %21 = tpu.matmul %18, %20, %cst_25 {dimension_numbers = #tpu.dot_dimension_numbers<[1], [0], [0], [1], [0, 0, 1, 1], [], []>} : vector<168x16xbf16>, vector<16x128xbf16>, vector<168x128xf32> -> vector<168x128xf32>
    %22 = arith.addf %16, %21 : vector<168x128xf32>
    %c0_26 = arith.constant 0 : index
    %c0_27 = arith.constant 0 : index
    %c17 = arith.constant 17 : index
    %c0_28 = arith.constant 0 : index
    %23 = vector.load %arg2[%c0_26, %c0_27, %c17, %c0_28] : memref<1x1x208x16xbf16, #tpu.memory_space<vmem>>, vector<1x1x168x16xbf16>
    %24 = vector.shape_cast %23 : vector<1x1x168x16xbf16> to vector<168x16xbf16>
    %c4 = arith.constant 4 : index
    %c0_29 = arith.constant 0 : index
    %c0_30 = arith.constant 0 : index
    %25 = vector.load %arg4[%c4, %c0_29, %c0_30] : memref<9x16x128xbf16, #tpu.memory_space<vmem>>, vector<1x16x128xbf16>
    %26 = vector.shape_cast %25 : vector<1x16x128xbf16> to vector<16x128xbf16>
    %cst_31 = arith.constant dense<0.000000e+00> : vector<168x128xf32>
    %27 = tpu.matmul %24, %26, %cst_31 {dimension_numbers = #tpu.dot_dimension_numbers<[1], [0], [0], [1], [0, 0, 1, 1], [], []>} : vector<168x16xbf16>, vector<16x128xbf16>, vector<168x128xf32> -> vector<168x128xf32>
    %28 = arith.addf %22, %27 : vector<168x128xf32>
    %c0_32 = arith.constant 0 : index
    %c0_33 = arith.constant 0 : index
    %c18 = arith.constant 18 : index
    %c0_34 = arith.constant 0 : index
    %29 = vector.load %arg2[%c0_32, %c0_33, %c18, %c0_34] : memref<1x1x208x16xbf16, #tpu.memory_space<vmem>>, vector<1x1x168x16xbf16>
    %30 = vector.shape_cast %29 : vector<1x1x168x16xbf16> to vector<168x16xbf16>
    %c5 = arith.constant 5 : index
    %c0_35 = arith.constant 0 : index
    %c0_36 = arith.constant 0 : index
    %31 = vector.load %arg4[%c5, %c0_35, %c0_36] : memref<9x16x128xbf16, #tpu.memory_space<vmem>>, vector<1x16x128xbf16>
    %32 = vector.shape_cast %31 : vector<1x16x128xbf16> to vector<16x128xbf16>
    %cst_37 = arith.constant dense<0.000000e+00> : vector<168x128xf32>
    %33 = tpu.matmul %30, %32, %cst_37 {dimension_numbers = #tpu.dot_dimension_numbers<[1], [0], [0], [1], [0, 0, 1, 1], [], []>} : vector<168x16xbf16>, vector<16x128xbf16>, vector<168x128xf32> -> vector<168x128xf32>
    %34 = arith.addf %28, %33 : vector<168x128xf32>
    %c0_38 = arith.constant 0 : index
    %c0_39 = arith.constant 0 : index
    %c32 = arith.constant 32 : index
    %c0_40 = arith.constant 0 : index
    %35 = vector.load %arg2[%c0_38, %c0_39, %c32, %c0_40] : memref<1x1x208x16xbf16, #tpu.memory_space<vmem>>, vector<1x1x168x16xbf16>
    %36 = vector.shape_cast %35 : vector<1x1x168x16xbf16> to vector<168x16xbf16>
    %c6 = arith.constant 6 : index
    %c0_41 = arith.constant 0 : index
    %c0_42 = arith.constant 0 : index
    %37 = vector.load %arg4[%c6, %c0_41, %c0_42] : memref<9x16x128xbf16, #tpu.memory_space<vmem>>, vector<1x16x128xbf16>
    %38 = vector.shape_cast %37 : vector<1x16x128xbf16> to vector<16x128xbf16>
    %cst_43 = arith.constant dense<0.000000e+00> : vector<168x128xf32>
    %39 = tpu.matmul %36, %38, %cst_43 {dimension_numbers = #tpu.dot_dimension_numbers<[1], [0], [0], [1], [0, 0, 1, 1], [], []>} : vector<168x16xbf16>, vector<16x128xbf16>, vector<168x128xf32> -> vector<168x128xf32>
    %40 = arith.addf %34, %39 : vector<168x128xf32>
    %c0_44 = arith.constant 0 : index
    %c0_45 = arith.constant 0 : index
    %c33 = arith.constant 33 : index
    %c0_46 = arith.constant 0 : index
    %41 = vector.load %arg2[%c0_44, %c0_45, %c33, %c0_46] : memref<1x1x208x16xbf16, #tpu.memory_space<vmem>>, vector<1x1x168x16xbf16>
    %42 = vector.shape_cast %41 : vector<1x1x168x16xbf16> to vector<168x16xbf16>
    %c7 = arith.constant 7 : index
    %c0_47 = arith.constant 0 : index
    %c0_48 = arith.constant 0 : index
    %43 = vector.load %arg4[%c7, %c0_47, %c0_48] : memref<9x16x128xbf16, #tpu.memory_space<vmem>>, vector<1x16x128xbf16>
    %44 = vector.shape_cast %43 : vector<1x16x128xbf16> to vector<16x128xbf16>
    %cst_49 = arith.constant dense<0.000000e+00> : vector<168x128xf32>
    %45 = tpu.matmul %42, %44, %cst_49 {dimension_numbers = #tpu.dot_dimension_numbers<[1], [0], [0], [1], [0, 0, 1, 1], [], []>} : vector<168x16xbf16>, vector<16x128xbf16>, vector<168x128xf32> -> vector<168x128xf32>
    %46 = arith.addf %40, %45 : vector<168x128xf32>
    %c0_50 = arith.constant 0 : index
    %c0_51 = arith.constant 0 : index
    %c34 = arith.constant 34 : index
    %c0_52 = arith.constant 0 : index
    %47 = vector.load %arg2[%c0_50, %c0_51, %c34, %c0_52] : memref<1x1x208x16xbf16, #tpu.memory_space<vmem>>, vector<1x1x168x16xbf16>
    %48 = vector.shape_cast %47 : vector<1x1x168x16xbf16> to vector<168x16xbf16>
    %c8 = arith.constant 8 : index
    %c0_53 = arith.constant 0 : index
    %c0_54 = arith.constant 0 : index
    %49 = vector.load %arg4[%c8, %c0_53, %c0_54] : memref<9x16x128xbf16, #tpu.memory_space<vmem>>, vector<1x16x128xbf16>
    %50 = vector.shape_cast %49 : vector<1x16x128xbf16> to vector<16x128xbf16>
    %cst_55 = arith.constant dense<0.000000e+00> : vector<168x128xf32>
    %51 = tpu.matmul %48, %50, %cst_55 {dimension_numbers = #tpu.dot_dimension_numbers<[1], [0], [0], [1], [0, 0, 1, 1], [], []>} : vector<168x16xbf16>, vector<16x128xbf16>, vector<168x128xf32> -> vector<168x128xf32>
    %52 = arith.addf %46, %51 : vector<168x128xf32>
    %c0_56 = arith.constant 0 : index
    %c0_57 = arith.constant 0 : index
    %c0_58 = arith.constant 0 : index
    %c0_59 = arith.constant 0 : index
    %53 = vector.load %arg3[%c0_56, %c0_57, %c0_58, %c0_59] : memref<1x1x208x16xbf16, #tpu.memory_space<vmem>>, vector<1x1x168x16xbf16>
    %54 = vector.shape_cast %53 : vector<1x1x168x16xbf16> to vector<168x16xbf16>
    %c0_60 = arith.constant 0 : index
    %c0_61 = arith.constant 0 : index
    %c0_62 = arith.constant 0 : index
    %55 = vector.load %arg5[%c0_60, %c0_61, %c0_62] : memref<9x16x128xbf16, #tpu.memory_space<vmem>>, vector<1x16x128xbf16>
    %56 = vector.shape_cast %55 : vector<1x16x128xbf16> to vector<16x128xbf16>
    %cst_63 = arith.constant dense<0.000000e+00> : vector<168x128xf32>
    %57 = tpu.matmul %54, %56, %cst_63 {dimension_numbers = #tpu.dot_dimension_numbers<[1], [0], [0], [1], [0, 0, 1, 1], [], []>} : vector<168x16xbf16>, vector<16x128xbf16>, vector<168x128xf32> -> vector<168x128xf32>
    %58 = arith.addf %52, %57 : vector<168x128xf32>
    %c0_64 = arith.constant 0 : index
    %c0_65 = arith.constant 0 : index
    %c1_66 = arith.constant 1 : index
    %c0_67 = arith.constant 0 : index
    %59 = vector.load %arg3[%c0_64, %c0_65, %c1_66, %c0_67] : memref<1x1x208x16xbf16, #tpu.memory_space<vmem>>, vector<1x1x168x16xbf16>
    %60 = vector.shape_cast %59 : vector<1x1x168x16xbf16> to vector<168x16xbf16>
    %c1_68 = arith.constant 1 : index
    %c0_69 = arith.constant 0 : index
    %c0_70 = arith.constant 0 : index
    %61 = vector.load %arg5[%c1_68, %c0_69, %c0_70] : memref<9x16x128xbf16, #tpu.memory_space<vmem>>, vector<1x16x128xbf16>
    %62 = vector.shape_cast %61 : vector<1x16x128xbf16> to vector<16x128xbf16>
    %cst_71 = arith.constant dense<0.000000e+00> : vector<168x128xf32>
    %63 = tpu.matmul %60, %62, %cst_71 {dimension_numbers = #tpu.dot_dimension_numbers<[1], [0], [0], [1], [0, 0, 1, 1], [], []>} : vector<168x16xbf16>, vector<16x128xbf16>, vector<168x128xf32> -> vector<168x128xf32>
    %64 = arith.addf %58, %63 : vector<168x128xf32>
    %c0_72 = arith.constant 0 : index
    %c0_73 = arith.constant 0 : index
    %c2_74 = arith.constant 2 : index
    %c0_75 = arith.constant 0 : index
    %65 = vector.load %arg3[%c0_72, %c0_73, %c2_74, %c0_75] : memref<1x1x208x16xbf16, #tpu.memory_space<vmem>>, vector<1x1x168x16xbf16>
    %66 = vector.shape_cast %65 : vector<1x1x168x16xbf16> to vector<168x16xbf16>
    %c2_76 = arith.constant 2 : index
    %c0_77 = arith.constant 0 : index
    %c0_78 = arith.constant 0 : index
    %67 = vector.load %arg5[%c2_76, %c0_77, %c0_78] : memref<9x16x128xbf16, #tpu.memory_space<vmem>>, vector<1x16x128xbf16>
    %68 = vector.shape_cast %67 : vector<1x16x128xbf16> to vector<16x128xbf16>
    %cst_79 = arith.constant dense<0.000000e+00> : vector<168x128xf32>
    %69 = tpu.matmul %66, %68, %cst_79 {dimension_numbers = #tpu.dot_dimension_numbers<[1], [0], [0], [1], [0, 0, 1, 1], [], []>} : vector<168x16xbf16>, vector<16x128xbf16>, vector<168x128xf32> -> vector<168x128xf32>
    %70 = arith.addf %64, %69 : vector<168x128xf32>
    %c0_80 = arith.constant 0 : index
    %c0_81 = arith.constant 0 : index
    %c16_82 = arith.constant 16 : index
    %c0_83 = arith.constant 0 : index
    %71 = vector.load %arg3[%c0_80, %c0_81, %c16_82, %c0_83] : memref<1x1x208x16xbf16, #tpu.memory_space<vmem>>, vector<1x1x168x16xbf16>
    %72 = vector.shape_cast %71 : vector<1x1x168x16xbf16> to vector<168x16xbf16>
    %c3_84 = arith.constant 3 : index
    %c0_85 = arith.constant 0 : index
    %c0_86 = arith.constant 0 : index
    %73 = vector.load %arg5[%c3_84, %c0_85, %c0_86] : memref<9x16x128xbf16, #tpu.memory_space<vmem>>, vector<1x16x128xbf16>
    %74 = vector.shape_cast %73 : vector<1x16x128xbf16> to vector<16x128xbf16>
    %cst_87 = arith.constant dense<0.000000e+00> : vector<168x128xf32>
    %75 = tpu.matmul %72, %74, %cst_87 {dimension_numbers = #tpu.dot_dimension_numbers<[1], [0], [0], [1], [0, 0, 1, 1], [], []>} : vector<168x16xbf16>, vector<16x128xbf16>, vector<168x128xf32> -> vector<168x128xf32>
    %76 = arith.addf %70, %75 : vector<168x128xf32>
    %c0_88 = arith.constant 0 : index
    %c0_89 = arith.constant 0 : index
    %c17_90 = arith.constant 17 : index
    %c0_91 = arith.constant 0 : index
    %77 = vector.load %arg3[%c0_88, %c0_89, %c17_90, %c0_91] : memref<1x1x208x16xbf16, #tpu.memory_space<vmem>>, vector<1x1x168x16xbf16>
    %78 = vector.shape_cast %77 : vector<1x1x168x16xbf16> to vector<168x16xbf16>
    %c4_92 = arith.constant 4 : index
    %c0_93 = arith.constant 0 : index
    %c0_94 = arith.constant 0 : index
    %79 = vector.load %arg5[%c4_92, %c0_93, %c0_94] : memref<9x16x128xbf16, #tpu.memory_space<vmem>>, vector<1x16x128xbf16>
    %80 = vector.shape_cast %79 : vector<1x16x128xbf16> to vector<16x128xbf16>
    %cst_95 = arith.constant dense<0.000000e+00> : vector<168x128xf32>
    %81 = tpu.matmul %78, %80, %cst_95 {dimension_numbers = #tpu.dot_dimension_numbers<[1], [0], [0], [1], [0, 0, 1, 1], [], []>} : vector<168x16xbf16>, vector<16x128xbf16>, vector<168x128xf32> -> vector<168x128xf32>
    %82 = arith.addf %76, %81 : vector<168x128xf32>
    %c0_96 = arith.constant 0 : index
    %c0_97 = arith.constant 0 : index
    %c18_98 = arith.constant 18 : index
    %c0_99 = arith.constant 0 : index
    %83 = vector.load %arg3[%c0_96, %c0_97, %c18_98, %c0_99] : memref<1x1x208x16xbf16, #tpu.memory_space<vmem>>, vector<1x1x168x16xbf16>
    %84 = vector.shape_cast %83 : vector<1x1x168x16xbf16> to vector<168x16xbf16>
    %c5_100 = arith.constant 5 : index
    %c0_101 = arith.constant 0 : index
    %c0_102 = arith.constant 0 : index
    %85 = vector.load %arg5[%c5_100, %c0_101, %c0_102] : memref<9x16x128xbf16, #tpu.memory_space<vmem>>, vector<1x16x128xbf16>
    %86 = vector.shape_cast %85 : vector<1x16x128xbf16> to vector<16x128xbf16>
    %cst_103 = arith.constant dense<0.000000e+00> : vector<168x128xf32>
    %87 = tpu.matmul %84, %86, %cst_103 {dimension_numbers = #tpu.dot_dimension_numbers<[1], [0], [0], [1], [0, 0, 1, 1], [], []>} : vector<168x16xbf16>, vector<16x128xbf16>, vector<168x128xf32> -> vector<168x128xf32>
    %88 = arith.addf %82, %87 : vector<168x128xf32>
    %c0_104 = arith.constant 0 : index
    %c0_105 = arith.constant 0 : index
    %c32_106 = arith.constant 32 : index
    %c0_107 = arith.constant 0 : index
    %89 = vector.load %arg3[%c0_104, %c0_105, %c32_106, %c0_107] : memref<1x1x208x16xbf16, #tpu.memory_space<vmem>>, vector<1x1x168x16xbf16>
    %90 = vector.shape_cast %89 : vector<1x1x168x16xbf16> to vector<168x16xbf16>
    %c6_108 = arith.constant 6 : index
    %c0_109 = arith.constant 0 : index
    %c0_110 = arith.constant 0 : index
    %91 = vector.load %arg5[%c6_108, %c0_109, %c0_110] : memref<9x16x128xbf16, #tpu.memory_space<vmem>>, vector<1x16x128xbf16>
    %92 = vector.shape_cast %91 : vector<1x16x128xbf16> to vector<16x128xbf16>
    %cst_111 = arith.constant dense<0.000000e+00> : vector<168x128xf32>
    %93 = tpu.matmul %90, %92, %cst_111 {dimension_numbers = #tpu.dot_dimension_numbers<[1], [0], [0], [1], [0, 0, 1, 1], [], []>} : vector<168x16xbf16>, vector<16x128xbf16>, vector<168x128xf32> -> vector<168x128xf32>
    %94 = arith.addf %88, %93 : vector<168x128xf32>
    %c0_112 = arith.constant 0 : index
    %c0_113 = arith.constant 0 : index
    %c33_114 = arith.constant 33 : index
    %c0_115 = arith.constant 0 : index
    %95 = vector.load %arg3[%c0_112, %c0_113, %c33_114, %c0_115] : memref<1x1x208x16xbf16, #tpu.memory_space<vmem>>, vector<1x1x168x16xbf16>
    %96 = vector.shape_cast %95 : vector<1x1x168x16xbf16> to vector<168x16xbf16>
    %c7_116 = arith.constant 7 : index
    %c0_117 = arith.constant 0 : index
    %c0_118 = arith.constant 0 : index
    %97 = vector.load %arg5[%c7_116, %c0_117, %c0_118] : memref<9x16x128xbf16, #tpu.memory_space<vmem>>, vector<1x16x128xbf16>
    %98 = vector.shape_cast %97 : vector<1x16x128xbf16> to vector<16x128xbf16>
    %cst_119 = arith.constant dense<0.000000e+00> : vector<168x128xf32>
    %99 = tpu.matmul %96, %98, %cst_119 {dimension_numbers = #tpu.dot_dimension_numbers<[1], [0], [0], [1], [0, 0, 1, 1], [], []>} : vector<168x16xbf16>, vector<16x128xbf16>, vector<168x128xf32> -> vector<168x128xf32>
    %100 = arith.addf %94, %99 : vector<168x128xf32>
    %c0_120 = arith.constant 0 : index
    %c0_121 = arith.constant 0 : index
    %c34_122 = arith.constant 34 : index
    %c0_123 = arith.constant 0 : index
    %101 = vector.load %arg3[%c0_120, %c0_121, %c34_122, %c0_123] : memref<1x1x208x16xbf16, #tpu.memory_space<vmem>>, vector<1x1x168x16xbf16>
    %102 = vector.shape_cast %101 : vector<1x1x168x16xbf16> to vector<168x16xbf16>
    %c8_124 = arith.constant 8 : index
    %c0_125 = arith.constant 0 : index
    %c0_126 = arith.constant 0 : index
    %103 = vector.load %arg5[%c8_124, %c0_125, %c0_126] : memref<9x16x128xbf16, #tpu.memory_space<vmem>>, vector<1x16x128xbf16>
    %104 = vector.shape_cast %103 : vector<1x16x128xbf16> to vector<16x128xbf16>
    %cst_127 = arith.constant dense<0.000000e+00> : vector<168x128xf32>
    %105 = tpu.matmul %102, %104, %cst_127 {dimension_numbers = #tpu.dot_dimension_numbers<[1], [0], [0], [1], [0, 0, 1, 1], [], []>} : vector<168x16xbf16>, vector<16x128xbf16>, vector<168x128xf32> -> vector<168x128xf32>
    %106 = arith.addf %100, %105 : vector<168x128xf32>
    %c0_128 = arith.constant 0 : index
    %c0_129 = arith.constant 0 : index
    %107 = vector.load %arg6[%c0_128, %c0_129] : memref<1x128xf32, #tpu.memory_space<vmem>>, vector<1x128xf32>
    %108 = vector.broadcast %107 : vector<1x128xf32> to vector<168x128xf32>
    %109 = arith.addf %106, %108 : vector<168x128xf32>
    %cst_130 = arith.constant 0.000000e+00 : f32
    %110 = vector.broadcast %cst_130 : f32 to vector<168x128xf32>
    %111 = arith.maximumf %109, %110 : vector<168x128xf32>
    %112 = tpu.iota {dimensions = array<i32: 0>} : vector<168x1xi32>
    %c16_i32 = arith.constant 16 : i32
    %c0_i32 = arith.constant 0 : i32
    %113 = arith.cmpi eq, %c16_i32, %c0_i32 : i32
    %c1_i32 = arith.constant 1 : i32
    %114 = arith.select %113, %c1_i32, %c16_i32 : i32
    %115 = vector.broadcast %114 : i32 to vector<168x1xi32>
    %116 = arith.remsi %112, %115 : vector<168x1xi32>
    %c0_i32_131 = arith.constant 0 : i32
    %117 = vector.broadcast %c0_i32_131 : i32 to vector<168x1xi32>
    %118 = arith.cmpi ne, %116, %117 : vector<168x1xi32>
    %c0_i32_132 = arith.constant 0 : i32
    %119 = vector.broadcast %c0_i32_132 : i32 to vector<168x1xi32>
    %120 = arith.cmpi slt, %116, %119 : vector<168x1xi32>
    %c0_i32_133 = arith.constant 0 : i32
    %121 = arith.cmpi slt, %114, %c0_i32_133 : i32
    %122 = vector.broadcast %121 : i1 to vector<168x1xi1>
    %123 = vector.broadcast %122 : vector<168x1xi1> to vector<168x1xi1>
    %124 = arith.xori %120, %123 : vector<168x1xi1>
    %125 = arith.andi %124, %118 : vector<168x1xi1>
    %126 = vector.broadcast %114 : i32 to vector<168x1xi32>
    %127 = arith.addi %116, %126 : vector<168x1xi32>
    %128 = arith.select %125, %127, %116 : vector<168x1xi1>, vector<168x1xi32>
    %c14_i32 = arith.constant 14 : i32
    %129 = vector.broadcast %c14_i32 : i32 to vector<168x1xi32>
    %130 = arith.cmpi slt, %128, %129 : vector<168x1xi32>
    %c128_i32 = arith.constant 128 : i32
    %131 = arith.muli %arg1, %c128_i32 : i32
    %132 = vector.broadcast %131 : i32 to vector<168x1xi32>
    %133 = arith.addi %112, %132 : vector<168x1xi32>
    %c224_i32 = arith.constant 224 : i32
    %134 = vector.broadcast %c224_i32 : i32 to vector<168x1xi32>
    %135 = arith.cmpi slt, %133, %134 : vector<168x1xi32>
    %136 = arith.andi %130, %135 : vector<168x1xi1>
    %cst_134 = arith.constant 0.000000e+00 : f32
    %137 = vector.shape_cast %136 : vector<168x1xi1> to vector<168x1xi1>
    %138 = vector.broadcast %137 : vector<168x1xi1> to vector<168x128xi1>
    %139 = vector.broadcast %cst_134 : f32 to vector<168x128xf32>
    %140 = arith.select %138, %111, %139 : vector<168x128xi1>, vector<168x128xf32>
    %141 = arith.truncf %140 : vector<168x128xf32> to vector<168x128xbf16>
    %c0_135 = arith.constant 0 : index
    %c0_136 = arith.constant 0 : index
    %c0_137 = arith.constant 0 : index
    %c0_138 = arith.constant 0 : index
    %142 = vector.load %arg7[%c0_135, %c0_136, %c0_137, %c0_138] : memref<1x1x168x128xbf16, #tpu.memory_space<vmem>>, vector<1x1x168x128xbf16>
    %143 = vector.shape_cast %142 : vector<1x1x168x128xbf16> to vector<168x128xbf16>
    %144 = vector.shape_cast %141 : vector<168x128xbf16> to vector<1x1x168x128xbf16>
    tpu.vector_store %arg7[%c0_135, %c0_136, %c0_137, %c0_138], %144 {strides = array<i32>} : memref<1x1x168x128xbf16, #tpu.memory_space<vmem>>, vector<1x1x168x128xbf16>,
    %145 = vector.extract_strided_slice %140 {offsets = [0, 0], sizes = [128, 128], strides = [1, 1]} : vector<168x128xf32> to vector<128x128xf32>
    %cst_139 = arith.constant dense<0.000000e+00> : vector<128xf32>
    %146 = vector.multi_reduction <add>, %145, %cst_139 [0] : vector<128x128xf32> to vector<128xf32>
    %147 = vector.shape_cast %146 : vector<128xf32> to vector<1x128xf32>
    %c0_140 = arith.constant 0 : index
    %c0_141 = arith.constant 0 : index
    %c0_142 = arith.constant 0 : index
    %c0_143 = arith.constant 0 : index
    %148 = vector.load %arg8[%c0_140, %c0_141, %c0_142, %c0_143] : memref<1x1x2x128xf32, #tpu.memory_space<vmem>>, vector<1x1x1x128xf32>
    %149 = vector.shape_cast %148 : vector<1x1x1x128xf32> to vector<1x128xf32>
    %150 = vector.shape_cast %147 : vector<1x128xf32> to vector<1x1x1x128xf32>
    tpu.vector_store %arg8[%c0_140, %c0_141, %c0_142, %c0_143], %150 {strides = array<i32>} : memref<1x1x2x128xf32, #tpu.memory_space<vmem>>, vector<1x1x1x128xf32>,
    %151 = arith.mulf %145, %145 : vector<128x128xf32>
    %cst_144 = arith.constant dense<0.000000e+00> : vector<128xf32>
    %152 = vector.multi_reduction <add>, %151, %cst_144 [0] : vector<128x128xf32> to vector<128xf32>
    %153 = vector.shape_cast %152 : vector<128xf32> to vector<1x128xf32>
    %c0_145 = arith.constant 0 : index
    %c0_146 = arith.constant 0 : index
    %c1_147 = arith.constant 1 : index
    %c0_148 = arith.constant 0 : index
    %154 = vector.load %arg8[%c0_145, %c0_146, %c1_147, %c0_148] : memref<1x1x2x128xf32, #tpu.memory_space<vmem>>, vector<1x1x1x128xf32>
    %155 = vector.shape_cast %154 : vector<1x1x1x128xf32> to vector<1x128xf32>
    %156 = vector.shape_cast %153 : vector<1x128xf32> to vector<1x1x1x128xf32>
    tpu.vector_store %arg8[%c0_145, %c0_146, %c1_147, %c0_148], %156 {strides = array<i32>} : memref<1x1x2x128xf32, #tpu.memory_space<vmem>>, vector<1x1x1x128xf32>,
    return
  }
  func.func @transform_0(%arg0: i32, %arg1: i32) -> (i32, i32, i32, i32) {
    %c0_i32 = arith.constant 0 : i32
    %c0_i32_0 = arith.constant 0 : i32
    %c0_i32_1 = arith.constant 0 : i32
    return %arg0, %arg1, %c0_i32, %c0_i32_0 : i32, i32, i32, i32
  }
  func.func @transform_1(%arg0: i32, %arg1: i32) -> (i32, i32, i32, i32) {
    %c0_i32 = arith.constant 0 : i32
    %c0_i32_0 = arith.constant 0 : i32
    %c0_i32_1 = arith.constant 0 : i32
    return %arg0, %arg1, %c0_i32, %c0_i32_0 : i32, i32, i32, i32
  }
  func.func @transform_2(%arg0: i32, %arg1: i32) -> (i32, i32, i32) {
    %c0_i32 = arith.constant 0 : i32
    %c0_i32_0 = arith.constant 0 : i32
    %c0_i32_1 = arith.constant 0 : i32
    %c0_i32_2 = arith.constant 0 : i32
    return %c0_i32, %c0_i32_0, %c0_i32_1 : i32, i32, i32
  }
  func.func @transform_3(%arg0: i32, %arg1: i32) -> (i32, i32, i32) {
    %c0_i32 = arith.constant 0 : i32
    %c0_i32_0 = arith.constant 0 : i32
    %c0_i32_1 = arith.constant 0 : i32
    %c0_i32_2 = arith.constant 0 : i32
    return %c0_i32, %c0_i32_0, %c0_i32_1 : i32, i32, i32
  }
  func.func @transform_4(%arg0: i32, %arg1: i32) -> (i32, i32) {
    %c0_i32 = arith.constant 0 : i32
    %c0_i32_0 = arith.constant 0 : i32
    %c0_i32_1 = arith.constant 0 : i32
    return %c0_i32, %c0_i32_0 : i32, i32
  }
  func.func @transform_5(%arg0: i32, %arg1: i32) -> (i32, i32, i32, i32) {
    %c0_i32 = arith.constant 0 : i32
    %c0_i32_0 = arith.constant 0 : i32
    %c0_i32_1 = arith.constant 0 : i32
    return %arg0, %arg1, %c0_i32, %c0_i32_0 : i32, i32, i32, i32
  }
  func.func @transform_6(%arg0: i32, %arg1: i32) -> (i32, i32, i32, i32) {
    %c0_i32 = arith.constant 0 : i32
    %c0_i32_0 = arith.constant 0 : i32
    %c0_i32_1 = arith.constant 0 : i32
    return %arg0, %arg1, %c0_i32, %c0_i32_0 : i32, i32, i32, i32
  }
}

module attributes {stable_mosaic.version = 11 : i64} {
  func.func @kernel(%arg0: i32, %arg1: i32, %arg2: memref<1x1x168x128xbf16, #tpu.memory_space<vmem>>, %arg3: memref<9x128x128xbf16, #tpu.memory_space<vmem>>, %arg4: memref<1x128xf32, #tpu.memory_space<vmem>>, %arg5: memref<1x1x128x128xbf16, #tpu.memory_space<vmem>>, %arg6: memref<1x1x2x128xf32, #tpu.memory_space<vmem>>) attributes {dimension_semantics = [#tpu.dimension_semantics<parallel>, #tpu.dimension_semantics<parallel>], iteration_bounds = array<i64: 2, 2>, scalar_prefetch = 0 : i64, scratch_operands = 0 : i64, tpu.core_type = #tpu.core_type<tc>, window_params = [{transform_indices = @transform_0, window_bounds = array<i64: 1, 1, 168, 128>}, {pipeline_mode = #tpu.pipeline_mode<synchronous>, transform_indices = @transform_1, window_bounds = array<i64: 9, 128, 128>}, {pipeline_mode = #tpu.pipeline_mode<synchronous>, transform_indices = @transform_2, window_bounds = array<i64: 1, 128>}, {transform_indices = @transform_3, window_bounds = array<i64: 1, 1, 128, 128>}, {transform_indices = @transform_4, window_bounds = array<i64: 1, 1, 2, 128>}]} {
    %c0 = arith.constant 0 : index
    %c0_0 = arith.constant 0 : index
    %c0_1 = arith.constant 0 : index
    %c0_2 = arith.constant 0 : index
    %0 = vector.load %arg2[%c0, %c0_0, %c0_1, %c0_2] : memref<1x1x168x128xbf16, #tpu.memory_space<vmem>>, vector<1x1x128x128xbf16>
    %1 = vector.shape_cast %0 : vector<1x1x128x128xbf16> to vector<128x128xbf16>
    %c0_3 = arith.constant 0 : index
    %c0_4 = arith.constant 0 : index
    %c0_5 = arith.constant 0 : index
    %2 = vector.load %arg3[%c0_3, %c0_4, %c0_5] : memref<9x128x128xbf16, #tpu.memory_space<vmem>>, vector<1x128x128xbf16>
    %3 = vector.shape_cast %2 : vector<1x128x128xbf16> to vector<128x128xbf16>
    %cst = arith.constant dense<0.000000e+00> : vector<128x128xf32>
    %4 = tpu.matmul %1, %3, %cst {dimension_numbers = #tpu.dot_dimension_numbers<[1], [0], [0], [1], [0, 0, 1, 1], [], []>} : vector<128x128xbf16>, vector<128x128xbf16>, vector<128x128xf32> -> vector<128x128xf32>
    %c0_6 = arith.constant 0 : index
    %c0_7 = arith.constant 0 : index
    %c1 = arith.constant 1 : index
    %c0_8 = arith.constant 0 : index
    %5 = vector.load %arg2[%c0_6, %c0_7, %c1, %c0_8] : memref<1x1x168x128xbf16, #tpu.memory_space<vmem>>, vector<1x1x128x128xbf16>
    %6 = vector.shape_cast %5 : vector<1x1x128x128xbf16> to vector<128x128xbf16>
    %c1_9 = arith.constant 1 : index
    %c0_10 = arith.constant 0 : index
    %c0_11 = arith.constant 0 : index
    %7 = vector.load %arg3[%c1_9, %c0_10, %c0_11] : memref<9x128x128xbf16, #tpu.memory_space<vmem>>, vector<1x128x128xbf16>
    %8 = vector.shape_cast %7 : vector<1x128x128xbf16> to vector<128x128xbf16>
    %cst_12 = arith.constant dense<0.000000e+00> : vector<128x128xf32>
    %9 = tpu.matmul %6, %8, %cst_12 {dimension_numbers = #tpu.dot_dimension_numbers<[1], [0], [0], [1], [0, 0, 1, 1], [], []>} : vector<128x128xbf16>, vector<128x128xbf16>, vector<128x128xf32> -> vector<128x128xf32>
    %10 = arith.addf %4, %9 : vector<128x128xf32>
    %c0_13 = arith.constant 0 : index
    %c0_14 = arith.constant 0 : index
    %c2 = arith.constant 2 : index
    %c0_15 = arith.constant 0 : index
    %11 = vector.load %arg2[%c0_13, %c0_14, %c2, %c0_15] : memref<1x1x168x128xbf16, #tpu.memory_space<vmem>>, vector<1x1x128x128xbf16>
    %12 = vector.shape_cast %11 : vector<1x1x128x128xbf16> to vector<128x128xbf16>
    %c2_16 = arith.constant 2 : index
    %c0_17 = arith.constant 0 : index
    %c0_18 = arith.constant 0 : index
    %13 = vector.load %arg3[%c2_16, %c0_17, %c0_18] : memref<9x128x128xbf16, #tpu.memory_space<vmem>>, vector<1x128x128xbf16>
    %14 = vector.shape_cast %13 : vector<1x128x128xbf16> to vector<128x128xbf16>
    %cst_19 = arith.constant dense<0.000000e+00> : vector<128x128xf32>
    %15 = tpu.matmul %12, %14, %cst_19 {dimension_numbers = #tpu.dot_dimension_numbers<[1], [0], [0], [1], [0, 0, 1, 1], [], []>} : vector<128x128xbf16>, vector<128x128xbf16>, vector<128x128xf32> -> vector<128x128xf32>
    %16 = arith.addf %10, %15 : vector<128x128xf32>
    %c0_20 = arith.constant 0 : index
    %c0_21 = arith.constant 0 : index
    %c16 = arith.constant 16 : index
    %c0_22 = arith.constant 0 : index
    %17 = vector.load %arg2[%c0_20, %c0_21, %c16, %c0_22] : memref<1x1x168x128xbf16, #tpu.memory_space<vmem>>, vector<1x1x128x128xbf16>
    %18 = vector.shape_cast %17 : vector<1x1x128x128xbf16> to vector<128x128xbf16>
    %c3 = arith.constant 3 : index
    %c0_23 = arith.constant 0 : index
    %c0_24 = arith.constant 0 : index
    %19 = vector.load %arg3[%c3, %c0_23, %c0_24] : memref<9x128x128xbf16, #tpu.memory_space<vmem>>, vector<1x128x128xbf16>
    %20 = vector.shape_cast %19 : vector<1x128x128xbf16> to vector<128x128xbf16>
    %cst_25 = arith.constant dense<0.000000e+00> : vector<128x128xf32>
    %21 = tpu.matmul %18, %20, %cst_25 {dimension_numbers = #tpu.dot_dimension_numbers<[1], [0], [0], [1], [0, 0, 1, 1], [], []>} : vector<128x128xbf16>, vector<128x128xbf16>, vector<128x128xf32> -> vector<128x128xf32>
    %22 = arith.addf %16, %21 : vector<128x128xf32>
    %c0_26 = arith.constant 0 : index
    %c0_27 = arith.constant 0 : index
    %c17 = arith.constant 17 : index
    %c0_28 = arith.constant 0 : index
    %23 = vector.load %arg2[%c0_26, %c0_27, %c17, %c0_28] : memref<1x1x168x128xbf16, #tpu.memory_space<vmem>>, vector<1x1x128x128xbf16>
    %24 = vector.shape_cast %23 : vector<1x1x128x128xbf16> to vector<128x128xbf16>
    %c4 = arith.constant 4 : index
    %c0_29 = arith.constant 0 : index
    %c0_30 = arith.constant 0 : index
    %25 = vector.load %arg3[%c4, %c0_29, %c0_30] : memref<9x128x128xbf16, #tpu.memory_space<vmem>>, vector<1x128x128xbf16>
    %26 = vector.shape_cast %25 : vector<1x128x128xbf16> to vector<128x128xbf16>
    %cst_31 = arith.constant dense<0.000000e+00> : vector<128x128xf32>
    %27 = tpu.matmul %24, %26, %cst_31 {dimension_numbers = #tpu.dot_dimension_numbers<[1], [0], [0], [1], [0, 0, 1, 1], [], []>} : vector<128x128xbf16>, vector<128x128xbf16>, vector<128x128xf32> -> vector<128x128xf32>
    %28 = arith.addf %22, %27 : vector<128x128xf32>
    %c0_32 = arith.constant 0 : index
    %c0_33 = arith.constant 0 : index
    %c18 = arith.constant 18 : index
    %c0_34 = arith.constant 0 : index
    %29 = vector.load %arg2[%c0_32, %c0_33, %c18, %c0_34] : memref<1x1x168x128xbf16, #tpu.memory_space<vmem>>, vector<1x1x128x128xbf16>
    %30 = vector.shape_cast %29 : vector<1x1x128x128xbf16> to vector<128x128xbf16>
    %c5 = arith.constant 5 : index
    %c0_35 = arith.constant 0 : index
    %c0_36 = arith.constant 0 : index
    %31 = vector.load %arg3[%c5, %c0_35, %c0_36] : memref<9x128x128xbf16, #tpu.memory_space<vmem>>, vector<1x128x128xbf16>
    %32 = vector.shape_cast %31 : vector<1x128x128xbf16> to vector<128x128xbf16>
    %cst_37 = arith.constant dense<0.000000e+00> : vector<128x128xf32>
    %33 = tpu.matmul %30, %32, %cst_37 {dimension_numbers = #tpu.dot_dimension_numbers<[1], [0], [0], [1], [0, 0, 1, 1], [], []>} : vector<128x128xbf16>, vector<128x128xbf16>, vector<128x128xf32> -> vector<128x128xf32>
    %34 = arith.addf %28, %33 : vector<128x128xf32>
    %c0_38 = arith.constant 0 : index
    %c0_39 = arith.constant 0 : index
    %c32 = arith.constant 32 : index
    %c0_40 = arith.constant 0 : index
    %35 = vector.load %arg2[%c0_38, %c0_39, %c32, %c0_40] : memref<1x1x168x128xbf16, #tpu.memory_space<vmem>>, vector<1x1x128x128xbf16>
    %36 = vector.shape_cast %35 : vector<1x1x128x128xbf16> to vector<128x128xbf16>
    %c6 = arith.constant 6 : index
    %c0_41 = arith.constant 0 : index
    %c0_42 = arith.constant 0 : index
    %37 = vector.load %arg3[%c6, %c0_41, %c0_42] : memref<9x128x128xbf16, #tpu.memory_space<vmem>>, vector<1x128x128xbf16>
    %38 = vector.shape_cast %37 : vector<1x128x128xbf16> to vector<128x128xbf16>
    %cst_43 = arith.constant dense<0.000000e+00> : vector<128x128xf32>
    %39 = tpu.matmul %36, %38, %cst_43 {dimension_numbers = #tpu.dot_dimension_numbers<[1], [0], [0], [1], [0, 0, 1, 1], [], []>} : vector<128x128xbf16>, vector<128x128xbf16>, vector<128x128xf32> -> vector<128x128xf32>
    %40 = arith.addf %34, %39 : vector<128x128xf32>
    %c0_44 = arith.constant 0 : index
    %c0_45 = arith.constant 0 : index
    %c33 = arith.constant 33 : index
    %c0_46 = arith.constant 0 : index
    %41 = vector.load %arg2[%c0_44, %c0_45, %c33, %c0_46] : memref<1x1x168x128xbf16, #tpu.memory_space<vmem>>, vector<1x1x128x128xbf16>
    %42 = vector.shape_cast %41 : vector<1x1x128x128xbf16> to vector<128x128xbf16>
    %c7 = arith.constant 7 : index
    %c0_47 = arith.constant 0 : index
    %c0_48 = arith.constant 0 : index
    %43 = vector.load %arg3[%c7, %c0_47, %c0_48] : memref<9x128x128xbf16, #tpu.memory_space<vmem>>, vector<1x128x128xbf16>
    %44 = vector.shape_cast %43 : vector<1x128x128xbf16> to vector<128x128xbf16>
    %cst_49 = arith.constant dense<0.000000e+00> : vector<128x128xf32>
    %45 = tpu.matmul %42, %44, %cst_49 {dimension_numbers = #tpu.dot_dimension_numbers<[1], [0], [0], [1], [0, 0, 1, 1], [], []>} : vector<128x128xbf16>, vector<128x128xbf16>, vector<128x128xf32> -> vector<128x128xf32>
    %46 = arith.addf %40, %45 : vector<128x128xf32>
    %c0_50 = arith.constant 0 : index
    %c0_51 = arith.constant 0 : index
    %c34 = arith.constant 34 : index
    %c0_52 = arith.constant 0 : index
    %47 = vector.load %arg2[%c0_50, %c0_51, %c34, %c0_52] : memref<1x1x168x128xbf16, #tpu.memory_space<vmem>>, vector<1x1x128x128xbf16>
    %48 = vector.shape_cast %47 : vector<1x1x128x128xbf16> to vector<128x128xbf16>
    %c8 = arith.constant 8 : index
    %c0_53 = arith.constant 0 : index
    %c0_54 = arith.constant 0 : index
    %49 = vector.load %arg3[%c8, %c0_53, %c0_54] : memref<9x128x128xbf16, #tpu.memory_space<vmem>>, vector<1x128x128xbf16>
    %50 = vector.shape_cast %49 : vector<1x128x128xbf16> to vector<128x128xbf16>
    %cst_55 = arith.constant dense<0.000000e+00> : vector<128x128xf32>
    %51 = tpu.matmul %48, %50, %cst_55 {dimension_numbers = #tpu.dot_dimension_numbers<[1], [0], [0], [1], [0, 0, 1, 1], [], []>} : vector<128x128xbf16>, vector<128x128xbf16>, vector<128x128xf32> -> vector<128x128xf32>
    %52 = arith.addf %46, %51 : vector<128x128xf32>
    %c0_56 = arith.constant 0 : index
    %c0_57 = arith.constant 0 : index
    %53 = vector.load %arg4[%c0_56, %c0_57] : memref<1x128xf32, #tpu.memory_space<vmem>>, vector<1x128xf32>
    %54 = vector.broadcast %53 : vector<1x128xf32> to vector<128x128xf32>
    %55 = arith.addf %52, %54 : vector<128x128xf32>
    %cst_58 = arith.constant 0.000000e+00 : f32
    %56 = vector.broadcast %cst_58 : f32 to vector<128x128xf32>
    %57 = arith.maximumf %55, %56 : vector<128x128xf32>
    %58 = tpu.iota {dimensions = array<i32: 0>} : vector<128x1xi32>
    %c16_i32 = arith.constant 16 : i32
    %c0_i32 = arith.constant 0 : i32
    %59 = arith.cmpi eq, %c16_i32, %c0_i32 : i32
    %c1_i32 = arith.constant 1 : i32
    %60 = arith.select %59, %c1_i32, %c16_i32 : i32
    %61 = vector.broadcast %60 : i32 to vector<128x1xi32>
    %62 = arith.remsi %58, %61 : vector<128x1xi32>
    %c0_i32_59 = arith.constant 0 : i32
    %63 = vector.broadcast %c0_i32_59 : i32 to vector<128x1xi32>
    %64 = arith.cmpi ne, %62, %63 : vector<128x1xi32>
    %c0_i32_60 = arith.constant 0 : i32
    %65 = vector.broadcast %c0_i32_60 : i32 to vector<128x1xi32>
    %66 = arith.cmpi slt, %62, %65 : vector<128x1xi32>
    %c0_i32_61 = arith.constant 0 : i32
    %67 = arith.cmpi slt, %60, %c0_i32_61 : i32
    %68 = vector.broadcast %67 : i1 to vector<128x1xi1>
    %69 = vector.broadcast %68 : vector<128x1xi1> to vector<128x1xi1>
    %70 = arith.xori %66, %69 : vector<128x1xi1>
    %71 = arith.andi %70, %64 : vector<128x1xi1>
    %72 = vector.broadcast %60 : i32 to vector<128x1xi32>
    %73 = arith.addi %62, %72 : vector<128x1xi32>
    %74 = arith.select %71, %73, %62 : vector<128x1xi1>, vector<128x1xi32>
    %c12_i32 = arith.constant 12 : i32
    %75 = vector.broadcast %c12_i32 : i32 to vector<128x1xi32>
    %76 = arith.cmpi slt, %74, %75 : vector<128x1xi32>
    %c128_i32 = arith.constant 128 : i32
    %77 = arith.muli %arg1, %c128_i32 : i32
    %78 = vector.broadcast %77 : i32 to vector<128x1xi32>
    %79 = arith.addi %58, %78 : vector<128x1xi32>
    %c192_i32 = arith.constant 192 : i32
    %80 = vector.broadcast %c192_i32 : i32 to vector<128x1xi32>
    %81 = arith.cmpi slt, %79, %80 : vector<128x1xi32>
    %82 = arith.andi %76, %81 : vector<128x1xi1>
    %cst_62 = arith.constant 0.000000e+00 : f32
    %83 = vector.shape_cast %82 : vector<128x1xi1> to vector<128x1xi1>
    %84 = vector.broadcast %83 : vector<128x1xi1> to vector<128x128xi1>
    %85 = vector.broadcast %cst_62 : f32 to vector<128x128xf32>
    %86 = arith.select %84, %57, %85 : vector<128x128xi1>, vector<128x128xf32>
    %87 = arith.truncf %86 : vector<128x128xf32> to vector<128x128xbf16>
    %c0_63 = arith.constant 0 : index
    %c0_64 = arith.constant 0 : index
    %c0_65 = arith.constant 0 : index
    %c0_66 = arith.constant 0 : index
    %88 = vector.load %arg5[%c0_63, %c0_64, %c0_65, %c0_66] : memref<1x1x128x128xbf16, #tpu.memory_space<vmem>>, vector<1x1x128x128xbf16>
    %89 = vector.shape_cast %88 : vector<1x1x128x128xbf16> to vector<128x128xbf16>
    %90 = vector.shape_cast %87 : vector<128x128xbf16> to vector<1x1x128x128xbf16>
    tpu.vector_store %arg5[%c0_63, %c0_64, %c0_65, %c0_66], %90 {strides = array<i32>} : memref<1x1x128x128xbf16, #tpu.memory_space<vmem>>, vector<1x1x128x128xbf16>,
    %cst_67 = arith.constant dense<0.000000e+00> : vector<128xf32>
    %91 = vector.multi_reduction <add>, %86, %cst_67 [0] : vector<128x128xf32> to vector<128xf32>
    %92 = vector.shape_cast %91 : vector<128xf32> to vector<1x128xf32>
    %c0_68 = arith.constant 0 : index
    %c0_69 = arith.constant 0 : index
    %c0_70 = arith.constant 0 : index
    %c0_71 = arith.constant 0 : index
    %93 = vector.load %arg6[%c0_68, %c0_69, %c0_70, %c0_71] : memref<1x1x2x128xf32, #tpu.memory_space<vmem>>, vector<1x1x1x128xf32>
    %94 = vector.shape_cast %93 : vector<1x1x1x128xf32> to vector<1x128xf32>
    %95 = vector.shape_cast %92 : vector<1x128xf32> to vector<1x1x1x128xf32>
    tpu.vector_store %arg6[%c0_68, %c0_69, %c0_70, %c0_71], %95 {strides = array<i32>} : memref<1x1x2x128xf32, #tpu.memory_space<vmem>>, vector<1x1x1x128xf32>,
    %96 = arith.mulf %86, %86 : vector<128x128xf32>
    %cst_72 = arith.constant dense<0.000000e+00> : vector<128xf32>
    %97 = vector.multi_reduction <add>, %96, %cst_72 [0] : vector<128x128xf32> to vector<128xf32>
    %98 = vector.shape_cast %97 : vector<128xf32> to vector<1x128xf32>
    %c0_73 = arith.constant 0 : index
    %c0_74 = arith.constant 0 : index
    %c1_75 = arith.constant 1 : index
    %c0_76 = arith.constant 0 : index
    %99 = vector.load %arg6[%c0_73, %c0_74, %c1_75, %c0_76] : memref<1x1x2x128xf32, #tpu.memory_space<vmem>>, vector<1x1x1x128xf32>
    %100 = vector.shape_cast %99 : vector<1x1x1x128xf32> to vector<1x128xf32>
    %101 = vector.shape_cast %98 : vector<1x128xf32> to vector<1x1x1x128xf32>
    tpu.vector_store %arg6[%c0_73, %c0_74, %c1_75, %c0_76], %101 {strides = array<i32>} : memref<1x1x2x128xf32, #tpu.memory_space<vmem>>, vector<1x1x1x128xf32>,
    return
  }
  func.func @transform_0(%arg0: i32, %arg1: i32) -> (i32, i32, i32, i32) {
    %c0_i32 = arith.constant 0 : i32
    %c0_i32_0 = arith.constant 0 : i32
    %c0_i32_1 = arith.constant 0 : i32
    return %arg0, %arg1, %c0_i32, %c0_i32_0 : i32, i32, i32, i32
  }
  func.func @transform_1(%arg0: i32, %arg1: i32) -> (i32, i32, i32) {
    %c0_i32 = arith.constant 0 : i32
    %c0_i32_0 = arith.constant 0 : i32
    %c0_i32_1 = arith.constant 0 : i32
    %c0_i32_2 = arith.constant 0 : i32
    return %c0_i32, %c0_i32_0, %c0_i32_1 : i32, i32, i32
  }
  func.func @transform_2(%arg0: i32, %arg1: i32) -> (i32, i32) {
    %c0_i32 = arith.constant 0 : i32
    %c0_i32_0 = arith.constant 0 : i32
    %c0_i32_1 = arith.constant 0 : i32
    return %c0_i32, %c0_i32_0 : i32, i32
  }
  func.func @transform_3(%arg0: i32, %arg1: i32) -> (i32, i32, i32, i32) {
    %c0_i32 = arith.constant 0 : i32
    %c0_i32_0 = arith.constant 0 : i32
    %c0_i32_1 = arith.constant 0 : i32
    return %arg0, %arg1, %c0_i32, %c0_i32_0 : i32, i32, i32, i32
  }
  func.func @transform_4(%arg0: i32, %arg1: i32) -> (i32, i32, i32, i32) {
    %c0_i32 = arith.constant 0 : i32
    %c0_i32_0 = arith.constant 0 : i32
    %c0_i32_1 = arith.constant 0 : i32
    return %arg0, %arg1, %c0_i32, %c0_i32_0 : i32, i32, i32, i32
  }
}

</mosaic_0001>

<bundles_post_ra>
// kernel: deconv_block_forward.3
= control target key start
LH: loop header
LB: loop body
LE: loop exit
PB: predicated region body
PF: predicated region fallthrough
CT: control target
= control target key end

     0   :  { %vm69_vm0 = vcmask 1043456   ;;  %vm44_vm1 = vcmask 64512   ;;  %s284_s1 = inlined_call_operand.vmem [shape: bf16[8,128], index: 1, kind: input, shape index: {}]   ;;  %s285_s0 = inlined_call_operand.vmem [shape: f32[128,8], index: 0, kind: input, shape index: {}]   ;;  %s286_s2 = inlined_call_operand.vmem [shape: f32[1,128], index: 2, kind: input, shape index: {}]   ;;  %s287_s3 = inlined_call_operand.vmem [shape: f32[128,128], index: 3, kind: output, shape index: {}]  }
   0x1   :  { %v39_v0 = vld [vmem:[%s284_s1] sm:$0xf]  ;;  %v16_v2 = vld [vmem:[%s285_s0 + $0x8] sm:$0xff]  ;;  %v17_v14 = vld [vmem:[%s285_s0 + $0x10] sm:$0xff] }
   0x2   :  { %v15_v1 = vld [vmem:[%s285_s0] sm:$0xff]  ;;  %v71_v3 = vsel %vm69_vm0, %v39_v0, 0  ;;  %v20_v6 = vld [vmem:[%s285_s0 + $0x28] sm:$0xff]  ;;  %v18_v15 = vld [vmem:[%s285_s0 + $0x18] sm:$0xff] }
   0x3   :  { %v31_v4 = vpack.c.bf16 %v16_v2, %v15_v1  ;;  %v19_v5 = vld [vmem:[%s285_s0 + $0x20] sm:$0xff]  ;;  %80 = vmatpush.bf16.msra.mxu0 %v71_v3  ;;  %150 = vmatpush.bf16.msra.mxu1 %v71_v3  ;;  %v24_v9 = vld [vmem:[%s285_s0 + $0x48] sm:$0xff]  ;;  %v21_v16 = vld [vmem:[%s285_s0 + $0x30] sm:$0xff]  ;;  %v32_v22 = vpack.c.bf16 %v18_v15, %v17_v14 }
   0x4   :  { %v23_v7 = vld [vmem:[%s285_s0 + $0x40] sm:$0xff]  ;;  %v33_v8 = vpack.c.bf16 %v20_v6, %v19_v5  ;;  %v28_v11 = vld [vmem:[%s285_s0 + $0x68] sm:$0xff]  ;;  %151 = vmatpush.bf16.msra.mxu2 %v71_v3  ;;  %152 = vmatpush.bf16.msra.mxu3 %v71_v3  ;;  %v22_v17 = vld [vmem:[%s285_s0 + $0x38] sm:$0xff] }
   0x5   :  { %v27_v10 = vld [vmem:[%s285_s0 + $0x60] sm:$0xff]  ;;  %v35_v12 = vpack.c.bf16 %v24_v9, %v23_v7  ;;  %v25_v18 = vld [vmem:[%s285_s0 + $0x50] sm:$0xff]  ;;  %v26_v19 = vld [vmem:[%s285_s0 + $0x58] sm:$0xff]  ;;  %v34_v23 = vpack.c.bf16 %v22_v17, %v21_v16 }
   0x6   :  { %v37_v13 = vpack.c.bf16 %v28_v11, %v27_v10  ;;  %142 = vmatmul.msk.bf16.vlgmr.msra.gmra.mxu0 %vm44_vm1, %v31_v4  ;;  %144 = vmatmul.msk.bf16.vlgmr.msra.gmra.mxu1 %vm44_vm1, %v33_v8  ;;  %v29_v20 = vld [vmem:[%s285_s0 + $0x70] sm:$0xff]  ;;  %v30_v21 = vld [vmem:[%s285_s0 + $0x78] sm:$0xff]  ;;  %v36_v24 = vpack.c.bf16 %v26_v19, %v25_v18  ;;  %v153_v26 = vld [vmem:[%s286_s2] ss:$0 sm:$0xff] }
   0x7   :  { %146 = vmatmul.msk.bf16.vlgmr.msra.gmra.mxu2 %vm44_vm1, %v35_v12  ;;  %v38_v25 = vpack.c.bf16 %v30_v21, %v29_v20 }
   0x8   :  { %148 = vmatmul.msk.bf16.vlgmr.msra.gmra.mxu3 %vm44_vm1, %v37_v13 }
  0x16   :  { %143 = vmatmul.msk.bf16.gmra.mxu0 %vm44_vm1, %v32_v22  ;;  %145 = vmatmul.msk.bf16.gmra.mxu1 %vm44_vm1, %v34_v23 }
  0x17   :  { %147 = vmatmul.msk.bf16.gmra.mxu2 %vm44_vm1, %v36_v24 }
  0x18   :  { %149 = vmatmul.msk.bf16.gmra.mxu3 %vm44_vm1, %v38_v25 }
  0x83   :  { %v82_v27 = vpop.f32.mrf.mxu0  ;;  %v92_v28 = vpop.f32.mrf.mxu1 }
  0x84   :  { %v83_v29 = vadd.f32 %v153_v26, %v82_v27  ;;  %v93_v30 = vadd.f32 %v153_v26, %v92_v28 }
  0x86   :  { %122 = vst [vmem:[%s287_s3] sm:$0xff] %v83_v29 }
  0x87   :  { %126 = vst [vmem:[%s287_s3 + $0x20] sm:$0xff] %v93_v30 }
  0x8a   :  { %v102_v31 = vpop.f32.mrf.mxu2 }
  0x8b   :  { %v112_v32 = vpop.f32.mrf.mxu3  ;;  %v103_v33 = vadd.f32 %v153_v26, %v102_v31  ;;  %v84_v35 = vpop.f32.mrf.mxu0 }
  0x8c   :  { %v113_v34 = vadd.f32 %v153_v26, %v112_v32  ;;  %v94_v36 = vpop.f32.mrf.mxu1  ;;  %v85_v37 = vadd.f32 %v153_v26, %v84_v35 }
  0x8d   :  { %v95_v38 = vadd.f32 %v153_v26, %v94_v36  ;;  %130 = vst [vmem:[%s287_s3 + $0x40] sm:$0xff] %v103_v33 }
  0x8e   :  { %134 = vst [vmem:[%s287_s3 + $0x60] sm:$0xff] %v113_v34 }
  0x8f   :  { %123 = vst [vmem:[%s287_s3 + $0x8] sm:$0xff] %v85_v37 }
  0x90   :  { %127 = vst [vmem:[%s287_s3 + $0x28] sm:$0xff] %v95_v38 }
  0x92   :  { %v104_v39 = vpop.f32.mrf.mxu2 }
  0x93   :  { %v114_v40 = vpop.f32.mrf.mxu3  ;;  %v105_v41 = vadd.f32 %v153_v26, %v104_v39  ;;  %v87_v43 = vpop.f32.mrf.mxu0 }
  0x94   :  { %v115_v42 = vadd.f32 %v153_v26, %v114_v40  ;;  %v97_v44 = vpop.f32.mrf.mxu1  ;;  %v88_v45 = vadd.f32 %v153_v26, %v87_v43 }
  0x95   :  { %v98_v46 = vadd.f32 %v153_v26, %v97_v44  ;;  %131 = vst [vmem:[%s287_s3 + $0x48] sm:$0xff] %v105_v41 }
  0x96   :  { %135 = vst [vmem:[%s287_s3 + $0x68] sm:$0xff] %v115_v42 }
  0x97   :  { %124 = vst [vmem:[%s287_s3 + $0x10] sm:$0xff] %v88_v45 }
  0x98   :  { %128 = vst [vmem:[%s287_s3 + $0x30] sm:$0xff] %v98_v46 }
  0x9a   :  { %v107_v47 = vpop.f32.mrf.mxu2 }
  0x9b   :  { %v117_v48 = vpop.f32.mrf.mxu3  ;;  %v108_v49 = vadd.f32 %v153_v26, %v107_v47  ;;  %v89_v51 = vpop.f32.mrf.mxu0 }
  0x9c   :  { %v118_v50 = vadd.f32 %v153_v26, %v117_v48  ;;  %v99_v52 = vpop.f32.mrf.mxu1  ;;  %v90_v53 = vadd.f32 %v153_v26, %v89_v51 }
  0x9d   :  { %v100_v54 = vadd.f32 %v153_v26, %v99_v52  ;;  %132 = vst [vmem:[%s287_s3 + $0x50] sm:$0xff] %v108_v49 }
  0x9e   :  { %136 = vst [vmem:[%s287_s3 + $0x70] sm:$0xff] %v118_v50 }
  0x9f   :  { %125 = vst [vmem:[%s287_s3 + $0x18] sm:$0xff] %v90_v53 }
  0xa0   :  { %129 = vst [vmem:[%s287_s3 + $0x38] sm:$0xff] %v100_v54 }
  0xa2   :  { %v109_v55 = vpop.f32.mrf.mxu2 }
  0xa3   :  { %v119_v56 = vpop.f32.mrf.mxu3  ;;  %v110_v57 = vadd.f32 %v153_v26, %v109_v55 }
  0xa4   :  { %v120_v58 = vadd.f32 %v153_v26, %v119_v56 }
  0xa5   :  { %133 = vst [vmem:[%s287_s3 + $0x58] sm:$0xff] %v110_v57 }
  0xa6   :  { %137 = vst [vmem:[%s287_s3 + $0x78] sm:$0xff] %v120_v58 }

// kernel: deconv_block_forward.5
= control target key start
LH: loop header
LB: loop body
LE: loop exit
PB: predicated region body
PF: predicated region fallthrough
CT: control target
= control target key end

     0   :  { %s3507_s15 = smov 0   ;;  %s3509_s16 = smov 0   ;;  %s4147_s0 = inlined_call_operand.vmem [shape: bf16[2,2,168,128], index: 0, kind: input, shape index: {}]   ;;  %s4148_s1 = inlined_call_operand.vmem [shape: bf16[9,128,128], index: 1, kind: input, shape index: {}]   ;;  %s4149_s2 = inlined_call_operand.vmem [shape: f32[1,128], index: 2, kind: input, shape index: {}]   ;;  %s4150_s3 = inlined_call_operand.vmem [shape: bf16[2,2,128,128], index: 3, kind: output, shape index: {0}]   ;;  %s4151_s4 = inlined_call_operand.vmem [shape: f32[2,2,2,128], index: 4, kind: output, shape index: {1}]  }
   0x1   :  { %s3511_s17 = smov 0   ;;  %s3513_s18 = smov 0  }
   0x2   :  { %s3515_s19 = smov 0  }
   0x3 LB: > { %s24_s20 = sadd.s32 1, %s3472_s17  ;;  %s27_s21 = sadd.s32 1, %s3476_s18  ;;  %s3480_s19 = sphi %s3515_s19, %s15_s19   ;;  %s3476_s18 = sphi %s3513_s18, %s4155_s18   ;;  %s3472_s17 = sphi %s3511_s17, %s4154_s17   ;;  %s3468_s16 = sphi %s3509_s16, %s4153_s16   ;;  %s3464_s15 = sphi %s3507_s15, %s4152_s15  }
   0x4   : > { %p25_p0 = scmp.ge.s32.totalorder %s24_s20, 2  ;;  %p2622_p1 = scmp.ge.s32.totalorder %s3480_s19, 1 }
   0x5   : > { %p187_p2 = scmp.lt.s32.totalorder %s3480_s19, 5 }
   0x6   : > { %s4157_s20 = smov (%p25_p0, %s24_s20), 0  ;;  %s4159_s21 = smov (!%p25_p0, %s27_s21), %s3476_s18 }
   0x7   : > { %p188_p3 = pnand %p2622_p1, %p187_p2  ;;  %p29_p4 = scmp.ge.s32.totalorder %s4159_s21, 2 }
   0x8   : > { %p229_p5 = scmp.lt.s32.totalorder (!%p188_p3), %s3468_s16, 1  ;;  %p231_p6 = scmp.lt.s32.totalorder (!%p188_p3), %s3464_s15, 1 }
   0x9   : > { %s4161_s21 = smov (%p29_p4, %s4159_s21), 0  ;;  %191 = sbr.rel (%p188_p3) target bundleno = 486 (0x1e6), region = 32 }
   0xe   : > { %v3218_v0 = vld [vmem:[%s4148_s1 + $0x78] sm:$0xff]  ;;  %v3217_v1 = vld [vmem:[%s4148_s1 + $0x70] sm:$0xff]  ;;  %s4163_s16 = smov (!%p229_p5, %s3468_s16), 1  ;;  %v3216_v2 = vld [vmem:[%s4148_s1 + $0x68] sm:$0xff]  ;;  %vm348_vm0 = vsmask.f32 7424 }
   0xf   : > { %3375 = vmatpush.bf16.msra.mxu1 %v3218_v0  ;;  %3376 = vmatpush.bf16.msra.mxu2 %v3218_v0  ;;  %s3549_s26 = scalar_select %p231_p6, %s3464_s15, 1  ;;  %v3215_v3 = vld [vmem:[%s4148_s1 + $0x60] sm:$0xff]  ;;  %v3214_v4 = vld [vmem:[%s4148_s1 + $0x58] sm:$0xff]  ;;  %v3213_v11 = vld [vmem:[%s4148_s1 + $0x50] sm:$0xff]  ;;  %vm648_vm1 = vcmask 1046528  }
  0x10   : > { %3377 = vmatpush.bf16.msra.mxu3 %v3218_v0  ;;  %473 = vmatpush.bf16.msra.mxu0 %v3218_v0  ;;  %s3400_s27 = smul.u32 42, %s4163_s16  ;;  %v3212_v22 = vld [vmem:[%s4148_s1 + $0x48] sm:$0xff]  ;;  %v3211_v31 = vld [vmem:[%s4148_s1 + $0x40] sm:$0xff]  ;;  %v3226_v40 = vld [vmem:[%s4148_s1 + $0xb8] sm:$0xff]  ;;  %s2625_s14 = sshll.u32 %s4163_s16, 5 }
  0x11   : > { %s3399_s28 = smul.u32 21, %s3549_s26  ;;  %v3210_v41 = vld [vmem:[%s4148_s1 + $0x38] sm:$0xff]  ;;  %v3225_v50 = vld [vmem:[%s4148_s1 + $0xb0] sm:$0xff]  ;;  %v3224_v55 = vld [vmem:[%s4148_s1 + $0xa8] sm:$0xff] }
  0x12   : > { %v3242_v46 = vld [vmem:[%s4148_s1 + $0xf8] sm:$0xff]  ;;  %v3209_v51 = vld [vmem:[%s4148_s1 + $0x30] sm:$0xff]  ;;  %v3208_v56 = vld [vmem:[%s4148_s1 + $0x28] sm:$0xff] }
  0x13   : > { %3378 = vmatpush.bf16.msra.mxu1 %v3217_v1  ;;  %3379 = vmatpush.bf16.msra.mxu2 %v3217_v1  ;;  %s235_s5 = sadd.s32 %s3400_s27, %s3399_s28  ;;  %v3257_v48 = vld [vmem:[%s4148_s1 + $0x138] sm:$0xff]  ;;  %v3241_v52 = vld [vmem:[%s4148_s1 + $0xf0] sm:$0xff]  ;;  %v3240_v59 = vld [vmem:[%s4148_s1 + $0xe8] sm:$0xff]  ;;  %s2627_s28 = sshll.u32 %s4163_s16, 1 }
  0x14   : > { %3380 = vmatpush.bf16.msra.mxu3 %v3217_v1  ;;  %474 = vmatpush.bf16.msra.mxu0 %v3217_v1  ;;  %s2623_s6 = sshll.u32 %s235_s5, 2  ;;  %v3256_v53 = vld [vmem:[%s4148_s1 + $0x130] sm:$0xff]  ;;  %v3255_v60 = vld [vmem:[%s4148_s1 + $0x128] sm:$0xff]  ;;  %v3223_v0 = vld [vmem:[%s4148_s1 + $0xa0] sm:$0xff]  ;;  %s252_s29 = sadd.s32 %s2627_s28, %s3549_s26 }
  0x15   : > { %s3562_s11 = scalar_lea.vmem %s4147_s0, %s2623_s6  ;;  %v3207_v1 = vld [vmem:[%s4148_s1 + $0x20] sm:$0xff]  ;;  %s2628_s30 = sshll.u32 %s252_s29, 1 }
  0x16   : > { %v3568_v5 = vld [vmem:[%s3562_s11 + $0x10] sm:$0xff]  ;;  %v3571_v6 = vld [vmem:[%s3562_s11 + $0x20] sm:$0xff]  ;;  %v3580_v9 = vld [vmem:[%s3562_s11 + $0x18] sm:$0xff]  ;;  %s254_s7 = scalar_lea.vmem %s4151_s4, %s2628_s30 }
  0x17   : > { %3381 = vmatpush.bf16.msra.mxu1 %v3216_v2  ;;  %3382 = vmatpush.bf16.msra.mxu2 %v3216_v2  ;;  %v3574_v7 = vld [vmem:[%s3562_s11 + $0x30] sm:$0xff]  ;;  %v3577_v8 = vld [vmem:[%s3562_s11] sm:$0xff]   ;;  %v3583_v10 = vld [vmem:[%s3562_s11 + $0x28] sm:$0xff]  ;;  %v365_v12 = vshll.u32 %v3568_v5, 16  ;;  %v381_v13 = vshll.u32 %v3571_v6, 16  ;;  %v369_v18 = vshrl.u32 %v3568_v5, 16 }
  0x18   : > { %3383 = vmatpush.bf16.msra.mxu3 %v3216_v2  ;;  %475 = vmatpush.bf16.msra.mxu0 %v3216_v2  ;;  %v3591_v14 = vld [vmem:[%s3562_s11 + $0x38] sm:$0xff]  ;;  %v397_v15 = vshll.u32 %v3574_v7, 16  ;;  %v3595_v16 = vld [vmem:[%s3562_s11 + $0x8] sm:$0xff]  ;;  %v352_v17 = vshll.u32 %v3577_v8, 16  ;;  %v373_v19 = vshll.u32 %v3580_v9, 16  ;;  %v385_v20 = vshrl.u32 %v3571_v6, 16 }
  0x19   : > { %v389_v21 = vshll.u32 %v3583_v10, 16  ;;  %v3605_v23 = vrot.slane %v365_v12, 1  ;;  %v3607_v24 = vrot.slane %v381_v13, 1  ;;  %v401_v25 = vshrl.u32 %v3574_v7, 16  ;;  %v287_v42 = vld [vmem:[%s3562_s11 + $0x40] sm:$0x1] }
  0x1a   : > { %v405_v26 = vshll.u32 %v3591_v14, 16  ;;  %v3611_v27 = vrot.slane %v397_v15, 1  ;;  %v350_v28 = vshrl.u32 %v3577_v8, 16  ;;  %v354_v29 = vrot.slane %v352_v17, 1  ;;  %v3222_v17 = vld [vmem:[%s4148_s1 + $0x98] sm:$0xff] }
  0x1b   : > { %3384 = vmatpush.bf16.msra.mxu1 %v3215_v3  ;;  %3385 = vmatpush.bf16.msra.mxu2 %v3215_v3  ;;  %v357_v30 = vshll.u32 %v3595_v16, 16  ;;  %v371_v32 = vor.u32 %v369_v18, %v3605_v23  ;;  %v375_v33 = vrot.slane %v373_v19, 1  ;;  %v387_v34 = vor.u32 %v385_v20, %v3607_v24  ;;  %v3206_v18 = vld [vmem:[%s4148_s1 + $0x18] sm:$0xff] }
  0x1c   : > { %3386 = vmatpush.bf16.msra.mxu3 %v3215_v3  ;;  %476 = vmatpush.bf16.msra.mxu0 %v3215_v3  ;;  %v391_v35 = vrot.slane %v389_v21, 1  ;;  %v403_v36 = vor.u32 %v401_v25, %v3611_v27  ;;  %v407_v37 = vrot.slane %v405_v26, 1  ;;  %v355_v38 = vor.u32 %v354_v29, %v350_v28  ;;  %v3221_v26 = vld [vmem:[%s4148_s1 + $0x90] sm:$0xff]  ;;  %v3360_v28 = vld [vmem:[%s3562_s11 + $0x8] sm:$0xff]  }
  0x1d   : > { %v359_v39 = vrot.slane %v357_v30, 1  ;;  %v376_v43 = vsel %vm348_vm0, %v371_v32, %v375_v33  ;;  %v338_v49 = vunpack.c.l.b16 %v287_v42  ;;  %v377_v57 = vshrl.u32 %v3580_v9, 16  ;;  %v3252_v29 = vld [vmem:[%s4148_s1 + $0x110] sm:$0xff]  ;;  %v3357_v30 = vld [vmem:[%s3562_s11] sm:$0xf0] }
  0x1e   : > { %v392_v44 = vsel %vm348_vm0, %v387_v34, %v391_v35  ;;  %v408_v45 = vsel %vm348_vm0, %v403_v36, %v407_v37  ;;  %v393_v58 = vshrl.u32 %v3583_v10, 16  ;;  %v409_v61 = vshrl.u32 %v3591_v14, 16  ;;  %v3716_v32 = vld [vmem:[%s3562_s11 + $0x10] sm:$0xff]  ;;  %v3220_v34 = vld [vmem:[%s4148_s1 + $0x88] sm:$0xff]  ;;  %v3219_v42 = vld [vmem:[%s4148_s1 + $0x80] sm:$0xff] }
  0x1f   : > { %3387 = vmatpush.bf16.msra.mxu1 %v3214_v4  ;;  %3388 = vmatpush.bf16.msra.mxu2 %v3214_v4  ;;  %v360_v47 = vsel %vm348_vm0, %v355_v38, %v359_v39  ;;  %v3650_v54 = vpack.c.b16 %v338_v49, %v338_v49  ;;  %v361_v63 = vshrl.u32 %v3595_v16, 16  ;;  %v379_v2 = vor.u32 %v377_v57, %v375_v33  ;;  %v3251_v38 = vld [vmem:[%s4148_s1 + $0x108] sm:$0xff]  ;;  %v3250_v49 = vld [vmem:[%s4148_s1 + $0x100] sm:$0xff] }
  0x20   : > { %3389 = vmatpush.bf16.msra.mxu3 %v3214_v4  ;;  %477 = vmatpush.bf16.msra.mxu0 %v3214_v4  ;;  %v395_v3 = vor.u32 %v393_v58, %v391_v35  ;;  %v3239_v4 = vld [vmem:[%s4148_s1 + $0xe0] sm:$0xff]  ;;  %v411_v12 = vor.u32 %v409_v61, %v407_v37  ;;  %v1061_v33 = vshll.u32 %v3360_v28, 16  ;;  %v3204_v35 = vld [vmem:[%s4148_s1 + $0x8] sm:$0xff]  ;;  %v3280_v58 = vld [vmem:[%s4148_s1 + $0x1b0] sm:$0xff] }
  0x21   : > { %v413_v62 = vshll.u32 %v3650_v54, 16  ;;  %v363_v15 = vor.u32 %v361_v63, %v359_v39  ;;  %v384_v19 = vsel %vm348_vm0, %v379_v2, %v3607_v24  ;;  %v3253_v24 = vld [vmem:[%s4148_s1 + $0x118] sm:$0xff]  ;;  %v3236_v37 = vld [vmem:[%s4148_s1 + $0xc8] sm:$0xff]  ;;  %v1059_v39 = vshrl.u32 %v3360_v28, 16  ;;  %v3303_v61 = vld [vmem:[%s4148_s1 + $0x230] sm:$0xff] }
  0x22   : > { %v400_v20 = vsel %vm348_vm0, %v395_v3, %v3611_v27  ;;  %v3205_v27 = vld [vmem:[%s4148_s1 + $0x10] sm:$0xff]  ;;  %v3279_v63 = vld [vmem:[%s4148_s1 + $0x1a8] sm:$0xff]  ;;  %v1070_v2 = vshrl.u32 %v3716_v32, 16 }
  0x23   : > { %3390 = vmatpush.bf16.msra.mxu1 %v3213_v11  ;;  %3391 = vmatpush.bf16.msra.mxu2 %v3213_v11  ;;  %v415_v13 = vrot.slane %v413_v62, 1  ;;  %v368_v25 = vsel %vm348_vm0, %v363_v15, %v3605_v23  ;;  %v3237_v23 = vld [vmem:[%s4148_s1 + $0xd0] sm:$0xff]  ;;  %v3773_v62 = vld [vmem:[%s3562_s11 + $0x18] sm:$0xff] }
  0x24   : > { %3392 = vmatpush.bf16.msra.mxu3 %v3213_v11  ;;  %478 = vmatpush.bf16.msra.mxu0 %v3213_v11  ;;  %v3254_v11 = vld [vmem:[%s4148_s1 + $0x120] sm:$0xff]  ;;  %v1074_v3 = vshll.u32 %v3773_v62, 16  ;;  %v3228_v15 = vld [vmem:[%s3562_s11 + $0x10] sm:$0xff] }
  0x25   : > { %v416_v21 = vsel %vm348_vm0, %v411_v12, %v415_v13 }
  0x26   : > { %v1076_v12 = vrot.slane %v1074_v3, 1 }
  0x27   : > { %3393 = vmatpush.bf16.msra.mxu1 %v3212_v22  ;;  %3394 = vmatpush.bf16.msra.mxu2 %v3212_v22 }
  0x28   : > { %3395 = vmatpush.bf16.msra.mxu3 %v3212_v22  ;;  %479 = vmatpush.bf16.msra.mxu0 %v3212_v22  ;;  %v3238_v22 = vld [vmem:[%s4148_s1 + $0xd8] sm:$0xff] }
  0x2b   : > { %3396 = vmatpush.bf16.msra.mxu1 %v3211_v31  ;;  %3397 = vmatpush.bf16.msra.mxu2 %v3211_v31 }
  0x2c   : > { %3398 = vmatpush.bf16.msra.mxu3 %v3211_v31  ;;  %480 = vmatpush.bf16.msra.mxu0 %v3211_v31  ;;  %v3358_v31 = vld [vmem:[%s3562_s11] sm:$0xe] }
  0x2d   : > { %v3359_v36 = vor.u32 %v3358_v31, %v3357_v30  ;;  %v3277_v30 = vld [vmem:[%s4148_s1 + $0x198] sm:$0xff] }
  0x2e   : > { %491 = vmatmul.bf16.vlgmr.msra.gmra.mxu1 %v376_v43  ;;  %501 = vmatmul.bf16.vlgmr.msra.gmra.mxu2 %v392_v44  ;;  %v3203_v43 = vld [vmem:[%s4148_s1] sm:$0xff]  ;;  %v3281_v44 = vld [vmem:[%s4148_s1 + $0x1b8] sm:$0xff] }
  0x2f   : > { %722 = vmatpush.bf16.msrb.mxu2 %v3226_v40  ;;  %578 = vmatpush.bf16.msrb.mxu1 %v3210_v41  ;;  %v1063_v40 = vrot.slane %v1061_v33, 1  ;;  %v1066_v41 = vshll.u32 %v3716_v32, 16  ;;  %v3292_v31 = vld [vmem:[%s4148_s1 + $0x1d8] sm:$0xff] }
  0x30   : > { %511 = vmatmul.bf16.vlgmr.msra.gmra.mxu3 %v408_v45  ;;  %481 = vmatmul.bf16.vlgmr.msra.gmra.mxu0 %v360_v47  ;;  %v3265_v45 = vld [vmem:[%s4148_s1 + $0x178] sm:$0xff]  ;;  %v650_v47 = vrot.slane %v3595_v16, 1 }
  0x31   : > { %916 = vmatpush.bf16.msrb.mxu3 %v3242_v46  ;;  %1182 = vmatpush.bf16.msrb.mxu0 %v3257_v48  ;;  %v649_v46 = vrot.slane %v3359_v36, 1  ;;  %v3235_v48 = vld [vmem:[%s4148_s1 + $0xc0] sm:$0xff]  ;;  %v3261_v33 = vld [vmem:[%s4148_s1 + $0x158] sm:$0xff] }
  0x33   : > { %723 = vmatpush.bf16.msrb.mxu2 %v3225_v50  ;;  %579 = vmatpush.bf16.msrb.mxu1 %v3209_v51  ;;  %v1064_v50 = vor.u32 %v1063_v40, %v1059_v39  ;;  %v1068_v51 = vrot.slane %v1066_v41, 1  ;;  %v3230_v41 = vld [vmem:[%s3562_s11 + $0x20] sm:$0xff] }
  0x35   : > { %917 = vmatpush.bf16.msrb.mxu3 %v3241_v52  ;;  %1183 = vmatpush.bf16.msrb.mxu0 %v3256_v53  ;;  %v3296_v52 = vld [vmem:[%s4148_s1 + $0x1f8] sm:$0xff]  ;;  %v1069_v57 = vsel %vm348_vm0, %v1064_v50, %v1068_v51 }
  0x36   : > { %v3304_v53 = vld [vmem:[%s4148_s1 + $0x238] sm:$0xff] }
  0x37   : > { %724 = vmatpush.bf16.msrb.mxu2 %v3224_v55  ;;  %580 = vmatpush.bf16.msrb.mxu1 %v3208_v56  ;;  %v651_v55 = vsel %vm648_vm1, %v649_v46, %v650_v47  ;;  %v3227_v56 = vld [vmem:[%s3562_s11 + $0x8] sm:$0xff]  ;;  %v3848_v46 = vld [vmem:[%s3562_s11 + $0x30] sm:$0xff] }
  0x39   : > { %918 = vmatpush.bf16.msrb.mxu3 %v3240_v59  ;;  %1184 = vmatpush.bf16.msrb.mxu0 %v3255_v60  ;;  %v3264_v59 = vld [vmem:[%s4148_s1 + $0x170] sm:$0xff] }
  0x3a   : > { %v3295_v60 = vld [vmem:[%s4148_s1 + $0x1f0] sm:$0xff] }
  0x3b   : > { %725 = vmatpush.bf16.msrb.mxu2 %v3223_v0  ;;  %581 = vmatpush.bf16.msrb.mxu1 %v3207_v1  ;;  %v3263_v0 = vld [vmem:[%s4148_s1 + $0x168] sm:$0xff] }
  0x3c   : > { %v3302_v1 = vld [vmem:[%s4148_s1 + $0x228] sm:$0xff] }
  0x3d   : > { %919 = vmatpush.bf16.msrb.mxu3 %v3239_v4  ;;  %1185 = vmatpush.bf16.msrb.mxu0 %v3254_v11  ;;  %v652_v4 = vrot.slane %v3568_v5, 1  ;;  %v1072_v11 = vor.u32 %v1070_v2, %v1068_v51  ;;  %v3232_v2 = vld [vmem:[%s3562_s11 + $0x30] sm:$0xff] }
  0x3e   : > { %496 = vmatmul.bf16.gmra.mxu1 %v384_v19  ;;  %506 = vmatmul.bf16.gmra.mxu2 %v400_v20  ;;  %v3293_v19 = vld [vmem:[%s4148_s1 + $0x1e0] sm:$0xff] }
  0x3f   : > { %726 = vmatpush.bf16.msrb.mxu2 %v3222_v17  ;;  %582 = vmatpush.bf16.msrb.mxu1 %v3206_v18  ;;  %v653_v13 = vsel %vm648_vm1, %v650_v47, %v652_v4  ;;  %v1077_v17 = vsel %vm348_vm0, %v1072_v11, %v1076_v12  ;;  %v3278_v18 = vld [vmem:[%s4148_s1 + $0x1a0] sm:$0xff] }
  0x40   : > { %516 = vmatmul.bf16.gmra.mxu3 %v416_v21  ;;  %486 = vmatmul.bf16.gmra.mxu0 %v368_v25  ;;  %v3262_v20 = vld [vmem:[%s4148_s1 + $0x160] sm:$0xff] }
  0x41   : > { %920 = vmatpush.bf16.msrb.mxu3 %v3238_v22  ;;  %1186 = vmatpush.bf16.msrb.mxu0 %v3253_v24  ;;  %v3804_v21 = vld [vmem:[%s3562_s11 + $0x20] sm:$0xff]  ;;  %v1078_v22 = vshrl.u32 %v3773_v62, 16  ;;  %v654_v24 = vrot.slane %v3580_v9, 1 }
  0x42   : > { %v1082_v25 = vshll.u32 %v3804_v21, 16  ;;  %v3289_v11 = vld [vmem:[%s4148_s1 + $0x1c0] sm:$0xff] }
  0x43   : > { %727 = vmatpush.bf16.msrb.mxu2 %v3221_v26  ;;  %583 = vmatpush.bf16.msrb.mxu1 %v3205_v27  ;;  %v1080_v26 = vor.u32 %v1078_v22, %v1076_v12  ;;  %v655_v28 = vsel %vm648_vm1, %v652_v4, %v654_v24  ;;  %v3274_v4 = vld [vmem:[%s4148_s1 + $0x180] sm:$0xff] }
  0x44   : > { %v1084_v27 = vrot.slane %v1082_v25, 1  ;;  %v3889_v12 = vld [vmem:[%s3562_s11 + $0x40] sm:$0xff] }
  0x45   : > { %921 = vmatpush.bf16.msrb.mxu3 %v3237_v23  ;;  %1187 = vmatpush.bf16.msrb.mxu0 %v3252_v29  ;;  %v3229_v23 = vld [vmem:[%s3562_s11 + $0x18] sm:$0xff] }
  0x46   : > { %v1085_v29 = vsel %vm348_vm0, %v1080_v26, %v1084_v27 }
  0x47   : > { %728 = vmatpush.bf16.msrb.mxu2 %v3220_v34  ;;  %584 = vmatpush.bf16.msrb.mxu1 %v3204_v35  ;;  %v3826_v34 = vld [vmem:[%s3562_s11 + $0x28] sm:$0xff]  ;;  %v1086_v35 = vshrl.u32 %v3804_v21, 16 }
  0x48   : > { %v1090_v36 = vshll.u32 %v3826_v34, 16  ;;  %v1094_v47 = vshrl.u32 %v3826_v34, 16 }
  0x49   : > { %922 = vmatpush.bf16.msrb.mxu3 %v3236_v37  ;;  %1188 = vmatpush.bf16.msrb.mxu0 %v3251_v38  ;;  %v656_v37 = vrot.slane %v3571_v6, 1  ;;  %v1088_v38 = vor.u32 %v1086_v35, %v1084_v27 }
  0x4a   : > { %v1092_v39 = vrot.slane %v1090_v36, 1 }
  0x4b   : > { %729 = vmatpush.bf16.msrb.mxu2 %v3219_v42  ;;  %585 = vmatpush.bf16.msrb.mxu1 %v3203_v43  ;;  %v657_v40 = vsel %vm648_vm1, %v654_v24, %v656_v37  ;;  %v3276_v43 = vld [vmem:[%s4148_s1 + $0x190] sm:$0xff]  ;;  %v3233_v24 = vld [vmem:[%s3562_s11 + $0x38] sm:$0xff] }
  0x4c   : > { %v1093_v42 = vsel %vm348_vm0, %v1088_v38, %v1092_v39  ;;  %v1096_v50 = vor.u32 %v1094_v47, %v1092_v39  ;;  %v3282_v47 = vld [vmem:[%s3562_s11 + $0x18] sm:$0xff] }
  0x4d   : > { %923 = vmatpush.bf16.msrb.mxu3 %v3235_v48  ;;  %1189 = vmatpush.bf16.msrb.mxu0 %v3250_v49  ;;  %v1098_v48 = vshll.u32 %v3848_v46, 16  ;;  %v658_v49 = vrot.slane %v3583_v10, 1 }
  0x4e   : > { %586 = vmatmul.bf16.vlgmr.msrb.gmra.mxu1 %v3577_v8  ;;  %730 = vmatmul.bf16.vlgmr.msrb.gmra.mxu2 %v651_v55  ;;  %v3294_v8 = vld [vmem:[%s4148_s1 + $0x1e8] sm:$0xff] }
  0x4f   : > { %1535 = vmatpush.bf16.msra.mxu2 %v3281_v44  ;;  %1341 = vmatpush.bf16.msra.mxu1 %v3265_v45  ;;  %v3291_v44 = vld [vmem:[%s4148_s1 + $0x1d0] sm:$0xff]  ;;  %v1100_v51 = vrot.slane %v1098_v48, 1 }
  0x50   : > { %924 = vmatmul.bf16.vlgmr.msrb.gmra.mxu3 %v3227_v56  ;;  %1190 = vmatmul.bf16.vlgmr.msrb.gmra.mxu0 %v1069_v57  ;;  %v3260_v45 = vld [vmem:[%s4148_s1 + $0x150] sm:$0xff]  ;;  %v3275_v56 = vld [vmem:[%s4148_s1 + $0x188] sm:$0xff] }
  0x51   : > { %1801 = vmatpush.bf16.msra.mxu3 %v3296_v52  ;;  %1960 = vmatpush.bf16.msra.mxu0 %v3304_v53  ;;  %v659_v52 = vsel %vm648_vm1, %v656_v37, %v658_v49  ;;  %v3231_v53 = vld [vmem:[%s3562_s11 + $0x28] sm:$0xff]  ;;  %v1101_v55 = vsel %vm348_vm0, %v1096_v50, %v1100_v51  ;;  %v3365_v50 = vld [vmem:[%s3562_s11 + $0x10] sm:$0xf0] }
  0x52   : > { %v3290_v57 = vld [vmem:[%s4148_s1 + $0x1c8] sm:$0xff] }
  0x53   : > { %1536 = vmatpush.bf16.msra.mxu2 %v3280_v58  ;;  %1342 = vmatpush.bf16.msra.mxu1 %v3264_v59  ;;  %v3867_v58 = vld [vmem:[%s3562_s11 + $0x38] sm:$0xff]  ;;  %v1102_v59 = vshrl.u32 %v3848_v46, 16 }
  0x55   : > { %1802 = vmatpush.bf16.msra.mxu3 %v3295_v60  ;;  %1961 = vmatpush.bf16.msra.mxu0 %v3303_v61  ;;  %v1106_v60 = vshll.u32 %v3867_v58, 16  ;;  %v3298_v61 = vld [vmem:[%s4148_s1 + $0x208] sm:$0xff] }
  0x57   : > { %1537 = vmatpush.bf16.msra.mxu2 %v3279_v63  ;;  %1343 = vmatpush.bf16.msra.mxu1 %v3263_v0  ;;  %v660_v63 = vrot.slane %v3574_v7, 1  ;;  %v1104_v0 = vor.u32 %v1102_v59, %v1100_v51  ;;  %v3366_v51 = vld [vmem:[%s3562_s11 + $0x10] sm:$0xe] }
  0x58   : > { %v3367_v59 = vor.u32 %v3366_v51, %v3365_v50 }
  0x59   : > { %1803 = vmatpush.bf16.msra.mxu3 %v3294_v8  ;;  %1962 = vmatpush.bf16.msra.mxu0 %v3302_v1  ;;  %v1108_v8 = vrot.slane %v1106_v60, 1  ;;  %v661_v1 = vsel %vm648_vm1, %v658_v49, %v660_v63 }
  0x5b   : > { %1538 = vmatpush.bf16.msra.mxu2 %v3278_v18  ;;  %1344 = vmatpush.bf16.msra.mxu1 %v3262_v20  ;;  %v1109_v3 = vsel %vm348_vm0, %v1104_v0, %v1108_v8  ;;  %v662_v18 = vrot.slane %v3591_v14, 1 }
  0x5d   : > { %1804 = vmatpush.bf16.msra.mxu3 %v3293_v19  ;;  %v663_v25 = vsel %vm648_vm1, %v660_v63, %v662_v18 }
  0x5e   : > { %591 = vmatmul.bf16.gmra.mxu1 %v3595_v16  ;;  %735 = vmatmul.bf16.gmra.mxu2 %v653_v13  ;;  %v3301_v16 = vld [vmem:[%s4148_s1 + $0x220] sm:$0xff]  ;;  %v1110_v13 = vshrl.u32 %v3867_v58, 16 }
  0x5f   : > { %1963 = vmatpush.bf16.msra.mxu0 %v3301_v16  ;;  %1539 = vmatpush.bf16.msra.mxu2 %v3277_v30  ;;  %v997_v16 = vld [vmem:[%s3562_s11 + $0x48] sm:$0x1] }
  0x60   : > { %929 = vmatmul.bf16.gmra.mxu3 %v3228_v15  ;;  %1195 = vmatmul.bf16.gmra.mxu0 %v1077_v17  ;;  %v1114_v15 = vshll.u32 %v3889_v12, 16  ;;  %v3297_v17 = vld [vmem:[%s4148_s1 + $0x200] sm:$0xff]  ;;  %v1112_v19 = vor.u32 %v1110_v13, %v1108_v8  ;;  %v1887_v8 = vrot.slane %v3367_v59, 1 }
  0x61   : > { %1805 = vmatpush.bf16.msra.mxu3 %v3292_v31  ;;  %1345 = vmatpush.bf16.msra.mxu1 %v3261_v33 }
  0x62   : > { %v1116_v20 = vrot.slane %v1114_v15, 1 }
  0x63   : > { %1540 = vmatpush.bf16.msra.mxu2 %v3276_v43 }
  0x64   : > { %v1117_v27 = vsel %vm348_vm0, %v1112_v19, %v1116_v20 }
  0x65   : > { %1806 = vmatpush.bf16.msra.mxu3 %v3291_v44  ;;  %1346 = vmatpush.bf16.msra.mxu1 %v3260_v45  ;;  %v3361_v45 = vld [vmem:[%s3562_s11 + $0x8] sm:$0xf0] }
  0x67   : > { %1541 = vmatpush.bf16.msra.mxu2 %v3275_v56 }
  0x69   : > { %1807 = vmatpush.bf16.msra.mxu3 %v3290_v57 }
  0x6b   : > { %1542 = vmatpush.bf16.msra.mxu2 %v3274_v4  ;;  %v3266_v4 = vld [vmem:[%s3562_s11 + $0x10] sm:$0xff] }
  0x6d   : > { %1808 = vmatpush.bf16.msra.mxu3 %v3289_v11 }
  0x6e   : > { %596 = vmatmul.bf16.gmra.mxu1 %v3568_v5  ;;  %740 = vmatmul.bf16.gmra.mxu2 %v655_v28  ;;  %v3300_v5 = vld [vmem:[%s4148_s1 + $0x218] sm:$0xff]  ;;  %v1048_v28 = vunpack.c.l.b16 %v997_v16 }
  0x6f   : > { %1964 = vmatpush.bf16.msra.mxu0 %v3300_v5  ;;  %v1118_v5 = vshrl.u32 %v3889_v12, 16 }
  0x70   : > { %934 = vmatmul.bf16.gmra.mxu3 %v3229_v23  ;;  %1200 = vmatmul.bf16.gmra.mxu0 %v1085_v29  ;;  %v3907_v23 = vpack.c.b16 %v1048_v28, %v1048_v28 }
  0x71   : > { %v1120_v36 = vor.u32 %v1118_v5, %v1116_v20  ;;  %v1689_v5 = vshrl.u32 %v3282_v47, 16 }
  0x72   : > { %v1122_v35 = vshll.u32 %v3907_v23, 16 }
  0x74   : > { %v1124_v37 = vrot.slane %v1122_v35, 1 }
  0x76   : > { %v1125_v44 = vsel %vm348_vm0, %v1120_v36, %v1124_v37 }
  0x7e   : > { %601 = vmatmul.bf16.gmra.mxu1 %v3580_v9  ;;  %745 = vmatmul.bf16.gmra.mxu2 %v657_v40  ;;  %v3299_v9 = vld [vmem:[%s4148_s1 + $0x210] sm:$0xff] }
  0x7f   : > { %1965 = vmatpush.bf16.msra.mxu0 %v3299_v9  ;;  %v3362_v9 = vld [vmem:[%s3562_s11 + $0x8] sm:$0xe] }
  0x80   : > { %939 = vmatmul.bf16.gmra.mxu3 %v3230_v41  ;;  %1205 = vmatmul.bf16.gmra.mxu0 %v1093_v42  ;;  %v3234_v42 = vld [vmem:[%s3562_s11 + $0x40] sm:$0xff] }
  0x83   : > { %1966 = vmatpush.bf16.msra.mxu0 %v3298_v61  ;;  %v1269_v61 = vrot.slane %v3716_v32, 1  ;;  %v3283_v32 = vld [vmem:[%s3562_s11 + $0x20] sm:$0xff] }
  0x87   : > { %1967 = vmatpush.bf16.msra.mxu0 %v3297_v17 }
  0x8e   : > { %606 = vmatmul.bf16.gmra.mxu1 %v3571_v6  ;;  %750 = vmatmul.bf16.gmra.mxu2 %v659_v52  ;;  %v3259_v6 = vld [vmem:[%s4148_s1 + $0x148] sm:$0xff] }
  0x8f   : > { %1347 = vmatpush.bf16.msra.mxu1 %v3259_v6  ;;  %v1685_v6 = vshll.u32 %v3282_v47, 16 }
  0x90   : > { %944 = vmatmul.bf16.gmra.mxu3 %v3231_v53  ;;  %1210 = vmatmul.bf16.gmra.mxu0 %v1101_v55  ;;  %v3363_v55 = vor.u32 %v3362_v9, %v3361_v45  ;;  %v3267_v45 = vld [vmem:[%s3562_s11 + $0x18] sm:$0xff] }
  0x91   : > { %v1687_v0 = vrot.slane %v1685_v6, 1 }
  0x92   : > { %v1268_v60 = vrot.slane %v3363_v55, 1 }
  0x93   : > { %v1691_v36 = vor.u32 %v1689_v5, %v1687_v0 }
  0x9e   : > { %611 = vmatmul.bf16.gmra.mxu1 %v3583_v10  ;;  %755 = vmatmul.bf16.gmra.mxu2 %v661_v1  ;;  %v3258_v10 = vld [vmem:[%s4148_s1 + $0x140] sm:$0xff]  ;;  %v1888_v1 = vrot.slane %v3282_v47, 1 }
  0x9f   : > { %1348 = vmatpush.bf16.msra.mxu1 %v3258_v10  ;;  %v1270_v10 = vsel %vm648_vm1, %v1268_v60, %v1269_v61 }
  0xa0   : > { %949 = vmatmul.bf16.gmra.mxu3 %v3232_v2  ;;  %1215 = vmatmul.bf16.gmra.mxu0 %v1109_v3 }
  0xab   : > { %v3901_v22 = vpop.f32.mrf.mxu1 }
  0xad   : > { %v482_v26 = vpop.f32.mrf.mxu0 }
  0xae   : > { %616 = vmatmul.bf16.gmra.mxu1 %v3574_v7  ;;  %760 = vmatmul.bf16.gmra.mxu2 %v663_v25  ;;  %v664_v7 = vrot.slane %v3650_v54, 1  ;;  %v3364_v54 = vld [vmem:[%s3562_s11 + $0x10] sm:$0xff]  }
  0xaf   : > { %v1680_v48 = vshll.u32 %v3364_v54, 16  ;;  %v1678_v57 = vshrl.u32 %v3364_v54, 16 }
  0xb0   : > { %954 = vmatmul.bf16.gmra.mxu3 %v3233_v24  ;;  %1220 = vmatmul.bf16.gmra.mxu0 %v1117_v27  ;;  %v665_v41 = vsel %vm648_vm1, %v662_v18, %v664_v7  ;;  %v1889_v18 = vsel %vm648_vm1, %v1887_v8, %v1888_v1  ;;  %v1271_v7 = vrot.slane %v3773_v62, 1 }
  0xb1   : > { %v3909_v29 = vpop.f32.mrf.mxu2 }
  0xb3   : > { %v3911_v30 = vpop.f32.mrf.mxu3  ;;  %v3913_v31 = vpop.f32.mrf.mxu1 }
  0xb5   : > { %v484_v33 = vpop.f32.mrf.mxu0 }
  0xb9   : > { %v3918_v38 = vpop.f32.mrf.mxu2 }
  0xbb   : > { %v3920_v39 = vpop.f32.mrf.mxu3  ;;  %v3922_v40 = vpop.f32.mrf.mxu1 }
  0xbd   : > { %v3926_v43 = vpop.f32.mrf.mxu0 }
  0xbe   : > { %621 = vmatmul.bf16.gmra.mxu1 %v3591_v14  ;;  %765 = vmatmul.bf16.gmra.mxu2 %v665_v41  ;;  %v1682_v14 = vrot.slane %v1680_v48, 1  ;;  %v1890_v41 = vrot.slane %v3283_v32, 1  ;;  %v1272_v48 = vsel %vm648_vm1, %v1269_v61, %v1271_v7 }
  0xc0   : > { %959 = vmatmul.bf16.gmra.mxu3 %v3234_v42  ;;  %1225 = vmatmul.bf16.gmra.mxu0 %v1125_v44  ;;  %v1683_v63 = vor.u32 %v1682_v14, %v1678_v57  ;;  %v1891_v55 = vsel %vm648_vm1, %v1888_v1, %v1890_v41  ;;  %v3284_v57 = vld [vmem:[%s3562_s11 + $0x28] sm:$0xff]  ;;  %v1273_v1 = vrot.slane %v3804_v21, 1 }
  0xc1   : > { %v3934_v49 = vpop.f32.mrf.mxu2  ;;  %v1701_v8 = vshll.u32 %v3284_v57, 16 }
  0xc2   : > { %v1688_v17 = vsel %vm348_vm0, %v1683_v63, %v1687_v0  ;;  %v1697_v0 = vshrl.u32 %v3283_v32, 16 }
  0xc3   : > { %v3938_v52 = vpop.f32.mrf.mxu3  ;;  %v3940_v53 = vpop.f32.mrf.mxu1 }
  0xc5   : > { %v489_v56 = vpop.f32.mrf.mxu0 }
  0xc9   : > { %v3943_v2 = vpop.f32.mrf.mxu2 }
  0xcb   : > { %v3945_v3 = vpop.f32.mrf.mxu3  ;;  %v587_v11 = vpop.f32.mrf.mxu1 }
  0xcc   : > { %v588_v13 = vadd.f32 %v587_v11, %v482_v26  ;;  %v1693_v26 = vshll.u32 %v3283_v32, 16 }
  0xcd   : > { %v1191_v15 = vpop.f32.mrf.mxu0 }
  0xce   : > { %1349 = vmatmul.bf16.vlgmr.msra.gmra.mxu1 %v1270_v10  ;;  %1543 = vmatmul.bf16.vlgmr.msra.gmra.mxu2 %v3266_v4  ;;  %v1695_v37 = vrot.slane %v1693_v26, 1  ;;  %v1703_v10 = vrot.slane %v1701_v8, 1 }
  0xd0   : > { %1809 = vmatmul.bf16.vlgmr.msra.gmra.mxu3 %v1688_v17  ;;  %1968 = vmatmul.bf16.vlgmr.msra.gmra.mxu0 %v1889_v18  ;;  %v1696_v51 = vsel %vm348_vm0, %v1691_v36, %v1695_v37  ;;  %v1699_v11 = vor.u32 %v1697_v0, %v1695_v37 }
  0xd1   : > { %v731_v19 = vpop.f32.mrf.mxu2 }
  0xd2   : > { %v771_v20 = vadd.f32 %v731_v19, %v588_v13  ;;  %v1892_v13 = vrot.slane %v3284_v57, 1  ;;  %v3268_v19 = vld [vmem:[%s3562_s11 + $0x20] sm:$0xff] }
  0xd3   : > { %v925_v16 = vpop.f32.mrf.mxu3  ;;  %v589_v25 = vpop.f32.mrf.mxu1 }
  0xd4   : > { %v965_v24 = vadd.f32 %v925_v16, %v771_v20  ;;  %v590_v27 = vadd.f32 %v589_v25, %v484_v33  ;;  %v1274_v16 = vsel %vm648_vm1, %v1271_v7, %v1273_v1 }
  0xd5   : > { %v1193_v28 = vpop.f32.mrf.mxu0 }
  0xd6   : > { %v3952_v35 = vadd.f32 %v1191_v15, %v965_v24  ;;  %v1704_v24 = vsel %vm348_vm0, %v1699_v11, %v1703_v10 }
  0xd9   : > { %v733_v42 = vpop.f32.mrf.mxu2 }
  0xda   : > { %v772_v44 = vadd.f32 %v733_v42, %v590_v27  ;;  %v1893_v27 = vsel %vm648_vm1, %v1890_v41, %v1892_v13  ;;  %v1275_v41 = vrot.slane %v3826_v34, 1 }
  0xdb   : > { %v927_v54 = vpop.f32.mrf.mxu3  ;;  %v592_v9 = vpop.f32.mrf.mxu1 }
  0xdc   : > { %v966_v50 = vadd.f32 %v927_v54, %v772_v44  ;;  %v593_v33 = vadd.f32 %v592_v9, %v3926_v43  ;;  %v1705_v44 = vshrl.u32 %v3284_v57, 16 }
  0xdd   : > { %v1196_v47 = vpop.f32.mrf.mxu0 }
  0xde   : > { %1354 = vmatmul.bf16.gmra.mxu1 %v1272_v48  ;;  %1548 = vmatmul.bf16.gmra.mxu2 %v3267_v45  ;;  %v3960_v62 = vadd.f32 %v1193_v28, %v966_v50  ;;  %v3285_v28 = vld [vmem:[%s3562_s11 + $0x30] sm:$0xff]  ;;  %v1707_v9 = vor.u32 %v1705_v44, %v1703_v10 }
  0xdf   : > { %v1709_v54 = vshll.u32 %v3285_v28, 16  ;;  %v1894_v50 = vrot.slane %v3285_v28, 1 }
  0xe0   : > { %1814 = vmatmul.bf16.gmra.mxu3 %v1696_v51  ;;  %1973 = vmatmul.bf16.gmra.mxu0 %v1891_v55  ;;  %v3269_v55 = vld [vmem:[%s3562_s11 + $0x28] sm:$0xff] }
  0xe1   : > { %v736_v14 = vpop.f32.mrf.mxu2  ;;  %v1711_v48 = vrot.slane %v1709_v54, 1 }
  0xe2   : > { %v773_v6 = vadd.f32 %v736_v14, %v593_v33 }
  0xe3   : > { %v930_v59 = vpop.f32.mrf.mxu3  ;;  %v594_v60 = vpop.f32.mrf.mxu1 }
  0xe4   : > { %v967_v61 = vadd.f32 %v930_v59, %v773_v6  ;;  %v595_v63 = vadd.f32 %v594_v60, %v489_v56  ;;  %v1276_v6 = vsel %vm648_vm1, %v1273_v1, %v1275_v41  ;;  %v1712_v60 = vsel %vm348_vm0, %v1707_v9, %v1711_v48 }
  0xe5   : > { %v1198_v43 = vpop.f32.mrf.mxu0 }
  0xe6   : > { %v3963_v4 = vadd.f32 %v1196_v47, %v967_v61  ;;  %v1895_v61 = vsel %vm648_vm1, %v1892_v13, %v1894_v50  ;;  %v1277_v13 = vrot.slane %v3848_v46, 1 }
  0xe9   : > { %v738_v15 = vpop.f32.mrf.mxu2 }
  0xea   : > { %v774_v17 = vadd.f32 %v738_v15, %v595_v63  ;;  %v3286_v63 = vld [vmem:[%s3562_s11 + $0x38] sm:$0xff]  ;;  %v1713_v15 = vshrl.u32 %v3285_v28, 16 }
  0xeb   : > { %v932_v18 = vpop.f32.mrf.mxu3  ;;  %v597_v20 = vpop.f32.mrf.mxu1 }
  0xec   : > { %v968_v25 = vadd.f32 %v932_v18, %v774_v17  ;;  %v598_v56 = vadd.f32 %v597_v20, %v3901_v22  ;;  %v1717_v17 = vshll.u32 %v3286_v63, 16 }
  0xed   : > { %v1201_v32 = vpop.f32.mrf.mxu0 }
  0xee   : > { %1359 = vmatmul.bf16.gmra.mxu1 %v1274_v16  ;;  %1553 = vmatmul.bf16.gmra.mxu2 %v3268_v19  ;;  %v3971_v21 = vadd.f32 %v1198_v43, %v968_v25  ;;  %v1715_v19 = vor.u32 %v1713_v15, %v1711_v48  ;;  %v1719_v20 = vrot.slane %v1717_v17, 1  ;;  %v1896_v16 = vrot.slane %v3286_v63, 1 }
  0xef   : > { %v1721_v48 = vshrl.u32 %v3286_v63, 16 }
  0xf0   : > { %1819 = vmatmul.bf16.gmra.mxu3 %v1704_v24  ;;  %1978 = vmatmul.bf16.gmra.mxu0 %v1893_v27  ;;  %v3270_v24 = vld [vmem:[%s3562_s11 + $0x30] sm:$0xff]  ;;  %v1720_v28 = vsel %vm348_vm0, %v1715_v19, %v1719_v20 }
  0xf1   : > { %v741_v5 = vpop.f32.mrf.mxu2 }
  0xf2   : > { %v775_v26 = vadd.f32 %v741_v5, %v598_v56  ;;  %v1278_v5 = vsel %vm648_vm1, %v1275_v41, %v1277_v13 }
  0xf3   : > { %v935_v36 = vpop.f32.mrf.mxu3  ;;  %v599_v7 = vpop.f32.mrf.mxu1 }
  0xf4   : > { %v969_v37 = vadd.f32 %v935_v36, %v775_v26  ;;  %v600_v22 = vadd.f32 %v599_v7, %v3913_v31  ;;  %v1897_v36 = vsel %vm648_vm1, %v1894_v50, %v1896_v16  ;;  %v1279_v50 = vrot.slane %v3867_v58, 1 }
  0xf5   : > { %v1203_v42 = vpop.f32.mrf.mxu0 }
  0xf6   : > { %v3975_v45 = vadd.f32 %v1201_v32, %v969_v37  ;;  %v3287_v37 = vld [vmem:[%s3562_s11 + $0x40] sm:$0xff] }
  0xf7   : > { %v1729_v19 = vshrl.u32 %v3287_v37, 16 }
  0xf9   : > { %v743_v33 = vpop.f32.mrf.mxu2 }
  0xfa   : > { %v776_v47 = vadd.f32 %v743_v33, %v600_v22  ;;  %v1725_v33 = vshll.u32 %v3287_v37, 16 }
  0xfb   : > { %v937_v51 = vpop.f32.mrf.mxu3  ;;  %v602_v14 = vpop.f32.mrf.mxu1 }
  0xfc   : > { %v970_v59 = vadd.f32 %v937_v51, %v776_v47  ;;  %v603_v31 = vadd.f32 %v602_v14, %v3922_v40  ;;  %v1727_v14 = vrot.slane %v1725_v33, 1 }
  0xfd   : > { %v1206_v57 = vpop.f32.mrf.mxu0 }
  0xfe   : > { %1364 = vmatmul.bf16.gmra.mxu1 %v1276_v6  ;;  %1558 = vmatmul.bf16.gmra.mxu2 %v3269_v55  ;;  %v3983_v34 = vadd.f32 %v1203_v42, %v970_v59  ;;  %v1723_v55 = vor.u32 %v1721_v48, %v1719_v20  ;;  %v1898_v6 = vrot.slane %v3287_v37, 1 }
 0x100   : > { %1824 = vmatmul.bf16.gmra.mxu3 %v1712_v60  ;;  %1983 = vmatmul.bf16.gmra.mxu0 %v1895_v61  ;;  %v1280_v61 = vsel %vm648_vm1, %v1277_v13, %v1279_v50 }
 0x101   : > { %v746_v43 = vpop.f32.mrf.mxu2 }
 0x102   : > { %v777_v0 = vadd.f32 %v746_v43, %v603_v31 }
 0x103   : > { %v940_v8 = vpop.f32.mrf.mxu3  ;;  %v604_v1 = vpop.f32.mrf.mxu1 }
 0x104   : > { %v971_v11 = vadd.f32 %v940_v8, %v777_v0  ;;  %v605_v40 = vadd.f32 %v604_v1, %v3940_v53  ;;  %v1728_v0 = vsel %vm348_vm0, %v1723_v55, %v1727_v14  ;;  %v1899_v8 = vsel %vm648_vm1, %v1896_v16, %v1898_v6  ;;  %v3288_v1 = vld [vmem:[%s3562_s11 + $0x48] sm:$0xff] }
 0x105   : > { %v1208_v10 = vpop.f32.mrf.mxu0  ;;  %v1733_v20 = vshll.u32 %v3288_v1, 16 }
 0x106   : > { %v3987_v18 = vadd.f32 %v1206_v57, %v971_v11  ;;  %v3271_v57 = vld [vmem:[%s3562_s11 + $0x38] sm:$0xff] }
 0x109   : > { %v748_v25 = vpop.f32.mrf.mxu2 }
 0x10a   : > { %v778_v56 = vadd.f32 %v748_v25, %v605_v40  ;;  %v1281_v25 = vrot.slane %v3889_v12, 1 }
 0x10b   : > { %v942_v32 = vpop.f32.mrf.mxu3  ;;  %v607_v27 = vpop.f32.mrf.mxu1 }
 0x10c   : > { %v972_v26 = vadd.f32 %v942_v32, %v778_v56  ;;  %v608_v7 = vadd.f32 %v607_v27, %v3909_v29  ;;  %v1731_v32 = vor.u32 %v1729_v19, %v1727_v14  ;;  %v1737_v14 = vshrl.u32 %v3288_v1, 16 }
 0x10d   : > { %v1211_v53 = vpop.f32.mrf.mxu0 }
 0x10e   : > { %1369 = vmatmul.bf16.gmra.mxu1 %v1278_v5  ;;  %1563 = vmatmul.bf16.gmra.mxu2 %v3270_v24  ;;  %v3994_v46 = vadd.f32 %v1208_v10, %v972_v26  ;;  %v1735_v24 = vrot.slane %v1733_v20, 1  ;;  %v1616_v5 = vld [vmem:[%s3562_s11 + $0x50] sm:$0x1] }
 0x10f   : > { %v1667_v12 = vunpack.c.l.b16 %v1616_v5 }
 0x110   : > { %1829 = vmatmul.bf16.gmra.mxu3 %v1720_v28  ;;  %1988 = vmatmul.bf16.gmra.mxu0 %v1897_v36  ;;  %v3272_v28 = vld [vmem:[%s3562_s11 + $0x40] sm:$0xff] }
 0x111   : > { %v751_v22 = vpop.f32.mrf.mxu2 }
 0x112   : > { %v779_v42 = vadd.f32 %v751_v22, %v608_v7  ;;  %v1282_v7 = vsel %vm648_vm1, %v1279_v50, %v1281_v25 }
 0x113   : > { %v945_v44 = vpop.f32.mrf.mxu3  ;;  %v609_v54 = vpop.f32.mrf.mxu1 }
 0x114   : > { %v973_v41 = vadd.f32 %v945_v44, %v779_v42  ;;  %v610_v51 = vadd.f32 %v609_v54, %v3918_v38  ;;  %v1736_v42 = vsel %vm348_vm0, %v1731_v32, %v1735_v24 }
 0x115   : > { %v1213_v9 = vpop.f32.mrf.mxu0 }
 0x116   : > { %v3998_v47 = vadd.f32 %v1211_v53, %v973_v41  ;;  %v1676_v41 = vpack.c.b16 %v1667_v12, %v1667_v12 }
 0x119   : > { %v753_v29 = vpop.f32.mrf.mxu2 }
 0x11a   : > { %v780_v59 = vadd.f32 %v753_v29, %v610_v51  ;;  %v1741_v29 = vshll.u32 %v1676_v41, 16 }
 0x11b   : > { %v947_v31 = vpop.f32.mrf.mxu3  ;;  %v612_v60 = vpop.f32.mrf.mxu1 }
 0x11c   : > { %v974_v43 = vadd.f32 %v947_v31, %v780_v59  ;;  %v613_v38 = vadd.f32 %v612_v60, %v3934_v49  ;;  %v1900_v49 = vrot.slane %v3288_v1, 1  ;;  %v1283_v59 = vrot.slane %v3907_v23, 1 }
 0x11d   : > { %v1216_v63 = vpop.f32.mrf.mxu0  ;;  %v1743_v60 = vrot.slane %v1741_v29, 1 }
 0x11e   : > { %1374 = vmatmul.bf16.gmra.mxu1 %v1280_v61  ;;  %1568 = vmatmul.bf16.gmra.mxu2 %v3271_v57  ;;  %v4006_v58 = vadd.f32 %v1213_v9, %v974_v43  ;;  %v1901_v44 = vsel %vm648_vm1, %v1898_v6, %v1900_v49  ;;  %v1739_v57 = vor.u32 %v1737_v14, %v1735_v24  ;;  %v1902_v61 = vrot.slane %v1676_v41, 1  ;;  %v4045_v41 = vld [vmem:[%s4149_s2] ss:$0 sm:$0xff] }
 0x120   : > { %1834 = vmatmul.bf16.gmra.mxu3 %v1728_v0  ;;  %1993 = vmatmul.bf16.gmra.mxu0 %v1899_v8  ;;  %v3273_v0 = vld [vmem:[%s3562_s11 + $0x48] sm:$0xff]  ;;  %v1744_v1 = vsel %vm348_vm0, %v1739_v57, %v1743_v60  ;;  %s3193_s11 = sshll.u32 %s3464_s15, 7  ;;  %s2624_s15 = sshll.u32 %s3549_s26, 4 }
 0x121   : > { %v756_v11 = vpop.f32.mrf.mxu2  ;;  %s244_s22 = sadd.s32 %s2625_s14, %s2624_s15 }
 0x122   : > { %v781_v40 = vadd.f32 %v756_v11, %v613_v38  ;;  %v1284_v38 = vsel %vm648_vm1, %v1281_v25, %v1283_v59  ;;  %s2626_s23 = sshll.u32 %s244_s22, 2 }
 0x123   : > { %v950_v10 = vpop.f32.mrf.mxu3  ;;  %v614_v15 = vpop.f32.mrf.mxu1  ;;  %s4063_s27 = scalar_lea.vmem %s4150_s3, %s2626_s23 }
 0x124   : > { %v975_v17 = vadd.f32 %v950_v10, %v781_v40  ;;  %v615_v56 = vadd.f32 %v614_v15, %v3943_v2  ;;  %v1903_v10 = vsel %vm648_vm1, %v1900_v49, %v1902_v61 }
 0x125   : > { %v1218_v13 = vpop.f32.mrf.mxu0 }
 0x126   : > { %v4010_v16 = vadd.f32 %v1216_v63, %v975_v17 }
 0x129   : > { %v758_v27 = vpop.f32.mrf.mxu2 }
 0x12a   : > { %v782_v26 = vadd.f32 %v758_v27, %v615_v56 }
 0x12b   : > { %v952_v53 = vpop.f32.mrf.mxu3  ;;  %v617_v36 = vpop.f32.mrf.mxu1 }
 0x12c   : > { %v976_v22 = vadd.f32 %v952_v53, %v782_v26  ;;  %v618_v54 = vadd.f32 %v617_v36, %v3911_v30  ;;  %v2061_v36 = vlaneseq }
 0x12d   : > { %v1221_v37 = vpop.f32.mrf.mxu0 }
 0x12e   : > { %1379 = vmatmul.bf16.gmra.mxu1 %v1282_v7  ;;  %1573 = vmatmul.bf16.gmra.mxu2 %v3272_v28  ;;  %v4019_v2 = vadd.f32 %v1218_v13, %v976_v22  ;;  %v4039_v12 = vshrl.u32 %v2061_v36, 7 }
 0x130   : > { %1839 = vmatmul.bf16.gmra.mxu3 %v1736_v42  ;;  %1998 = vmatmul.bf16.gmra.mxu0 %v1901_v44 }
 0x131   : > { %v761_v9 = vpop.f32.mrf.mxu2 }
 0x132   : > { %v783_v48 = vadd.f32 %v761_v9, %v618_v54  ;;  %v4048_v9 = vstv %s3193_s11 }
 0x133   : > { %v955_v33 = vpop.f32.mrf.mxu3  ;;  %v619_v50 = vpop.f32.mrf.mxu1  ;;  %v2288_v59 = vadd.s32 %v4048_v9, %v4039_v12 }
 0x134   : > { %v977_v51 = vadd.f32 %v955_v33, %v783_v48  ;;  %v620_v31 = vadd.f32 %v619_v50, %v3920_v39 }
 0x135   : > { %v1223_v55 = vpop.f32.mrf.mxu0  ;;  %vm2304_vm4 = vcmp.lt.s32.totalorder %v2288_v59, 192 }
 0x136   : > { %v4022_v6 = vadd.f32 %v1221_v37, %v977_v51 }
 0x139   : > { %v763_v30 = vpop.f32.mrf.mxu2 }
 0x13a   : > { %v784_v43 = vadd.f32 %v763_v30, %v620_v31 }
 0x13b   : > { %v957_v63 = vpop.f32.mrf.mxu3  ;;  %v622_v8 = vpop.f32.mrf.mxu1 }
 0x13c   : > { %v978_v11 = vadd.f32 %v957_v63, %v784_v43  ;;  %v623_v39 = vadd.f32 %v622_v8, %v3938_v52  ;;  %v2064_v63 = vadd.s32 16, %v4039_v12 }
 0x13d   : > { %v1226_v40 = vpop.f32.mrf.mxu0 }
 0x13e   : > { %1384 = vmatmul.bf16.gmra.mxu1 %v1284_v38  ;;  %1578 = vmatmul.bf16.gmra.mxu2 %v3273_v0  ;;  %v4030_v23 = vadd.f32 %v1223_v55, %v978_v11 }
 0x140   : > { %1844 = vmatmul.bf16.gmra.mxu3 %v1744_v1  ;;  %2003 = vmatmul.bf16.gmra.mxu0 %v1903_v10 }
 0x141   : > { %v766_v15 = vpop.f32.mrf.mxu2 }
 0x142   : > { %v785_v17 = vadd.f32 %v766_v15, %v623_v39 }
 0x143   : > { %v960_v13 = vpop.f32.mrf.mxu3  ;;  %v624_v19 = vpop.f32.mrf.mxu1 }
 0x144   : > { %v979_v20 = vadd.f32 %v960_v13, %v785_v17  ;;  %v625_v32 = vadd.f32 %v624_v19, %v3945_v3 }
 0x145   : > { %v1228_v25 = vpop.f32.mrf.mxu0 }
 0x146   : > { %v4033_v56 = vadd.f32 %v1226_v40, %v979_v20 }
 0x149   : > { %v768_v24 = vpop.f32.mrf.mxu2 }
 0x14a   : > { %v786_v49 = vadd.f32 %v768_v24, %v625_v32  ;;  %v2065_v32 = vadd.s32 24, %v4039_v12 }
 0x14b   : > { %v962_v27 = vpop.f32.mrf.mxu3  ;;  %v1350_v5 = vpop.f32.mrf.mxu1 }
 0x14c   : > { %v980_v26 = vadd.f32 %v962_v27, %v786_v49  ;;  %v1390_v52 = vadd.f32 %v1350_v5, %v3952_v35  ;;  %v2063_v35 = vadd.s32 8, %v4039_v12  ;;  %v2103_v36 = vand.u32 15, %v2065_v32 }
 0x14d   : > { %v1969_v53 = vpop.f32.mrf.mxu0 }
 0x14e   : > { %v4036_v28 = vadd.f32 %v1228_v25, %v980_v26  ;;  %v2089_v14 = vand.u32 15, %v2063_v35  ;;  %v2289_v29 = vadd.s32 %v4048_v9, %v2063_v35  ;;  %vm2273_vm7 = vcmp.lt.s32.totalorder %v2103_v36, 12 }
 0x150   : > { %vm2271_vm2 = vcmp.lt.s32.totalorder %v2089_v14, 12  ;;  %vm2305_vm3 = vcmp.lt.s32.totalorder %v2289_v29, 192 }
 0x151   : > { %v1544_v7 = vpop.f32.mrf.mxu2  ;;  %vm2321_vm5 = vmand %vm2271_vm2, %vm2305_vm3 }
 0x152   : > { %v1584_v22 = vadd.f32 %v1544_v7, %v1390_v52  ;;  %v2291_v7 = vadd.s32 %v4048_v9, %v2065_v32 }
 0x153   : > { %v1810_v37 = vpop.f32.mrf.mxu3  ;;  %v1352_v42 = vpop.f32.mrf.mxu1 }
 0x154   : > { %v1850_v44 = vadd.f32 %v1810_v37, %v1584_v22  ;;  %v1391_v48 = vadd.f32 %v1352_v42, %v3960_v62  ;;  %vm2307_vm8 = vcmp.lt.s32.totalorder %v2291_v7, 192 }
 0x155   : > { %v1971_v3 = vpop.f32.mrf.mxu0  ;;  %vm2323_vm9 = vmand %vm2273_vm7, %vm2307_vm8 }
 0x156   : > { %v2009_v54 = vadd.f32 %v1969_v53, %v1850_v44 }
 0x158   : > { %v2029_v50 = vadd.f32 %v4045_v41, %v2009_v54 }
 0x159   : > { %v1546_v33 = vpop.f32.mrf.mxu2 }
 0x15a   : > { %v1585_v51 = vadd.f32 %v1546_v33, %v1391_v48  ;;  %v2045_v61 = vmax.f32 %v2029_v50, 0.0 }
 0x15b   : > { %v1812_v55 = vpop.f32.mrf.mxu3  ;;  %v1355_v31 = vpop.f32.mrf.mxu1 }
 0x15c   : > { %v1851_v57 = vadd.f32 %v1812_v55, %v1585_v51  ;;  %v1392_v43 = vadd.f32 %v1355_v31, %v3963_v4  ;;  %v2368_v8 = vsel %vm2304_vm4, %v2045_v61, 0.0  ;;  %v2290_v4 = vadd.s32 %v4048_v9, %v2064_v63 }
 0x15d   : > { %v1974_v60 = vpop.f32.mrf.mxu0  ;;  %v2438_v17 = vmul.f32 %v2368_v8, %v2368_v8  ;;  %v2066_v51 = vadd.s32 32, %v4039_v12 }
 0x15e   : > { %v2010_v30 = vadd.f32 %v1971_v3, %v1851_v57  ;;  %vm2306_vm6 = vcmp.lt.s32.totalorder %v2290_v4, 192 }
 0x160   : > { %v2030_v62 = vadd.f32 %v4045_v41, %v2010_v30 }
 0x161   : > { %v1549_v0 = vpop.f32.mrf.mxu2 }
 0x162   : > { %v2046_v38 = vmax.f32 %v2030_v62, 0.0  ;;  %v1586_v11 = vadd.f32 %v1549_v0, %v1392_v43  ;;  %v2292_v43 = vadd.s32 %v4048_v9, %v2066_v51 }
 0x163   : > { %v1815_v40 = vpop.f32.mrf.mxu3  ;;  %v1357_v1 = vpop.f32.mrf.mxu1 }
 0x164   : > { %v2369_v10 = vsel %vm2321_vm5, %v2046_v38, 0.0  ;;  %v1852_v39 = vadd.f32 %v1815_v40, %v1586_v11  ;;  %v1393_v27 = vadd.f32 %v1357_v1, %v3971_v21  ;;  %vm2308_vm10 = vcmp.lt.s32.totalorder %v2292_v43, 192 }
 0x165   : > { %v1976_v15 = vpop.f32.mrf.mxu0  ;;  %v3320_v13 = vpack.c.bf16 %v2369_v10, %v2368_v8  ;;  %v2416_v19 = vadd.f32 %v2369_v10, %v2368_v8  ;;  %v2439_v20 = vmul.f32 %v2369_v10, %v2369_v10 }
 0x166   : > { %v2011_v25 = vadd.f32 %v1974_v60, %v1852_v39 }
 0x167   : > { %3321 = vst [vmem:[%s4063_s27] sm:$0xff] %v3320_v13   ;;  %v2454_v24 = vadd.f32 %v2439_v20, %v2438_v17 }
 0x168   : > { %v2031_v49 = vadd.f32 %v4045_v41, %v2011_v25 }
 0x169   : > { %v1551_v5 = vpop.f32.mrf.mxu2 }
 0x16a   : > { %v2047_v26 = vmax.f32 %v2031_v49, 0.0  ;;  %v1587_v53 = vadd.f32 %v1551_v5, %v1393_v27  ;;  %v2068_v5 = vadd.s32 48, %v4039_v12 }
 0x16b   : > { %v1817_v52 = vpop.f32.mrf.mxu3  ;;  %v1360_v22 = vpop.f32.mrf.mxu1 }
 0x16c   : > { %v2370_v37 = vsel %vm2306_vm6, %v2047_v26, 0.0  ;;  %v1853_v42 = vadd.f32 %v1817_v52, %v1587_v53  ;;  %v1394_v33 = vadd.f32 %v1360_v22, %v3975_v45  ;;  %v2067_v45 = vadd.s32 40, %v4039_v12 }
 0x16d   : > { %v1979_v44 = vpop.f32.mrf.mxu0  ;;  %v2417_v3 = vadd.f32 %v2416_v19, %v2370_v37  ;;  %v2440_v54 = vmul.f32 %v2370_v37, %v2370_v37 }
 0x16e   : > { %v2012_v35 = vadd.f32 %v1976_v15, %v1853_v42  ;;  %v2117_v39 = vand.u32 15, %v2067_v45  ;;  %v2293_v4 = vadd.s32 %v4048_v9, %v2067_v45 }
 0x16f   : > { %v2455_v48 = vadd.f32 %v2454_v24, %v2440_v54  ;;  %v2294_v54 = vadd.s32 %v4048_v9, %v2068_v5 }
 0x170   : > { %v2032_v21 = vadd.f32 %v4045_v41, %v2012_v35  ;;  %vm2275_vm11 = vcmp.lt.s32.totalorder %v2117_v39, 12  ;;  %vm2309_vm12 = vcmp.lt.s32.totalorder %v2293_v4, 192 }
 0x171   : > { %v1554_v50 = vpop.f32.mrf.mxu2  ;;  %vm2325_vm13 = vmand %vm2275_vm11, %vm2309_vm12  ;;  %vm2310_vm14 = vcmp.lt.s32.totalorder %v2294_v54, 192 }
 0x172   : > { %v2048_v55 = vmax.f32 %v2032_v21, 0.0  ;;  %v1588_v14 = vadd.f32 %v1554_v50, %v1394_v33 }
 0x173   : > { %v1820_v29 = vpop.f32.mrf.mxu3  ;;  %v1362_v59 = vpop.f32.mrf.mxu1 }
 0x174   : > { %v2371_v31 = vsel %vm2323_vm9, %v2048_v55, 0.0  ;;  %v1854_v57 = vadd.f32 %v1820_v29, %v1588_v14  ;;  %v1395_v38 = vadd.f32 %v1362_v59, %v3983_v34 }
 0x175   : > { %v1981_v60 = vpop.f32.mrf.mxu0  ;;  %v3325_v61 = vpack.c.bf16 %v2371_v31, %v2370_v37  ;;  %v2418_v30 = vadd.f32 %v2417_v3, %v2371_v31  ;;  %v2441_v62 = vmul.f32 %v2371_v31, %v2371_v31 }
 0x176   : > { %v2013_v63 = vadd.f32 %v1979_v44, %v1854_v57 }
 0x177   : > { %3368 = vst [vmem:[%s4063_s27 + $0x8] sm:$0xff] %v3325_v61   ;;  %v2456_v0 = vadd.f32 %v2455_v48, %v2441_v62 }
 0x178   : > { %v2033_v8 = vadd.f32 %v4045_v41, %v2013_v63 }
 0x179   : > { %v1556_v11 = vpop.f32.mrf.mxu2 }
 0x17a   : > { %v2049_v40 = vmax.f32 %v2033_v8, 0.0  ;;  %v1589_v1 = vadd.f32 %v1556_v11, %v1395_v38  ;;  %v2070_v8 = vadd.s32 64, %v4039_v12 }
 0x17b   : > { %v1822_v10 = vpop.f32.mrf.mxu3  ;;  %v1365_v15 = vpop.f32.mrf.mxu1 }
 0x17c   : > { %v2372_v17 = vsel %vm2308_vm10, %v2049_v40, 0.0  ;;  %v1855_v13 = vadd.f32 %v1822_v10, %v1589_v1  ;;  %v1396_v49 = vadd.f32 %v1365_v15, %v3987_v18  ;;  %v2069_v18 = vadd.s32 56, %v4039_v12 }
 0x17d   : > { %v1984_v19 = vpop.f32.mrf.mxu0  ;;  %v2419_v20 = vadd.f32 %v2418_v30, %v2372_v17  ;;  %v2442_v25 = vmul.f32 %v2372_v17, %v2372_v17 }
 0x17e   : > { %v2014_v32 = vadd.f32 %v1981_v60, %v1855_v13  ;;  %v2131_v29 = vand.u32 15, %v2069_v18  ;;  %v2295_v59 = vadd.s32 %v4048_v9, %v2069_v18  ;;  %v2072_v18 = vadd.s32 80, %v4039_v12 }
 0x17f   : > { %v2457_v24 = vadd.f32 %v2456_v0, %v2442_v25 }
 0x180   : > { %v2034_v34 = vadd.f32 %v4045_v41, %v2014_v32  ;;  %vm2277_vm15 = vcmp.lt.s32.totalorder %v2131_v29, 12  ;;  %vm2311_vm0 = vcmp.lt.s32.totalorder %v2295_v59, 192 }
 0x181   : > { %v1559_v27 = vpop.f32.mrf.mxu2  ;;  %vm2327_vm1 = vmand %vm2277_vm15, %vm2311_vm0 }
 0x182   : > { %v2050_v26 = vmax.f32 %v2034_v34, 0.0  ;;  %v1590_v53 = vadd.f32 %v1559_v27, %v1396_v49 }
 0x183   : > { %v1825_v52 = vpop.f32.mrf.mxu3  ;;  %v1367_v36 = vpop.f32.mrf.mxu1 }
 0x184   : > { %v2373_v7 = vsel %vm2325_vm13, %v2050_v26, 0.0  ;;  %v1856_v22 = vadd.f32 %v1825_v52, %v1590_v53  ;;  %v1397_v33 = vadd.f32 %v1367_v36, %v3994_v46 }
 0x185   : > { %v1986_v37 = vpop.f32.mrf.mxu0  ;;  %v3330_v42 = vpack.c.bf16 %v2373_v7, %v2372_v17  ;;  %v2420_v44 = vadd.f32 %v2419_v20, %v2373_v7  ;;  %v2443_v3 = vmul.f32 %v2373_v7, %v2373_v7 }
 0x186   : > { %v2015_v35 = vadd.f32 %v1984_v19, %v1856_v22  ;;  %v2296_v19 = vadd.s32 %v4048_v9, %v2070_v8 }
 0x187   : > { %3369 = vst [vmem:[%s4063_s27 + $0x10] sm:$0xff] %v3330_v42   ;;  %v2458_v48 = vadd.f32 %v2457_v24, %v2443_v3 }
 0x188   : > { %v2035_v21 = vadd.f32 %v4045_v41, %v2015_v35  ;;  %vm2312_vm2 = vcmp.lt.s32.totalorder %v2296_v19, 192  ;;  %v2074_v19 = vadd.s32 96, %v4039_v12 }
 0x189   : > { %v1561_v50 = vpop.f32.mrf.mxu2 }
 0x18a   : > { %v2051_v51 = vmax.f32 %v2035_v21, 0.0  ;;  %v1591_v55 = vadd.f32 %v1561_v50, %v1397_v33 }
 0x18b   : > { %v1827_v14 = vpop.f32.mrf.mxu3  ;;  %v1370_v31 = vpop.f32.mrf.mxu1 }
 0x18c   : > { %v2374_v57 = vsel %vm2310_vm14, %v2051_v51, 0.0  ;;  %v1857_v60 = vadd.f32 %v1827_v14, %v1591_v55  ;;  %v1398_v45 = vadd.f32 %v1370_v31, %v3998_v47  ;;  %v2071_v47 = vadd.s32 72, %v4039_v12 }
 0x18d   : > { %v1989_v61 = vpop.f32.mrf.mxu0  ;;  %v2421_v30 = vadd.f32 %v2420_v44, %v2374_v57  ;;  %v2444_v62 = vmul.f32 %v2374_v57, %v2374_v57  ;;  %v2298_v31 = vadd.s32 %v4048_v9, %v2072_v18 }
 0x18e   : > { %v2016_v43 = vadd.f32 %v1986_v37, %v1857_v60  ;;  %v2145_v26 = vand.u32 15, %v2071_v47  ;;  %v2297_v53 = vadd.s32 %v4048_v9, %v2071_v47 }
 0x18f   : > { %v2459_v63 = vadd.f32 %v2458_v48, %v2444_v62  ;;  %vm2314_vm6 = vcmp.lt.s32.totalorder %v2298_v31, 192 }
 0x190   : > { %v2036_v46 = vadd.f32 %v4045_v41, %v2016_v43  ;;  %vm2279_vm3 = vcmp.lt.s32.totalorder %v2145_v26, 12  ;;  %vm2313_vm4 = vcmp.lt.s32.totalorder %v2297_v53, 192  ;;  %v2300_v26 = vadd.s32 %v4048_v9, %v2074_v19 }
 0x191   : > { %v1564_v0 = vpop.f32.mrf.mxu2  ;;  %vm2329_vm5 = vmand %vm2279_vm3, %vm2313_vm4 }
 0x192   : > { %v2052_v38 = vmax.f32 %v2036_v46, 0.0  ;;  %v1592_v11 = vadd.f32 %v1564_v0, %v1398_v45  ;;  %vm2316_vm10 = vcmp.lt.s32.totalorder %v2300_v26, 192 }
 0x193   : > { %v1830_v40 = vpop.f32.mrf.mxu3  ;;  %v1372_v1 = vpop.f32.mrf.mxu1 }
 0x194   : > { %v2375_v10 = vsel %vm2327_vm1, %v2052_v38, 0.0  ;;  %v1858_v39 = vadd.f32 %v1830_v40, %v1592_v11  ;;  %v1399_v24 = vadd.f32 %v1372_v1, %v4006_v58 }
 0x195   : > { %v1991_v4 = vpop.f32.mrf.mxu0  ;;  %v3335_v15 = vpack.c.bf16 %v2375_v10, %v2374_v57  ;;  %v2422_v17 = vadd.f32 %v2421_v30, %v2375_v10  ;;  %v2445_v13 = vmul.f32 %v2375_v10, %v2375_v10 }
 0x196   : > { %v2017_v20 = vadd.f32 %v1989_v61, %v1858_v39 }
 0x197   : > { %3370 = vst [vmem:[%s4063_s27 + $0x18] sm:$0xff] %v3335_v15   ;;  %v2460_v25 = vadd.f32 %v2459_v63, %v2445_v13 }
 0x198   : > { %v2037_v32 = vadd.f32 %v4045_v41, %v2017_v20 }
 0x199   : > { %v1566_v34 = vpop.f32.mrf.mxu2 }
 0x19a   : > { %v2053_v49 = vmax.f32 %v2037_v32, 0.0  ;;  %v1593_v27 = vadd.f32 %v1566_v34, %v1399_v24 }
 0x19b   : > { %v1832_v5 = vpop.f32.mrf.mxu3  ;;  %v1375_v52 = vpop.f32.mrf.mxu1 }
 0x19c   : > { %v2376_v36 = vsel %vm2312_vm2, %v2053_v49, 0.0  ;;  %v1859_v7 = vadd.f32 %v1832_v5, %v1593_v27  ;;  %v1400_v54 = vadd.f32 %v1375_v52, %v4010_v16  ;;  %v2073_v16 = vadd.s32 88, %v4039_v12 }
 0x19d   : > { %v1994_v22 = vpop.f32.mrf.mxu0  ;;  %v2423_v37 = vadd.f32 %v2422_v17, %v2376_v36  ;;  %v2446_v42 = vmul.f32 %v2376_v36, %v2376_v36  ;;  %v2075_v52 = vadd.s32 104, %v4039_v12 }
 0x19e   : > { %v2018_v44 = vadd.f32 %v1991_v4, %v1859_v7  ;;  %v2159_v0 = vand.u32 15, %v2073_v16  ;;  %v2299_v8 = vadd.s32 %v4048_v9, %v2073_v16 }
 0x19f   : > { %v2461_v3 = vadd.f32 %v2460_v25, %v2446_v42 }
 0x1a0   : > { %v2038_v58 = vadd.f32 %v4045_v41, %v2018_v44  ;;  %vm2281_vm7 = vcmp.lt.s32.totalorder %v2159_v0, 12  ;;  %vm2315_vm8 = vcmp.lt.s32.totalorder %v2299_v8, 192 }
 0x1a1   : > { %v1569_v35 = vpop.f32.mrf.mxu2  ;;  %vm2331_vm9 = vmand %vm2281_vm7, %vm2315_vm8 }
 0x1a2   : > { %v2054_v48 = vmax.f32 %v2038_v58, 0.0  ;;  %v1594_v21 = vadd.f32 %v1569_v35, %v1400_v54  ;;  %v2173_v58 = vand.u32 15, %v2075_v52  ;;  %v2301_v54 = vadd.s32 %v4048_v9, %v2075_v52 }
 0x1a3   : > { %v1835_v33 = vpop.f32.mrf.mxu3  ;;  %v1377_v50 = vpop.f32.mrf.mxu1 }
 0x1a4   : > { %v2377_v51 = vsel %vm2329_vm5, %v2054_v48, 0.0  ;;  %v1860_v55 = vadd.f32 %v1835_v33, %v1594_v21  ;;  %v1401_v62 = vadd.f32 %v1377_v50, %v4019_v2  ;;  %vm2283_vm11 = vcmp.lt.s32.totalorder %v2173_v58, 12 }
 0x1a5   : > { %v3340_v14 = vpack.c.bf16 %v2377_v51, %v2376_v36  ;;  %v2424_v29 = vadd.f32 %v2423_v37, %v2377_v51  ;;  %v2447_v59 = vmul.f32 %v2377_v51, %v2377_v51  ;;  %v1996_v57 = vpop.f32.mrf.mxu0  ;;  %vm2317_vm12 = vcmp.lt.s32.totalorder %v2301_v54, 192 }
 0x1a6   : > { %v2019_v60 = vadd.f32 %v1994_v22, %v1860_v55  ;;  %vm2333_vm13 = vmand %vm2283_vm11, %vm2317_vm12 }
 0x1a7   : > { %3371 = vst [vmem:[%s4063_s27 + $0x20] sm:$0xff] %v3340_v14   ;;  %v2462_v61 = vadd.f32 %v2461_v3, %v2447_v59 }
 0x1a8   : > { %v2039_v30 = vadd.f32 %v4045_v41, %v2019_v60 }
 0x1a9   : > { %v1571_v43 = vpop.f32.mrf.mxu2 }
 0x1aa   : > { %v2055_v63 = vmax.f32 %v2039_v30, 0.0  ;;  %v1595_v46 = vadd.f32 %v1571_v43, %v1401_v62 }
 0x1ab   : > { %v1837_v45 = vpop.f32.mrf.mxu3  ;;  %v1380_v38 = vpop.f32.mrf.mxu1 }
 0x1ac   : > { %v2378_v11 = vsel %vm2314_vm6, %v2055_v63, 0.0  ;;  %v1861_v40 = vadd.f32 %v1837_v45, %v1595_v46  ;;  %v1402_v17 = vadd.f32 %v1380_v38, %v4022_v6 }
 0x1ad   : > { %v2425_v1 = vadd.f32 %v2424_v29, %v2378_v11  ;;  %v2448_v10 = vmul.f32 %v2378_v11, %v2378_v11  ;;  %v1999_v15 = vpop.f32.mrf.mxu0  ;;  %v2076_v29 = vadd.s32 112, %v4039_v12 }
 0x1ae   : > { %v2020_v39 = vadd.f32 %v1996_v57, %v1861_v40 }
 0x1af   : > { %v2463_v4 = vadd.f32 %v2462_v61, %v2448_v10  ;;  %v2302_v63 = vadd.s32 %v4048_v9, %v2076_v29 }
 0x1b0   : > { %v2040_v2 = vadd.f32 %v4045_v41, %v2020_v39 }
 0x1b1   : > { %v1574_v13 = vpop.f32.mrf.mxu2  ;;  %vm2318_vm14 = vcmp.lt.s32.totalorder %v2302_v63, 192 }
 0x1b2   : > { %v2056_v20 = vmax.f32 %v2040_v2, 0.0  ;;  %v1596_v47 = vadd.f32 %v1574_v13, %v1402_v17 }
 0x1b3   : > { %v1840_v25 = vpop.f32.mrf.mxu3  ;;  %v1382_v32 = vpop.f32.mrf.mxu1 }
 0x1b4   : > { %v2379_v24 = vsel %vm2331_vm9, %v2056_v20, 0.0  ;;  %v1862_v34 = vadd.f32 %v1840_v25, %v1596_v47  ;;  %v1403_v7 = vadd.f32 %v1382_v32, %v4030_v23 }
 0x1b5   : > { %v3345_v49 = vpack.c.bf16 %v2379_v24, %v2378_v11  ;;  %v2426_v27 = vadd.f32 %v2425_v1, %v2379_v24  ;;  %v2449_v5 = vmul.f32 %v2379_v24, %v2379_v24  ;;  %v2001_v22 = vpop.f32.mrf.mxu0 }
 0x1b6   : > { %v2021_v53 = vadd.f32 %v1999_v15, %v1862_v34 }
 0x1b7   : > { %3372 = vst [vmem:[%s4063_s27 + $0x28] sm:$0xff] %v3345_v49   ;;  %v2464_v6 = vadd.f32 %v2463_v4, %v2449_v5 }
 0x1b8   : > { %v2041_v36 = vadd.f32 %v4045_v41, %v2021_v53 }
 0x1b9   : > { %v1576_v37 = vpop.f32.mrf.mxu2 }
 0x1ba   : > { %v2057_v42 = vmax.f32 %v2041_v36, 0.0  ;;  %v1597_v44 = vadd.f32 %v1576_v37, %v1403_v7 }
 0x1bb   : > { %v1842_v3 = vpop.f32.mrf.mxu3  ;;  %v1385_v35 = vpop.f32.mrf.mxu1 }
 0x1bc   : > { %v2380_v18 = vsel %vm2316_vm10, %v2057_v42, 0.0  ;;  %v1863_v48 = vadd.f32 %v1842_v3, %v1597_v44  ;;  %v1404_v55 = vadd.f32 %v1385_v35, %v4033_v56  ;;  %v2077_v56 = vadd.s32 120, %v4039_v12 }
 0x1bd   : > { %v2427_v21 = vadd.f32 %v2426_v27, %v2380_v18  ;;  %v2450_v33 = vmul.f32 %v2380_v18, %v2380_v18  ;;  %v2004_v60 = vpop.f32.mrf.mxu0 }
 0x1be   : > { %v2022_v50 = vadd.f32 %v2001_v22, %v1863_v48  ;;  %v2187_v10 = vand.u32 15, %v2077_v56  ;;  %v2303_v39 = vadd.s32 %v4048_v9, %v2077_v56 }
 0x1bf   : > { %v2465_v51 = vadd.f32 %v2464_v6, %v2450_v33 }
 0x1c0   : > { %v2042_v23 = vadd.f32 %v4045_v41, %v2022_v50  ;;  %vm2285_vm15 = vcmp.lt.s32.totalorder %v2187_v10, 12  ;;  %vm2319_vm0 = vcmp.lt.s32.totalorder %v2303_v39, 192 }
 0x1c1   : > { %v1579_v14 = vpop.f32.mrf.mxu2  ;;  %vm2335_vm1 = vmand %vm2285_vm15, %vm2319_vm0 }
 0x1c2   : > { %v2058_v59 = vmax.f32 %v2042_v23, 0.0  ;;  %v1598_v31 = vadd.f32 %v1579_v14, %v1404_v55 }
 0x1c3   : > { %v1845_v57 = vpop.f32.mrf.mxu3  ;;  %v1387_v46 = vpop.f32.mrf.mxu1 }
 0x1c4   : > { %v2381_v16 = vsel %vm2333_vm13, %v2058_v59, 0.0  ;;  %v1864_v61 = vadd.f32 %v1845_v57, %v1598_v31  ;;  %v1405_v38 = vadd.f32 %v1387_v46, %v4036_v28 }
 0x1c5   : > { %v3350_v30 = vpack.c.bf16 %v2381_v16, %v2380_v18  ;;  %v2428_v62 = vadd.f32 %v2427_v21, %v2381_v16  ;;  %v2451_v43 = vmul.f32 %v2381_v16, %v2381_v16  ;;  %v2006_v13 = vpop.f32.mrf.mxu0 }
 0x1c6   : > { %v2023_v45 = vadd.f32 %v2004_v60, %v1864_v61 }
 0x1c7   : > { %3373 = vst [vmem:[%s4063_s27 + $0x30] sm:$0xff] %v3350_v30   ;;  %v2466_v0 = vadd.f32 %v2465_v51, %v2451_v43 }
 0x1c8   : > { %v2043_v8 = vadd.f32 %v4045_v41, %v2023_v45 }
 0x1c9   : > { %v1581_v11 = vpop.f32.mrf.mxu2 }
 0x1ca   : > { %v2059_v40 = vmax.f32 %v2043_v8, 0.0  ;;  %v1599_v1 = vadd.f32 %v1581_v11, %v1405_v38 }
 0x1cb   : > { %v1847_v4 = vpop.f32.mrf.mxu3 }
 0x1cc   : > { %v2382_v15 = vsel %vm2318_vm14, %v2059_v40, 0.0  ;;  %v1865_v2 = vadd.f32 %v1847_v4, %v1599_v1 }
 0x1cd   : > { %v2429_v17 = vadd.f32 %v2428_v62, %v2382_v15  ;;  %v2452_v12 = vmul.f32 %v2382_v15, %v2382_v15 }
 0x1ce   : > { %v2024_v19 = vadd.f32 %v2006_v13, %v1865_v2 }
 0x1cf   : > { %v2467_v28 = vadd.f32 %v2466_v0, %v2452_v12 }
 0x1d0   : > { %v2044_v20 = vadd.f32 %v4045_v41, %v2024_v19 }
 0x1d2   : > { %v2060_v47 = vmax.f32 %v2044_v20, 0.0 }
 0x1d4   : > { %v2383_v25 = vsel %vm2335_vm1, %v2060_v47, 0.0 }
 0x1d5   : > { %v3355_v32 = vpack.c.bf16 %v2383_v25, %v2382_v15  ;;  %v2430_v9 = vadd.f32 %v2429_v17, %v2383_v25  ;;  %v2453_v24 = vmul.f32 %v2383_v25, %v2383_v25 }
 0x1d7   : > { %3374 = vst [vmem:[%s4063_s27 + $0x38] sm:$0xff] %v3355_v32   ;;  %v2431_v34 = vrot.slane %v2430_v9, 4  ;;  %v2468_v49 = vadd.f32 %v2467_v28, %v2453_v24 }
 0x1d9   : > { %v2432_v27 = vadd.f32 %v2431_v34, %v2430_v9  ;;  %v2469_v5 = vrot.slane %v2468_v49, 4 }
 0x1db   : > { %v2433_v26 = vrot.slane %v2432_v27, 2  ;;  %v2470_v53 = vadd.f32 %v2469_v5, %v2468_v49 }
 0x1dd   : > { %v2434_v52 = vadd.f32 %v2433_v26, %v2432_v27  ;;  %v2471_v6 = vrot.slane %v2470_v53, 2 }
 0x1df   : > { %v2435_v36 = vrot.slane %v2434_v52, 1  ;;  %v2472_v41 = vadd.f32 %v2471_v6, %v2470_v53 }
 0x1e1   : > { %v2436_v7 = vadd.f32 %v2435_v36, %v2434_v52  ;;  %v2473_v22 = vrot.slane %v2472_v41, 1 }
 0x1e3   : > { %2437 = vst [vmem:[%s254_s7] sm:$0x1] %v2436_v7  ;;  %v2474_v37 = vadd.f32 %v2473_v22, %v2472_v41 }
 0x1e5   : > { %2475 = vst [vmem:[%s254_s7 + $0x1] sm:$0x1] %v2474_v37 }
 0x1e6 PF: > { %s15_s19 = sadd.s32 1, %s3480_s19   ;;  %s4152_s15 = smov %s3472_s17 }
 0x1e7   : > { %p12_p7 = scmp.ge.s32.totalorder %s15_s19, 6   ;;  %s4153_s16 = smov %s3476_s18 }
 0x1e8   : > { %s4154_s17 = smov %s4157_s20  ;;  %s4155_s18 = smov %s4161_s21 }
 0x1e9   :  { %14 = sbr.rel (!%p12_p7) target bundleno = 3 (0x3), region = 82 }

// kernel: deconv_block_forward.4
= control target key start
LH: loop header
LB: loop body
LE: loop exit
PB: predicated region body
PF: predicated region fallthrough
CT: control target
= control target key end

     0   :  { %s5905_s21 = smov 0   ;;  %s5907_s22 = smov 0   ;;  %s7027_s0 = inlined_call_operand.vmem [shape: bf16[2,2,208,16], index: 0, kind: input, shape index: {}]   ;;  %s7028_s1 = inlined_call_operand.vmem [shape: bf16[2,2,208,16], index: 1, kind: input, shape index: {}]   ;;  %s7029_s2 = inlined_call_operand.vmem [shape: bf16[9,16,128], index: 2, kind: input, shape index: {}]   ;;  %s7030_s3 = inlined_call_operand.vmem [shape: bf16[9,16,128], index: 3, kind: input, shape index: {}]   ;;  %s7031_s4 = inlined_call_operand.vmem [shape: f32[1,128], index: 4, kind: input, shape index: {}]   ;;  %s7032_s5 = inlined_call_operand.vmem [shape: bf16[2,2,168,128], index: 5, kind: output, shape index: {0}]   ;;  %s7033_s6 = inlined_call_operand.vmem [shape: f32[2,2,2,128], index: 6, kind: output, shape index: {1}]  }
   0x1   :  { %s5909_s23 = smov 0   ;;  %s5911_s24 = smov 0  }
   0x2   :  { %s5913_s25 = smov 0  }
   0x3 LB: > { %s26_s26 = sadd.s32 1, %s5860_s23  ;;  %s29_s27 = sadd.s32 1, %s5864_s24  ;;  %s5868_s25 = sphi %s5913_s25, %s17_s25   ;;  %s5864_s24 = sphi %s5911_s24, %s7037_s24   ;;  %s5860_s23 = sphi %s5909_s23, %s7036_s23   ;;  %s5856_s22 = sphi %s5907_s22, %s7035_s22   ;;  %s5852_s21 = sphi %s5905_s21, %s7034_s21  }
   0x4   : > { %p27_p0 = scmp.ge.s32.totalorder %s26_s26, 2  ;;  %p4804_p1 = scmp.ge.s32.totalorder %s5868_s25, 1 }
   0x5   : > { %p253_p2 = scmp.lt.s32.totalorder %s5868_s25, 5 }
   0x6   : > { %s7039_s26 = smov (%p27_p0, %s26_s26), 0  ;;  %s7041_s27 = smov (!%p27_p0, %s29_s27), %s5864_s24 }
   0x7   : > { %p254_p3 = pnand %p4804_p1, %p253_p2  ;;  %p31_p4 = scmp.ge.s32.totalorder %s7041_s27, 2 }
   0x8   : > { %p308_p5 = scmp.lt.s32.totalorder (!%p254_p3), %s5856_s22, 1  ;;  %p310_p6 = scmp.lt.s32.totalorder (!%p254_p3), %s5852_s21, 1 }
   0x9   : > { %s7043_s27 = smov (%p31_p4, %s7041_s27), 0  ;;  %257 = sbr.rel (%p254_p3) target bundleno = 952 (0x3b8), region = 40 }
   0xa   : > { %s5548_s28 = sshll.u32 (!%p254_p3), %s5852_s21, 7 }
   0xe   : > { %v5560_v0 = vld [vmem:[%s7029_s2] sm:$0xff]  ;;  %v5561_v1 = vld [vmem:[%s7029_s2 + $0x8] sm:$0xff]  ;;  %v5562_v4 = vld [vmem:[%s7029_s2 + $0x10] sm:$0xff]  ;;  %s7045_s22 = smov (!%p308_p5, %s5856_s22), 1  ;;  %vm520_vm0 = vcmask 130048   ;;  %vm717_vm2 = vcmask 1046528  }
   0xf   : > { %v5584_v2 = vld [vmem:[%s7029_s2 + $0x20] sm:$0xff]  ;;  %v5585_v3 = vld [vmem:[%s7029_s2 + $0x28] sm:$0xff]  ;;  %v5573_v5 = vld [vmem:[%s7029_s2 + $0x18] sm:$0xff]  ;;  %654 = vmatpush.bf16.msra.mxu1 %v5560_v0  ;;  %561 = vmatpush.bf16.msra.mxu0 %v5561_v1  ;;  %s5959_s16 = scalar_select %p310_p6, %s5852_s21, 1  ;;  %vm426_vm1 = vsmask.f32 7424 }
  0x10   : > { %5784 = vmatpush.bf16.msra.mxu3 %v5560_v0  ;;  %5783 = vmatpush.bf16.msra.mxu2 %v5561_v1  ;;  %s5786_s17 = smul.u32 52, %s7045_s22  ;;  %v5596_v1 = vld [vmem:[%s7029_s2 + $0x30] sm:$0xff] }
  0x11   : > { %s5785_s18 = smul.u32 26, %s5959_s16 }
  0x12   : > { %s5787_s21 = smul.u32 21, %s5959_s16 }
  0x13   : > { %1275 = vmatpush.bf16.msrb.mxu0 %v5584_v2  ;;  %1426 = vmatpush.bf16.msrb.mxu1 %v5585_v3  ;;  %s5963_s19 = sadd.s32 %s5786_s17, %s5785_s18  ;;  %v5607_v2 = vld [vmem:[%s7029_s2 + $0x38] sm:$0xff]  ;;  %s5788_s8 = smul.u32 42, %s7045_s22 }
  0x14   : > { %785 = vmatpush.bf16.msrb.mxu2 %v5562_v4  ;;  %985 = vmatpush.bf16.msrb.mxu3 %v5573_v5  ;;  %s4805_s20 = sshll.u32 %s5963_s19, 2 }
  0x15   : > { %s5971_s30 = scalar_lea.vmem %s7027_s0, %s4805_s20  ;;  %s6287_s12 = scalar_lea.vmem %s7028_s1, %s4805_s20 }
  0x16   : > { %v5679_v6 = vld [vmem:[%s5971_s30] sm:$0xff]   ;;  %v5975_v7 = vld [vmem:[%s5971_s30 + $0x8] sm:$0xff]  ;;  %v5978_v8 = vld [vmem:[%s5971_s30 + $0x30] sm:$0xff]  ;;  %s332_s9 = sadd.s32 %s5788_s8, %s5787_s21  ;;  %s4808_s20 = sshll.u32 %s7045_s22, 1 }
  0x17   : > { %v428_v9 = vshrl.u32 %v5679_v6, 16  ;;  %v430_v10 = vshll.u32 %v5679_v6, 16  ;;  %4867 = vmatmul.msk.bf16.vlgmr.msra.gmra.mxu1 %vm520_vm0, %v5679_v6  ;;  %v5982_v11 = vld [vmem:[%s5971_s30 + $0x38] sm:$0xff]  ;;  %v435_v12 = vshll.u32 %v5975_v7, 16  ;;  %4873 = vmatmul.msk.bf16.vlgmr.msra.gmra.mxu3 %vm520_vm0, %v5978_v8  ;;  %v475_v13 = vshll.u32 %v5978_v8, 16  ;;  %v5998_v24 = vld [vmem:[%s5971_s30 + $0x10] sm:$0xff]  ;;  %s340_s13 = sadd.s32 %s4808_s20, %s5959_s16 }
  0x18   : > { %v479_v14 = vshrl.u32 %v5978_v8, 16  ;;  %v483_v16 = vshll.u32 %v5982_v11, 16  ;;  %v6001_v25 = vld [vmem:[%s5971_s30 + $0x40] sm:$0xff]  ;;  %v439_v26 = vshrl.u32 %v5975_v7, 16  ;;  %v443_v27 = vshll.u32 %v5998_v24, 16  ;;  %v6016_v36 = vld [vmem:[%s5971_s30 + $0x18] sm:$0xff]  ;;  %1916 = vmatpush.bf16.msra.mxu3 %v5607_v2 }
  0x19   : > { %v432_v15 = vrot.slane %v430_v10, 1  ;;  %v437_v17 = vrot.slane %v435_v12, 1  ;;  %v5990_v18 = vrot.slane %v475_v13, 1  ;;  %v487_v28 = vshrl.u32 %v5982_v11, 16  ;;  %v6019_v37 = vld [vmem:[%s5971_s30 + $0x48] sm:$0xff]  ;;  %v6036_v52 = vld [vmem:[%s5971_s30 + $0x20] sm:$0xff] }
  0x1a   : > { %v485_v20 = vrot.slane %v483_v16, 1  ;;  %v491_v29 = vshll.u32 %v6001_v25, 16  ;;  %v445_v31 = vrot.slane %v443_v27, 1  ;;  %v447_v38 = vshrl.u32 %v5998_v24, 16  ;;  %v364_v46 = vld [vmem:[%s5971_s30 + $0x50] sm:$0xf] }
  0x1b   : > { %v433_v19 = vor.u32 %v432_v15, %v428_v9  ;;  %v481_v21 = vor.u32 %v479_v14, %v5990_v18  ;;  %v441_v30 = vor.u32 %v439_v26, %v437_v17  ;;  %v451_v39 = vshll.u32 %v6016_v36, 16  ;;  %v367_v47 = vld [vmem:[%s5971_s30 + $0x54] sm:$0x1]  ;;  %v6053_v0 = vld [vmem:[%s5971_s30 + $0x28] sm:$0xff]  ;;  %v5608_v14 = vld [vmem:[%s7029_s2 + $0x40] sm:$0xff]  ;;  %s4807_s10 = sshll.u32 %s332_s9, 2 }
  0x1c   : > { %v489_v32 = vor.u32 %v487_v28, %v485_v20  ;;  %v493_v33 = vrot.slane %v491_v29, 1  ;;  %v495_v40 = vshrl.u32 %v6001_v25, 16  ;;  %v499_v41 = vshll.u32 %v6019_v37, 16  ;;  %v5619_v15 = vld [vmem:[%s7030_s3] sm:$0xff]  ;;  %v5756_v27 = vld [vmem:[%s5971_s30 + $0x8] sm:$0xf0]  ;;  %s6911_s19 = scalar_lea.vmem %s7032_s5, %s4807_s10 }
  0x1d   : > { %v438_v22 = vsel %vm426_vm1, %v433_v19, %v437_v17  ;;  %v486_v23 = vsel %vm426_vm1, %v481_v21, %v485_v20  ;;  %v446_v34 = vsel %vm426_vm1, %v441_v30, %v445_v31  ;;  %v449_v42 = vor.u32 %v447_v38, %v445_v31  ;;  %v5752_v16 = vld [vmem:[%s5971_s30] sm:$0xf0]  ;;  %v5753_v17 = vld [vmem:[%s5971_s30] sm:$0xe]  ;;  %2266 = vmatpush.bf16.msra.mxu1 %v5619_v15  ;;  %v5563_v20 = vld [vmem:[%s5971_s30 + $0x8] sm:$0xff]  ;;  %s4809_s22 = sshll.u32 %s340_s13, 1 }
  0x1e   : > { %4852 = vmatmul.msk.bf16.vlgmr.msra.gmra.mxu0 %vm520_vm0, %v438_v22  ;;  %4858 = vmatmul.msk.bf16.vlgmr.msra.gmra.mxu2 %vm520_vm0, %v486_v23  ;;  %v494_v35 = vsel %vm426_vm1, %v489_v32, %v493_v33  ;;  %v453_v43 = vrot.slane %v451_v39, 1  ;;  %v497_v44 = vor.u32 %v495_v40, %v493_v33  ;;  %v501_v45 = vrot.slane %v499_v41, 1  ;;  %v5757_v28 = vld [vmem:[%s5971_s30 + $0x8] sm:$0xe]  ;;  %v5574_v31 = vld [vmem:[%s5971_s30 + $0x10] sm:$0xff]  ;;  %v5566_v2 = vld [vmem:[%s5971_s30 + $0x20] sm:$0xff] }
  0x1f   : > { %v413_v50 = vunpack.c.l.b16 %v364_v46  ;;  %v414_v51 = vunpack.c.l.b16 %v367_v47  ;;  %v455_v54 = vshrl.u32 %v6016_v36, 16  ;;  %v459_v55 = vshll.u32 %v6036_v52, 16  ;;  %1626 = vmatpush.bf16.msra.mxu2 %v5596_v1  ;;  %2067 = vmatpush.bf16.msra.mxu0 %v5608_v14  ;;  %v5755_v33 = vld [vmem:[%s5971_s30 + $0x8] sm:$0xff]   ;;  %v5575_v47 = vld [vmem:[%s5971_s30 + $0x18] sm:$0xff] }
  0x20   : > { %v454_v48 = vsel %vm426_vm1, %v449_v42, %v453_v43  ;;  %v502_v49 = vsel %vm426_vm1, %v497_v44, %v501_v45  ;;  %v503_v56 = vshrl.u32 %v6019_v37, 16  ;;  %v463_v3 = vshrl.u32 %v6036_v52, 16  ;;  %v5577_v14 = vld [vmem:[%s5971_s30 + $0x28] sm:$0xff] }
  0x21   : > { %v6038_v53 = vpack.c.b16 %v414_v51, %v413_v50  ;;  %v457_v58 = vor.u32 %v455_v54, %v453_v43  ;;  %v461_v59 = vrot.slane %v459_v55, 1  ;;  %v467_v4 = vshll.u32 %v6053_v0, 16  ;;  %v5565_v54 = vld [vmem:[%s5971_s30 + $0x18] sm:$0xff] }
  0x22   : > { %v505_v60 = vor.u32 %v503_v56, %v501_v45  ;;  %v617_v5 = vpack.c.b16 %v413_v50, %v413_v50  ;;  %v471_v19 = vshrl.u32 %v6053_v0, 16  ;;  %v5754_v21 = vor.u32 %v5753_v17, %v5752_v16 }
  0x23   : > { %v507_v57 = vshll.u32 %v6038_v53, 16  ;;  %v462_v62 = vsel %vm426_vm1, %v457_v58, %v461_v59  ;;  %v465_v6 = vor.u32 %v463_v3, %v461_v59  ;;  %v469_v9 = vrot.slane %v467_v4, 1  ;;  %v5576_v59 = vld [vmem:[%s5971_s30 + $0x20] sm:$0xff] }
  0x24   : > { %v511_v10 = vshrl.u32 %v6038_v53, 16  ;;  %v718_v23 = vrot.slane %v5754_v21, 1  ;;  %v719_v26 = vrot.slane %v5975_v7, 1  ;;  %v5758_v32 = vor.u32 %v5757_v28, %v5756_v27  ;;  %v5567_v27 = vld [vmem:[%s5971_s30 + $0x28] sm:$0xff] }
  0x25   : > { %v509_v61 = vrot.slane %v507_v57, 1  ;;  %v470_v12 = vsel %vm426_vm1, %v465_v6, %v469_v9  ;;  %v473_v22 = vor.u32 %v471_v19, %v469_v9  ;;  %v1143_v38 = vshrl.u32 %v5755_v33, 16 }
  0x26   : > { %v720_v30 = vsel %vm717_vm2, %v718_v23, %v719_v26  ;;  %v1150_v40 = vshll.u32 %v5574_v31, 16  ;;  %v721_v44 = vrot.slane %v5998_v24, 1  ;;  %v1158_v50 = vshll.u32 %v5575_v47, 16 }
  0x27   : > { %4868 = vmatmul.msk.bf16.gmra.mxu1 %vm520_vm0, %v5975_v7  ;;  %4874 = vmatmul.msk.bf16.gmra.mxu3 %vm520_vm0, %v5982_v11  ;;  %v510_v63 = vsel %vm426_vm1, %v505_v60, %v509_v61  ;;  %v513_v13 = vor.u32 %v511_v10, %v509_v61  ;;  %v478_v29 = vsel %vm426_vm1, %v473_v22, %v5990_v18  ;;  %v1360_v7 = vrot.slane %v5574_v31, 1  ;;  %v5564_v18 = vld [vmem:[%s5971_s30 + $0x10] sm:$0xff] }
  0x28   : > { %v1152_v43 = vrot.slane %v1150_v40, 1  ;;  %v722_v46 = vsel %vm717_vm2, %v719_v26, %v721_v44  ;;  %v1160_v55 = vrot.slane %v1158_v50, 1  ;;  %v723_v56 = vrot.slane %v6016_v36, 1  ;;  %v5578_v40 = vld [vmem:[%s5971_s30 + $0x30] sm:$0xff] }
  0x29   : > { %v1364_v60 = vrot.slane %v5576_v59, 1  ;;  %v1162_v61 = vshrl.u32 %v5575_v47, 16  ;;  %v725_v4 = vrot.slane %v6036_v52, 1  ;;  %v1366_v15 = vrot.slane %v5577_v14, 1 }
  0x2a   : > { %v724_v58 = vsel %vm717_vm2, %v721_v44, %v723_v56  ;;  %v1174_v21 = vshll.u32 %v5577_v14, 16  ;;  %v1178_v44 = vshrl.u32 %v5577_v14, 16 }
  0x2b   : > { %v1367_v26 = vsel %vm717_vm2, %v1364_v60, %v1366_v15 }
  0x2e   : > { %4853 = vmatmul.msk.bf16.gmra.mxu0 %vm520_vm0, %v446_v34  ;;  %4859 = vmatmul.msk.bf16.gmra.mxu2 %vm520_vm0, %v494_v35  ;;  %v1145_v34 = vshll.u32 %v5755_v33, 16  ;;  %v1359_v35 = vrot.slane %v5758_v32, 1 }
  0x30   : > { %v1147_v39 = vrot.slane %v1145_v34, 1  ;;  %v1361_v41 = vsel %vm717_vm2, %v1359_v35, %v1360_v7 }
  0x32   : > { %v1148_v42 = vor.u32 %v1147_v39, %v1143_v38 }
  0x34   : > { %v1153_v45 = vsel %vm426_vm1, %v1148_v42, %v1152_v43 }
  0x37   : > { %4869 = vmatmul.msk.bf16.gmra.mxu1 %vm520_vm0, %v5998_v24  ;;  %4875 = vmatmul.msk.bf16.gmra.mxu3 %vm520_vm0, %v6001_v25 }
  0x3e   : > { %4854 = vmatmul.msk.bf16.gmra.mxu0 %vm520_vm0, %v454_v48  ;;  %4860 = vmatmul.msk.bf16.gmra.mxu2 %vm520_vm0, %v502_v49  ;;  %v1362_v48 = vrot.slane %v5575_v47, 1  ;;  %v1154_v49 = vshrl.u32 %v5574_v31, 16 }
  0x40   : > { %v1363_v51 = vsel %vm717_vm2, %v1360_v7, %v1362_v48  ;;  %v1156_v24 = vor.u32 %v1154_v49, %v1152_v43  ;;  %v1365_v1 = vsel %vm717_vm2, %v1362_v48, %v1364_v60  ;;  %v5568_v49 = vld [vmem:[%s5971_s30 + $0x30] sm:$0xff] }
  0x42   : > { %v1161_v57 = vsel %vm426_vm1, %v1156_v24, %v1160_v55 }
  0x47   : > { %4870 = vmatmul.msk.bf16.gmra.mxu1 %vm520_vm0, %v6016_v36  ;;  %4876 = vmatmul.msk.bf16.gmra.mxu3 %vm520_vm0, %v6019_v37  ;;  %v1164_v36 = vor.u32 %v1162_v61, %v1160_v55 }
  0x4e   : > { %4855 = vmatmul.msk.bf16.gmra.mxu0 %vm520_vm0, %v462_v62  ;;  %4861 = vmatmul.msk.bf16.gmra.mxu2 %vm520_vm0, %v510_v63  ;;  %v1166_v62 = vshll.u32 %v5576_v59, 16 }
  0x50   : > { %v1168_v3 = vrot.slane %v1166_v62, 1  ;;  %v5579_v62 = vld [vmem:[%s5971_s30 + $0x38] sm:$0xff] }
  0x52   : > { %v1169_v6 = vsel %vm426_vm1, %v1164_v36, %v1168_v3 }
  0x57   : > { %4871 = vmatmul.msk.bf16.gmra.mxu1 %vm520_vm0, %v6036_v52  ;;  %4877 = vmatmul.msk.bf16.gmra.mxu3 %vm520_vm0, %v617_v5 }
  0x5e   : > { %4856 = vmatmul.msk.bf16.gmra.mxu0 %vm520_vm0, %v470_v12  ;;  %4862 = vmatmul.msk.bf16.gmra.mxu2 %vm520_vm0, %v513_v13  ;;  %v726_v13 = vsel %vm717_vm2, %v723_v56, %v725_v4 }
  0x67   : > { %4872 = vmatmul.msk.bf16.gmra.mxu1 %vm520_vm0, %v6053_v0  ;;  %4941 = vmatmul.msk.bf16.vlgmr.msrb.gmra.mxu3 %vm520_vm0, %v5563_v20  ;;  %v1170_v20 = vshrl.u32 %v5576_v59, 16 }
  0x69   : > { %v1172_v28 = vor.u32 %v1170_v20, %v1168_v3  ;;  %v1186_v3 = vshrl.u32 %v5578_v40, 16 }
  0x6e   : > { %4857 = vmatmul.msk.bf16.gmra.mxu0 %vm520_vm0, %v478_v29  ;;  %4884 = vmatmul.msk.bf16.vlgmr.msrb.gmra.mxu2 %vm520_vm0, %v720_v30  ;;  %v1176_v29 = vrot.slane %v1174_v21, 1  ;;  %v727_v30 = vrot.slane %v6053_v0, 1 }
  0x70   : > { %v1177_v34 = vsel %vm426_vm1, %v1172_v28, %v1176_v29  ;;  %v728_v39 = vsel %vm717_vm2, %v725_v4, %v727_v30  ;;  %v1180_v50 = vor.u32 %v1178_v44, %v1176_v29  ;;  %v1190_v4 = vshll.u32 %v5579_v62, 16  ;;  %v5580_v28 = vld [vmem:[%s5971_s30 + $0x40] sm:$0xff] }
  0x71   : > { %v1372_v29 = vrot.slane %v5580_v28, 1 }
  0x72   : > { %v1192_v14 = vrot.slane %v1190_v4, 1 }
  0x77   : > { %5015 = vmatmul.msk.bf16.vlgmr.msrb.gmra.mxu1 %vm520_vm0, %v1361_v41  ;;  %4942 = vmatmul.msk.bf16.gmra.mxu3 %vm520_vm0, %v5564_v18  ;;  %v1368_v41 = vrot.slane %v5578_v40, 1 }
  0x79   : > { %v1369_v48 = vsel %vm717_vm2, %v1366_v15, %v1368_v41  ;;  %v731_v15 = vrot.slane %v5982_v11, 1 }
  0x7e   : > { %4998 = vmatmul.msk.bf16.vlgmr.msrb.gmra.mxu0 %vm520_vm0, %v1153_v45  ;;  %4885 = vmatmul.msk.bf16.gmra.mxu2 %vm520_vm0, %v722_v46  ;;  %v1182_v45 = vshll.u32 %v5578_v40, 16 }
  0x87   : > { %5016 = vmatmul.msk.bf16.gmra.mxu1 %vm520_vm0, %v1363_v51  ;;  %4943 = vmatmul.msk.bf16.gmra.mxu3 %vm520_vm0, %v5565_v54  ;;  %v1184_v51 = vrot.slane %v1182_v45, 1  ;;  %v729_v54 = vrot.slane %v5978_v8, 1 }
  0x89   : > { %v730_v61 = vsel %vm717_vm2, %v727_v30, %v729_v54 }
  0x8e   : > { %4999 = vmatmul.msk.bf16.gmra.mxu0 %vm520_vm0, %v1161_v57  ;;  %4886 = vmatmul.msk.bf16.gmra.mxu2 %vm520_vm0, %v724_v58  ;;  %v1185_v57 = vsel %vm426_vm1, %v1180_v50, %v1184_v51 }
  0x94   : > { %v656_v63 = vpop.f32.mrf.mxu1 }
  0x97   : > { %5017 = vmatmul.msk.bf16.gmra.mxu1 %vm520_vm0, %v1365_v1  ;;  %4944 = vmatmul.msk.bf16.gmra.mxu3 %vm520_vm0, %v5566_v2 }
  0x9a   : > { %v686_v9 = vpop.f32.mrf.mxu3 }
  0x9b   : > { %v563_v5 = vpop.f32.mrf.mxu0 }
  0x9c   : > { %v6119_v10 = vadd.f32 %v656_v63, %v563_v5  ;;  %v658_v12 = vpop.f32.mrf.mxu1  ;;  %v1370_v63 = vrot.slane %v5579_v62, 1 }
  0x9e   : > { %5000 = vmatmul.msk.bf16.gmra.mxu0 %vm520_vm0, %v1169_v6  ;;  %4887 = vmatmul.msk.bf16.gmra.mxu2 %vm520_vm0, %v726_v13  ;;  %v1188_v13 = vor.u32 %v1186_v3, %v1184_v51  ;;  %v1373_v40 = vsel %vm717_vm2, %v1370_v63, %v1372_v29 }
  0xa0   : > { %v1193_v20 = vsel %vm426_vm1, %v1188_v13, %v1192_v14 }
  0xa1   : > { %v593_v16 = vpop.f32.mrf.mxu2 }
  0xa2   : > { %v6125_v19 = vadd.f32 %v686_v9, %v593_v16  ;;  %v688_v52 = vpop.f32.mrf.mxu3  ;;  %v1371_v9 = vsel %vm717_vm2, %v1368_v41, %v1370_v63  ;;  %v5570_v41 = vld [vmem:[%s5971_s30 + $0x40] sm:$0xff] }
  0xa3   : > { %v565_v17 = vpop.f32.mrf.mxu0 }
  0xa4   : > { %v6127_v22 = vadd.f32 %v658_v12, %v565_v17  ;;  %v661_v23 = vpop.f32.mrf.mxu1  ;;  %v5569_v12 = vld [vmem:[%s5971_s30 + $0x38] sm:$0xff] }
  0xa7   : > { %5018 = vmatmul.msk.bf16.gmra.mxu1 %vm520_vm0, %v1367_v26  ;;  %4945 = vmatmul.msk.bf16.gmra.mxu3 %vm520_vm0, %v5567_v27  ;;  %v732_v27 = vsel %vm717_vm2, %v729_v54, %v731_v15 }
  0xa9   : > { %v595_v31 = vpop.f32.mrf.mxu2 }
  0xaa   : > { %v6134_v33 = vadd.f32 %v688_v52, %v595_v31  ;;  %v691_v35 = vpop.f32.mrf.mxu3 }
  0xab   : > { %v568_v32 = vpop.f32.mrf.mxu0 }
  0xac   : > { %v6137_v7 = vadd.f32 %v661_v23, %v568_v32  ;;  %v663_v38 = vpop.f32.mrf.mxu1 }
  0xae   : > { %5001 = vmatmul.msk.bf16.gmra.mxu0 %vm520_vm0, %v1177_v34  ;;  %4888 = vmatmul.msk.bf16.gmra.mxu2 %vm520_vm0, %v728_v39  ;;  %v1194_v34 = vshrl.u32 %v5579_v62, 16 }
  0xb1   : > { %v598_v0 = vpop.f32.mrf.mxu2 }
  0xb2   : > { %v6143_v42 = vadd.f32 %v691_v35, %v598_v0  ;;  %v693_v43 = vpop.f32.mrf.mxu3  ;;  %v1198_v35 = vshll.u32 %v5580_v28, 16  ;;  %v1196_v0 = vor.u32 %v1194_v34, %v1192_v14 }
  0xb3   : > { %v570_v18 = vpop.f32.mrf.mxu0 }
  0xb4   : > { %v6145_v46 = vadd.f32 %v663_v38, %v570_v18  ;;  %v666_v47 = vpop.f32.mrf.mxu1  ;;  %v1200_v18 = vrot.slane %v1198_v35, 1  ;;  %v5572_v35 = vld [vmem:[%s5971_s30 + $0x50] sm:$0xff] }
  0xb7   : > { %5019 = vmatmul.msk.bf16.gmra.mxu1 %vm520_vm0, %v1369_v48  ;;  %4946 = vmatmul.msk.bf16.gmra.mxu3 %vm520_vm0, %v5568_v49  ;;  %v1201_v48 = vsel %vm426_vm1, %v1196_v0, %v1200_v18  ;;  %v737_v0 = vrot.slane %v6038_v53, 1 }
  0xb9   : > { %v600_v24 = vpop.f32.mrf.mxu2 }
  0xba   : > { %v6152_v56 = vadd.f32 %v693_v43, %v600_v24  ;;  %v696_v58 = vpop.f32.mrf.mxu3  ;;  %v733_v43 = vrot.slane %v6001_v25, 1  ;;  %v5581_v24 = vld [vmem:[%s5971_s30 + $0x48] sm:$0xff] }
  0xbb   : > { %v573_v55 = vpop.f32.mrf.mxu0  ;;  %v1206_v62 = vshll.u32 %v5581_v24, 16 }
  0xbc   : > { %v6155_v59 = vadd.f32 %v666_v47, %v573_v55  ;;  %v668_v60 = vpop.f32.mrf.mxu1  ;;  %v734_v54 = vsel %vm717_vm2, %v731_v15, %v733_v43  ;;  %v1374_v55 = vrot.slane %v5581_v24, 1 }
  0xbd   : > { %v1208_v4 = vrot.slane %v1206_v62, 1 }
  0xbe   : > { %5002 = vmatmul.msk.bf16.gmra.mxu0 %vm520_vm0, %v1185_v57  ;;  %4889 = vmatmul.msk.bf16.gmra.mxu2 %vm520_vm0, %v730_v61  ;;  %v1202_v61 = vshrl.u32 %v5580_v28, 16 }
  0xc0   : > { %v1204_v3 = vor.u32 %v1202_v61, %v1200_v18  ;;  %v5583_v18 = vld [vmem:[%s5971_s30 + $0x58] sm:$0x10] }
  0xc1   : > { %v603_v8 = vpop.f32.mrf.mxu2 }
  0xc2   : > { %v6161_v2 = vadd.f32 %v696_v58, %v603_v8  ;;  %v698_v36 = vpop.f32.mrf.mxu3  ;;  %v1209_v13 = vsel %vm426_vm1, %v1204_v3, %v1208_v4 }
  0xc3   : > { %v575_v1 = vpop.f32.mrf.mxu0 }
  0xc4   : > { %v6163_v5 = vadd.f32 %v668_v60, %v575_v1  ;;  %v671_v6 = vpop.f32.mrf.mxu1  ;;  %v1375_v1 = vsel %vm717_vm2, %v1372_v29, %v1374_v55  ;;  %v1210_v29 = vshrl.u32 %v5581_v24, 16 }
  0xc7   : > { %5020 = vmatmul.msk.bf16.gmra.mxu1 %vm520_vm0, %v1371_v9  ;;  %4947 = vmatmul.msk.bf16.gmra.mxu3 %vm520_vm0, %v5569_v12 }
  0xc9   : > { %v605_v16 = vpop.f32.mrf.mxu2 }
  0xca   : > { %v6170_v52 = vadd.f32 %v698_v36, %v605_v16  ;;  %v701_v21 = vpop.f32.mrf.mxu3  ;;  %v5571_v36 = vld [vmem:[%s5971_s30 + $0x48] sm:$0xff] }
  0xcb   : > { %v578_v17 = vpop.f32.mrf.mxu0 }
  0xcc   : > { %v6173_v23 = vadd.f32 %v671_v6, %v578_v17  ;;  %v673_v26 = vpop.f32.mrf.mxu1  ;;  %v735_v6 = vrot.slane %v6019_v37, 1 }
  0xce   : > { %5003 = vmatmul.msk.bf16.gmra.mxu0 %vm520_vm0, %v1193_v20  ;;  %4890 = vmatmul.msk.bf16.gmra.mxu2 %vm520_vm0, %v732_v27  ;;  %v736_v17 = vsel %vm717_vm2, %v733_v43, %v735_v6  ;;  %v5582_v20 = vld [vmem:[%s5971_s30 + $0x50] sm:$0xff]  ;;  %v738_v24 = vsel %vm717_vm2, %v735_v6, %v737_v0 }
  0xd1   : > { %v608_v11 = vpop.f32.mrf.mxu2 }
  0xd2   : > { %v6179_v31 = vadd.f32 %v701_v21, %v608_v11  ;;  %v703_v32 = vpop.f32.mrf.mxu3  ;;  %v1376_v21 = vrot.slane %v5582_v20, 1  ;;  %v1214_v11 = vshll.u32 %v5582_v20, 16 }
  0xd3   : > { %v580_v30 = vpop.f32.mrf.mxu0 }
  0xd4   : > { %v6181_v38 = vadd.f32 %v673_v26, %v580_v30  ;;  %v676_v39 = vpop.f32.mrf.mxu1  ;;  %v1377_v34 = vsel %vm717_vm2, %v1374_v55, %v1376_v21 }
  0xd7   : > { %5021 = vmatmul.msk.bf16.gmra.mxu1 %vm520_vm0, %v1373_v40  ;;  %4948 = vmatmul.msk.bf16.gmra.mxu3 %vm520_vm0, %v5570_v41  ;;  %v1212_v40 = vor.u32 %v1210_v29, %v1208_v4  ;;  %v1216_v41 = vrot.slane %v1214_v11, 1 }
  0xd9   : > { %v610_v44 = vpop.f32.mrf.mxu2 }
  0xda   : > { %v6188_v47 = vadd.f32 %v703_v32, %v610_v44  ;;  %v706_v49 = vpop.f32.mrf.mxu3 }
  0xdb   : > { %v583_v45 = vpop.f32.mrf.mxu0 }
  0xdc   : > { %v6191_v50 = vadd.f32 %v676_v39, %v583_v45  ;;  %v678_v51 = vpop.f32.mrf.mxu1 }
  0xde   : > { %5004 = vmatmul.msk.bf16.gmra.mxu0 %vm520_vm0, %v1201_v48  ;;  %4891 = vmatmul.msk.bf16.gmra.mxu2 %vm520_vm0, %v734_v54  ;;  %v1217_v48 = vsel %vm426_vm1, %v1212_v40, %v1216_v41 }
  0xe1   : > { %v613_v25 = vpop.f32.mrf.mxu2 }
  0xe2   : > { %v6197_v58 = vadd.f32 %v706_v49, %v613_v25  ;;  %v708_v60 = vpop.f32.mrf.mxu3 }
  0xe3   : > { %v585_v57 = vpop.f32.mrf.mxu0 }
  0xe4   : > { %v6199_v63 = vadd.f32 %v678_v51, %v585_v57  ;;  %v681_v8 = vpop.f32.mrf.mxu1  ;;  %v882_v57 = vld [vmem:[%s5971_s30 + $0x58] sm:$0xf] }
  0xe5   : > { %v927_v60 = vunpack.c.l.b16 %v882_v57 }
  0xe7   : > { %5022 = vmatmul.msk.bf16.gmra.mxu1 %vm520_vm0, %v1375_v1  ;;  %4949 = vmatmul.msk.bf16.gmra.mxu3 %vm520_vm0, %v5571_v36  ;;  %v1218_v36 = vshrl.u32 %v5582_v20, 16 }
  0xe9   : > { %v615_v9 = vpop.f32.mrf.mxu2  ;;  %v1220_v20 = vor.u32 %v1218_v36, %v1216_v41 }
  0xea   : > { %v987_v14 = vpop.f32.mrf.mxu3 }
  0xeb   : > { %v588_v12 = vpop.f32.mrf.mxu0 }
  0xec   : > { %v6207_v15 = vadd.f32 %v681_v8, %v588_v12  ;;  %v683_v16 = vpop.f32.mrf.mxu1  ;;  %v938_v12 = vpack.c.b16 %v927_v60, %v927_v60 }
  0xee   : > { %5005 = vmatmul.msk.bf16.gmra.mxu0 %vm520_vm0, %v1209_v13  ;;  %4892 = vmatmul.msk.bf16.gmra.mxu2 %vm520_vm0, %v736_v17  ;;  %v5630_v13 = vld [vmem:[%s7030_s3 + $0x8] sm:$0xff] }
  0xef   : > { %2556 = vmatpush.bf16.msrb.mxu2 %v5630_v13 }
  0xf1   : > { %v787_v26 = vpop.f32.mrf.mxu2 }
  0xf2   : > { %v841_v27 = vadd.f32 %v787_v26, %v6119_v10  ;;  %v989_v28 = vpop.f32.mrf.mxu3  ;;  %v4992_v10 = vld [vmem:[%s5971_s30 + $0x58] sm:$0xf] }
  0xf3   : > { %v590_v37 = vpop.f32.mrf.mxu0  ;;  %v6226_v55 = vor.u32 %v5583_v18, %v4992_v10  ;;  %v5642_v18 = vld [vmem:[%s7030_s3 + $0x18] sm:$0xff] }
  0xf4   : > { %v6214_v30 = vadd.f32 %v683_v16, %v590_v37  ;;  %v1428_v32 = vpop.f32.mrf.mxu1  ;;  %v1041_v39 = vadd.f32 %v987_v14, %v841_v27  ;;  %v5631_v14 = vld [vmem:[%s7030_s3 + $0x10] sm:$0xff]  ;;  %2907 = vmatpush.bf16.msrb.mxu0 %v5642_v18 }
  0xf5   : > { %v1222_v3 = vshll.u32 %v6226_v55, 16  ;;  %v5759_v16 = vld [vmem:[%s5971_s30 + $0x10] sm:$0xff]   ;;  %2707 = vmatpush.bf16.msrb.mxu3 %v5631_v14  ;;  %v1226_v60 = vshrl.u32 %v6226_v55, 16 }
  0xf6   : > { %v1786_v37 = vshll.u32 %v5759_v16, 16  ;;  %v1784_v40 = vshrl.u32 %v5759_v16, 16  ;;  %v5761_v14 = vld [vmem:[%s5971_s30 + $0x10] sm:$0xe] }
  0xf7   : > { %5023 = vmatmul.msk.bf16.gmra.mxu1 %vm520_vm0, %v1377_v34  ;;  %4950 = vmatmul.msk.bf16.gmra.mxu3 %vm520_vm0, %v5572_v35  ;;  %v1224_v26 = vrot.slane %v1222_v3, 1  ;;  %v5586_v3 = vld [vmem:[%s5971_s30 + $0x10] sm:$0xff] }
  0xf8   : > { %v1788_v10 = vrot.slane %v1786_v37, 1 }
  0xf9   : > { %v789_v43 = vpop.f32.mrf.mxu2  ;;  %v1225_v11 = vsel %vm426_vm1, %v1220_v20, %v1224_v26 }
  0xfa   : > { %v842_v44 = vadd.f32 %v789_v43, %v6127_v22  ;;  %v992_v49 = vpop.f32.mrf.mxu3  ;;  %v1378_v22 = vrot.slane %v6226_v55, 1 }
  0xfb   : > { %v1277_v45 = vpop.f32.mrf.mxu0 }
  0xfc   : > { %v1331_v51 = vadd.f32 %v1277_v45, %v1041_v39  ;;  %v1430_v54 = vpop.f32.mrf.mxu1  ;;  %v1042_v25 = vadd.f32 %v989_v28, %v842_v44  ;;  %v1379_v9 = vsel %vm717_vm2, %v1376_v21, %v1378_v22  ;;  %v6249_v21 = vld [vmem:[%s5971_s30 + $0x18] sm:$0xff]  ;;  %v1789_v44 = vor.u32 %v1788_v10, %v1784_v40 }
  0xfd   : > { %v1791_v41 = vshll.u32 %v6249_v21, 16  ;;  %v2001_v10 = vrot.slane %v6249_v21, 1 }
  0xfe   : > { %5006 = vmatmul.msk.bf16.gmra.mxu0 %vm520_vm0, %v1217_v48  ;;  %v6230_v53 = vadd.f32 %v1428_v32, %v1331_v51  ;;  %4893 = vmatmul.msk.bf16.gmra.mxu2 %vm520_vm0, %v738_v24 }
  0xff   : > { %v1793_v45 = vrot.slane %v1791_v41, 1 }
 0x101   : > { %v792_v61 = vpop.f32.mrf.mxu2 }
 0x102   : > { %v843_v62 = vadd.f32 %v792_v61, %v6137_v7  ;;  %v994_v1 = vpop.f32.mrf.mxu3 }
 0x103   : > { %v1279_v8 = vpop.f32.mrf.mxu0 }
 0x104   : > { %v1332_v4 = vadd.f32 %v1279_v8, %v1042_v25  ;;  %v1433_v6 = vpop.f32.mrf.mxu1  ;;  %v1043_v7 = vadd.f32 %v992_v49, %v843_v62  ;;  %v6272_v62 = vld [vmem:[%s5971_s30 + $0x20] sm:$0xff]  ;;  %v1228_v8 = vor.u32 %v1226_v60, %v1224_v26 }
 0x106   : > { %v6244_v17 = vadd.f32 %v1430_v54, %v1332_v4 }
 0x107   : > { %5024 = vmatmul.msk.bf16.gmra.mxu1 %vm520_vm0, %v1379_v9  ;;  %4951 = vmatmul.msk.bf16.gmra.mxu3 %vm520_vm0, %v938_v12  ;;  %v1795_v12 = vshrl.u32 %v6249_v21, 16 }
 0x109   : > { %v794_v27 = vpop.f32.mrf.mxu2 }
 0x10a   : > { %v844_v28 = vadd.f32 %v794_v27, %v6145_v46  ;;  %v997_v32 = vpop.f32.mrf.mxu3  ;;  %v5653_v46 = vld [vmem:[%s7030_s3 + $0x20] sm:$0xff] }
 0x10b   : > { %v1282_v29 = vpop.f32.mrf.mxu0  ;;  %3197 = vmatpush.bf16.msrb.mxu1 %v5653_v46  ;;  %v5609_v27 = vld [vmem:[%s6287_s12] sm:$0xff] }
 0x10c   : > { %v1333_v34 = vadd.f32 %v1282_v29, %v1043_v7  ;;  %v1435_v35 = vpop.f32.mrf.mxu1  ;;  %v1044_v39 = vadd.f32 %v994_v1, %v844_v28  ;;  %v1797_v7 = vor.u32 %v1795_v12, %v1793_v45  ;;  %v6320_v12 = vld [vmem:[%s5971_s30 + $0x30] sm:$0xff] }
 0x10e   : > { %5007 = vmatmul.msk.bf16.gmra.mxu0 %vm520_vm0, %v1225_v11  ;;  %v6258_v43 = vadd.f32 %v1433_v6, %v1333_v34  ;;  %4894 = vmatmul.msk.bf16.gmra.mxu2 %vm520_vm0, %v737_v0  ;;  %v1794_v0 = vsel %vm426_vm1, %v1789_v44, %v1793_v45  ;;  %v5587_v45 = vld [vmem:[%s5971_s30 + $0x18] sm:$0xff] }
 0x111   : > { %v797_v48 = vpop.f32.mrf.mxu2 }
 0x112   : > { %v845_v49 = vadd.f32 %v797_v48, %v6155_v59  ;;  %v999_v54 = vpop.f32.mrf.mxu3 }
 0x113   : > { %v1284_v51 = vpop.f32.mrf.mxu0 }
 0x114   : > { %v1334_v24 = vadd.f32 %v1284_v51, %v1044_v39  ;;  %v1438_v25 = vpop.f32.mrf.mxu1  ;;  %v1045_v57 = vadd.f32 %v997_v32, %v845_v49 }
 0x116   : > { %v6267_v61 = vadd.f32 %v1435_v35, %v1334_v24  ;;  %v1803_v24 = vshrl.u32 %v6272_v62, 16 }
 0x117   : > { %5025 = vmatmul.msk.bf16.gmra.mxu1 %vm520_vm0, %v1378_v22  ;;  %5129 = vmatmul.msk.bf16.vlgmr.msra.gmra.mxu3 %vm520_vm0, %v1794_v0  ;;  %v1799_v22 = vshll.u32 %v6272_v62, 16 }
 0x119   : > { %v799_v59 = vpop.f32.mrf.mxu2  ;;  %v1801_v16 = vrot.slane %v1799_v22, 1 }
 0x11a   : > { %v846_v1 = vadd.f32 %v799_v59, %v6163_v5  ;;  %v1002_v4 = vpop.f32.mrf.mxu3  ;;  %v5760_v5 = vld [vmem:[%s5971_s30 + $0x10] sm:$0xf0] }
 0x11b   : > { %v1287_v36 = vpop.f32.mrf.mxu0  ;;  %v5762_v29 = vor.u32 %v5761_v14, %v5760_v5  ;;  %v1802_v35 = vsel %vm426_vm1, %v1797_v7, %v1801_v16  ;;  %v5588_v7 = vld [vmem:[%s5971_s30 + $0x20] sm:$0xff] }
 0x11c   : > { %v1335_v6 = vadd.f32 %v1287_v36, %v1045_v57  ;;  %v1440_v55 = vpop.f32.mrf.mxu1  ;;  %v1046_v9 = vadd.f32 %v999_v54, %v846_v1 }
 0x11d   : > { %v2000_v40 = vrot.slane %v5762_v29, 1 }
 0x11e   : > { %5008 = vmatmul.msk.bf16.gmra.mxu0 %vm520_vm0, %v1228_v8  ;;  %v6279_v13 = vadd.f32 %v1438_v25, %v1335_v6  ;;  %5072 = vmatmul.msk.bf16.vlgmr.msra.gmra.mxu2 %vm520_vm0, %v5586_v3  ;;  %v5610_v8 = vld [vmem:[%s6287_s12 + $0x8] sm:$0xff] }
 0x11f   : > { %v2002_v44 = vsel %vm717_vm2, %v2000_v40, %v2001_v10 }
 0x121   : > { %v802_v20 = vpop.f32.mrf.mxu2 }
 0x122   : > { %v847_v26 = vadd.f32 %v802_v20, %v6173_v23  ;;  %v1004_v28 = vpop.f32.mrf.mxu3  ;;  %v6300_v23 = vld [vmem:[%s5971_s30 + $0x28] sm:$0xff] }
 0x123   : > { %v1289_v37 = vpop.f32.mrf.mxu0  ;;  %v1807_v21 = vshll.u32 %v6300_v23, 16 }
 0x124   : > { %v1336_v11 = vadd.f32 %v1289_v37, %v1046_v9  ;;  %v1443_v32 = vpop.f32.mrf.mxu1  ;;  %v1047_v34 = vadd.f32 %v1002_v4, %v847_v26  ;;  %v2003_v9 = vrot.slane %v6272_v62, 1  ;;  %v1815_v62 = vshll.u32 %v6320_v12, 16 }
 0x125   : > { %v1809_v57 = vrot.slane %v1807_v21, 1 }
 0x126   : > { %v6294_v39 = vadd.f32 %v1440_v55, %v1336_v11  ;;  %v2004_v14 = vsel %vm717_vm2, %v2001_v10, %v2003_v9  ;;  %v1817_v29 = vrot.slane %v1815_v62, 1 }
 0x127   : > { %5201 = vmatmul.msk.bf16.vlgmr.msra.gmra.mxu1 %vm520_vm0, %v5609_v27  ;;  %5130 = vmatmul.msk.bf16.gmra.mxu3 %vm520_vm0, %v1802_v35  ;;  %v1811_v27 = vshrl.u32 %v6300_v23, 16  ;;  %v5611_v35 = vld [vmem:[%s6287_s12 + $0x10] sm:$0xff] }
 0x129   : > { %v804_v41 = vpop.f32.mrf.mxu2 }
 0x12a   : > { %v848_v18 = vadd.f32 %v804_v41, %v6181_v38  ;;  %v1007_v48 = vpop.f32.mrf.mxu3  ;;  %v1805_v38 = vor.u32 %v1803_v24, %v1801_v16  ;;  %v5589_v24 = vld [vmem:[%s5971_s30 + $0x28] sm:$0xff] }
 0x12b   : > { %v1292_v46 = vpop.f32.mrf.mxu0 }
 0x12c   : > { %v1337_v49 = vadd.f32 %v1292_v46, %v1047_v34  ;;  %v1445_v51 = vpop.f32.mrf.mxu1  ;;  %v1048_v54 = vadd.f32 %v1004_v28, %v848_v18  ;;  %v1810_v6 = vsel %vm426_vm1, %v1805_v38, %v1809_v57 }
 0x12e   : > { %5146 = vmatmul.msk.bf16.vlgmr.msra.gmra.mxu0 %vm520_vm0, %v2002_v44  ;;  %v6308_v25 = vadd.f32 %v1443_v32, %v1337_v49  ;;  %5073 = vmatmul.msk.bf16.gmra.mxu2 %vm520_vm0, %v5587_v45  ;;  %v2005_v45 = vrot.slane %v6300_v23, 1 }
 0x131   : > { %v807_v0 = vpop.f32.mrf.mxu2 }
 0x132   : > { %v849_v60 = vadd.f32 %v807_v0, %v6191_v50  ;;  %v1009_v1 = vpop.f32.mrf.mxu3 }
 0x133   : > { %v1294_v59 = vpop.f32.mrf.mxu0 }
 0x134   : > { %v1338_v36 = vadd.f32 %v1294_v59, %v1048_v54  ;;  %v1448_v3 = vpop.f32.mrf.mxu1  ;;  %v1049_v4 = vadd.f32 %v1007_v48, %v849_v60  ;;  %v6340_v48 = vld [vmem:[%s5971_s30 + $0x38] sm:$0xff]  ;;  %v2006_v54 = vsel %vm717_vm2, %v2003_v9, %v2005_v45  ;;  %v1819_v60 = vshrl.u32 %v6320_v12, 16 }
 0x135   : > { %v1823_v23 = vshll.u32 %v6340_v48, 16 }
 0x136   : > { %v6314_v55 = vadd.f32 %v1445_v51, %v1338_v36 }
 0x137   : > { %5202 = vmatmul.msk.bf16.gmra.mxu1 %vm520_vm0, %v5610_v8  ;;  %5131 = vmatmul.msk.bf16.gmra.mxu3 %vm520_vm0, %v1810_v6  ;;  %v1825_v8 = vrot.slane %v1823_v23, 1 }
 0x139   : > { %v809_v50 = vpop.f32.mrf.mxu2 }
 0x13a   : > { %v850_v22 = vadd.f32 %v809_v50, %v6199_v63  ;;  %v1012_v16 = vpop.f32.mrf.mxu3  ;;  %v1813_v63 = vor.u32 %v1811_v27, %v1809_v57  ;;  %v5590_v27 = vld [vmem:[%s5971_s30 + $0x30] sm:$0xff] }
 0x13b   : > { %v1297_v5 = vpop.f32.mrf.mxu0 }
 0x13c   : > { %v1339_v20 = vadd.f32 %v1297_v5, %v1049_v4  ;;  %v1450_v26 = vpop.f32.mrf.mxu1  ;;  %v1050_v37 = vadd.f32 %v1009_v1, %v850_v22  ;;  %v1818_v46 = vsel %vm426_vm1, %v1813_v63, %v1817_v29  ;;  %v5612_v4 = vld [vmem:[%s6287_s12 + $0x18] sm:$0xff] }
 0x13e   : > { %5147 = vmatmul.msk.bf16.gmra.mxu0 %vm520_vm0, %v2004_v14  ;;  %v6328_v28 = vadd.f32 %v1448_v3, %v1339_v20  ;;  %5074 = vmatmul.msk.bf16.gmra.mxu2 %vm520_vm0, %v5588_v7  ;;  %v2007_v7 = vrot.slane %v6320_v12, 1 }
 0x141   : > { %v812_v11 = vpop.f32.mrf.mxu2 }
 0x142   : > { %v851_v32 = vadd.f32 %v812_v11, %v6207_v15  ;;  %v1014_v40 = vpop.f32.mrf.mxu3 }
 0x143   : > { %v1299_v34 = vpop.f32.mrf.mxu0 }
 0x144   : > { %v1340_v10 = vadd.f32 %v1299_v34, %v1050_v37  ;;  %v1453_v41 = vpop.f32.mrf.mxu1  ;;  %v1051_v18 = vadd.f32 %v1012_v16, %v851_v32  ;;  %v6360_v16 = vld [vmem:[%s5971_s30 + $0x40] sm:$0xff]  ;;  %v2008_v37 = vsel %vm717_vm2, %v2005_v45, %v2007_v7  ;;  %v1827_v32 = vshrl.u32 %v6340_v48, 16 }
 0x145   : > { %v1831_v12 = vshll.u32 %v6360_v16, 16 }
 0x146   : > { %v6334_v44 = vadd.f32 %v1450_v26, %v1340_v10 }
 0x147   : > { %5203 = vmatmul.msk.bf16.gmra.mxu1 %vm520_vm0, %v5611_v35  ;;  %5132 = vmatmul.msk.bf16.gmra.mxu3 %vm520_vm0, %v1818_v46  ;;  %v1833_v35 = vrot.slane %v1831_v12, 1 }
 0x149   : > { %v814_v15 = vpop.f32.mrf.mxu2 }
 0x14a   : > { %v852_v49 = vadd.f32 %v814_v15, %v6214_v30  ;;  %v1017_v21 = vpop.f32.mrf.mxu3  ;;  %v1821_v30 = vor.u32 %v1819_v60, %v1817_v29  ;;  %v5591_v60 = vld [vmem:[%s5971_s30 + $0x38] sm:$0xff] }
 0x14b   : > { %v1302_v51 = vpop.f32.mrf.mxu0 }
 0x14c   : > { %v1341_v38 = vadd.f32 %v1302_v51, %v1051_v18  ;;  %v1455_v57 = vpop.f32.mrf.mxu1  ;;  %v1052_v0 = vadd.f32 %v1014_v40, %v852_v49  ;;  %v1826_v5 = vsel %vm426_vm1, %v1821_v30, %v1825_v8  ;;  %v5613_v18 = vld [vmem:[%s6287_s12 + $0x20] sm:$0xff] }
 0x14e   : > { %5148 = vmatmul.msk.bf16.gmra.mxu0 %vm520_vm0, %v2006_v54  ;;  %v6348_v59 = vadd.f32 %v1453_v41, %v1341_v38  ;;  %5075 = vmatmul.msk.bf16.gmra.mxu2 %vm520_vm0, %v5589_v24  ;;  %v2009_v24 = vrot.slane %v6340_v48, 1 }
 0x151   : > { %v817_v1 = vpop.f32.mrf.mxu2 }
 0x152   : > { %v853_v36 = vadd.f32 %v817_v1, %v6125_v19  ;;  %v1019_v6 = vpop.f32.mrf.mxu3 }
 0x153   : > { %v1304_v3 = vpop.f32.mrf.mxu0 }
 0x154   : > { %v1342_v9 = vadd.f32 %v1304_v3, %v1052_v0  ;;  %v1458_v50 = vpop.f32.mrf.mxu1  ;;  %v1053_v22 = vadd.f32 %v1017_v21, %v853_v36  ;;  %v6380_v21 = vld [vmem:[%s5971_s30 + $0x48] sm:$0xff]  ;;  %v2010_v0 = vsel %vm717_vm2, %v2007_v7, %v2009_v24  ;;  %v1835_v36 = vshrl.u32 %v6360_v16, 16 }
 0x155   : > { %v1839_v48 = vshll.u32 %v6380_v21, 16 }
 0x156   : > { %v6354_v14 = vadd.f32 %v1455_v57, %v1342_v9 }
 0x157   : > { %5204 = vmatmul.msk.bf16.gmra.mxu1 %vm520_vm0, %v5612_v4  ;;  %5133 = vmatmul.msk.bf16.gmra.mxu3 %vm520_vm0, %v1826_v5  ;;  %v1841_v4 = vrot.slane %v1839_v48, 1 }
 0x159   : > { %v819_v19 = vpop.f32.mrf.mxu2 }
 0x15a   : > { %v854_v20 = vadd.f32 %v819_v19, %v6134_v33  ;;  %v1022_v62 = vpop.f32.mrf.mxu3  ;;  %v1829_v33 = vor.u32 %v1827_v32, %v1825_v8  ;;  %v5592_v32 = vld [vmem:[%s5971_s30 + $0x40] sm:$0xff] }
 0x15b   : > { %v1307_v26 = vpop.f32.mrf.mxu0 }
 0x15c   : > { %v1343_v63 = vadd.f32 %v1307_v26, %v1053_v22  ;;  %v1460_v29 = vpop.f32.mrf.mxu1  ;;  %v1054_v11 = vadd.f32 %v1019_v6, %v854_v20  ;;  %v1834_v51 = vsel %vm426_vm1, %v1829_v33, %v1833_v35  ;;  %v5614_v22 = vld [vmem:[%s6287_s12 + $0x28] sm:$0xff] }
 0x15e   : > { %5149 = vmatmul.msk.bf16.gmra.mxu0 %vm520_vm0, %v2008_v37  ;;  %v6368_v34 = vadd.f32 %v1458_v50, %v1343_v63  ;;  %5076 = vmatmul.msk.bf16.gmra.mxu2 %vm520_vm0, %v5590_v27  ;;  %v2011_v27 = vrot.slane %v6360_v16, 1 }
 0x161   : > { %v822_v40 = vpop.f32.mrf.mxu2 }
 0x162   : > { %v855_v10 = vadd.f32 %v822_v40, %v6143_v42  ;;  %v1024_v46 = vpop.f32.mrf.mxu3 }
 0x163   : > { %v1309_v41 = vpop.f32.mrf.mxu0 }
 0x164   : > { %v1344_v45 = vadd.f32 %v1309_v41, %v1054_v11  ;;  %v1463_v15 = vpop.f32.mrf.mxu1  ;;  %v1055_v49 = vadd.f32 %v1022_v62, %v855_v10  ;;  %v6400_v62 = vld [vmem:[%s5971_s30 + $0x50] sm:$0xff]  ;;  %v2012_v11 = vsel %vm717_vm2, %v2009_v24, %v2011_v27  ;;  %v1843_v10 = vshrl.u32 %v6380_v21, 16 }
 0x165   : > { %v1847_v16 = vshll.u32 %v6400_v62, 16 }
 0x166   : > { %v6374_v54 = vadd.f32 %v1460_v29, %v1344_v45 }
 0x167   : > { %5205 = vmatmul.msk.bf16.gmra.mxu1 %vm520_vm0, %v5613_v18  ;;  %5134 = vmatmul.msk.bf16.gmra.mxu3 %vm520_vm0, %v1834_v51  ;;  %v1849_v18 = vrot.slane %v1847_v16, 1  ;;  %v5594_v16 = vld [vmem:[%s5971_s30 + $0x50] sm:$0xff] }
 0x169   : > { %v824_v42 = vpop.f32.mrf.mxu2 }
 0x16a   : > { %v856_v38 = vadd.f32 %v824_v42, %v6152_v56  ;;  %v1027_v23 = vpop.f32.mrf.mxu3  ;;  %v1837_v56 = vor.u32 %v1835_v36, %v1833_v35  ;;  %v5593_v36 = vld [vmem:[%s5971_s30 + $0x48] sm:$0xff] }
 0x16b   : > { %v1312_v57 = vpop.f32.mrf.mxu0 }
 0x16c   : > { %v1345_v30 = vadd.f32 %v1312_v57, %v1055_v49  ;;  %v1465_v8 = vpop.f32.mrf.mxu1  ;;  %v1056_v1 = vadd.f32 %v1024_v46, %v856_v38  ;;  %v1842_v26 = vsel %vm426_vm1, %v1837_v56, %v1841_v4  ;;  %v5615_v49 = vld [vmem:[%s6287_s12 + $0x30] sm:$0xff] }
 0x16e   : > { %5150 = vmatmul.msk.bf16.gmra.mxu0 %vm520_vm0, %v2010_v0  ;;  %v6388_v3 = vadd.f32 %v1463_v15, %v1345_v30  ;;  %5077 = vmatmul.msk.bf16.gmra.mxu2 %vm520_vm0, %v5591_v60  ;;  %v2013_v60 = vrot.slane %v6380_v21, 1 }
 0x171   : > { %v827_v6 = vpop.f32.mrf.mxu2 }
 0x172   : > { %v857_v9 = vadd.f32 %v827_v6, %v6161_v2  ;;  %v1029_v5 = vpop.f32.mrf.mxu3 }
 0x173   : > { %v1314_v50 = vpop.f32.mrf.mxu0 }
 0x174   : > { %v1346_v7 = vadd.f32 %v1314_v50, %v1056_v1  ;;  %v1468_v19 = vpop.f32.mrf.mxu1  ;;  %v1057_v20 = vadd.f32 %v1027_v23, %v857_v9  ;;  %v6420_v23 = vld [vmem:[%s5971_s30 + $0x58] sm:$0xff]  ;;  %v2014_v1 = vsel %vm717_vm2, %v2011_v27, %v2013_v60  ;;  %v1851_v9 = vshrl.u32 %v6400_v62, 16 }
 0x175   : > { %v1855_v21 = vshll.u32 %v6420_v23, 16 }
 0x176   : > { %v6394_v37 = vadd.f32 %v1465_v8, %v1346_v7 }
 0x177   : > { %5206 = vmatmul.msk.bf16.gmra.mxu1 %vm520_vm0, %v5614_v22  ;;  %5135 = vmatmul.msk.bf16.gmra.mxu3 %vm520_vm0, %v1842_v26  ;;  %v1857_v22 = vrot.slane %v1855_v21, 1 }
 0x179   : > { %v829_v2 = vpop.f32.mrf.mxu2 }
 0x17a   : > { %v858_v63 = vadd.f32 %v829_v2, %v6170_v52  ;;  %v1032_v12 = vpop.f32.mrf.mxu3  ;;  %v1845_v52 = vor.u32 %v1843_v10, %v1841_v4 }
 0x17b   : > { %v1317_v29 = vpop.f32.mrf.mxu0 }
 0x17c   : > { %v1347_v33 = vadd.f32 %v1317_v29, %v1057_v20  ;;  %v1470_v35 = vpop.f32.mrf.mxu1  ;;  %v1058_v40 = vadd.f32 %v1029_v5, %v858_v63  ;;  %v1850_v57 = vsel %vm426_vm1, %v1845_v52, %v1849_v18  ;;  %v5616_v20 = vld [vmem:[%s6287_s12 + $0x38] sm:$0xff] }
 0x17e   : > { %5151 = vmatmul.msk.bf16.gmra.mxu0 %vm520_vm0, %v2012_v11  ;;  %v6408_v41 = vadd.f32 %v1468_v19, %v1347_v33  ;;  %5078 = vmatmul.msk.bf16.gmra.mxu2 %vm520_vm0, %v5592_v32  ;;  %v5123_v11 = vld [vmem:[%s5971_s30 + $0x60] sm:$0xf]  ;;  %v5606_v32 = vld [vmem:[%s5971_s30 + $0x60] sm:$0x10]  ;;  %v2015_v33 = vrot.slane %v6400_v62, 1 }
 0x180   : > { %v2016_v10 = vsel %vm717_vm2, %v2013_v60, %v2015_v33 }
 0x181   : > { %v832_v46 = vpop.f32.mrf.mxu2 }
 0x182   : > { %v859_v45 = vadd.f32 %v832_v46, %v6179_v31  ;;  %v1034_v51 = vpop.f32.mrf.mxu3 }
 0x183   : > { %v1319_v15 = vpop.f32.mrf.mxu0 }
 0x184   : > { %v1348_v24 = vadd.f32 %v1319_v15, %v1058_v40  ;;  %v1473_v42 = vpop.f32.mrf.mxu1  ;;  %v1059_v38 = vadd.f32 %v1032_v12, %v859_v45  ;;  %v1859_v45 = vshrl.u32 %v6420_v23, 16 }
 0x186   : > { %v6414_v0 = vadd.f32 %v1470_v35, %v1348_v24 }
 0x187   : > { %5207 = vmatmul.msk.bf16.gmra.mxu1 %vm520_vm0, %v5615_v49  ;;  %5136 = vmatmul.msk.bf16.gmra.mxu3 %vm520_vm0, %v1850_v57  ;;  %v1861_v49 = vor.u32 %v1859_v45, %v1857_v22  ;;  %v5617_v57 = vld [vmem:[%s6287_s12 + $0x40] sm:$0xff] }
 0x189   : > { %v834_v31 = vpop.f32.mrf.mxu2 }
 0x18a   : > { %v860_v30 = vadd.f32 %v834_v31, %v6188_v47  ;;  %v1037_v48 = vpop.f32.mrf.mxu3  ;;  %v1853_v47 = vor.u32 %v1851_v9, %v1849_v18 }
 0x18b   : > { %v1322_v8 = vpop.f32.mrf.mxu0 }
 0x18c   : > { %v1349_v56 = vadd.f32 %v1322_v8, %v1059_v38  ;;  %v1475_v4 = vpop.f32.mrf.mxu1  ;;  %v1060_v6 = vadd.f32 %v1034_v51, %v860_v30  ;;  %v1858_v29 = vsel %vm426_vm1, %v1853_v47, %v1857_v22 }
 0x18e   : > { %5152 = vmatmul.msk.bf16.gmra.mxu0 %vm520_vm0, %v2014_v1  ;;  %v6428_v50 = vadd.f32 %v1473_v42, %v1349_v56  ;;  %5079 = vmatmul.msk.bf16.gmra.mxu2 %vm520_vm0, %v5593_v36  ;;  %v2017_v1 = vrot.slane %v6420_v23, 1 }
 0x191   : > { %v837_v5 = vpop.f32.mrf.mxu2 }
 0x192   : > { %v861_v7 = vadd.f32 %v837_v5, %v6197_v58  ;;  %v1039_v26 = vpop.f32.mrf.mxu3  ;;  %v6441_v58 = vor.u32 %v5606_v32, %v5123_v11  ;;  %v5665_v11 = vld [vmem:[%s7030_s3 + $0x30] sm:$0xff] }
 0x193   : > { %v1324_v19 = vpop.f32.mrf.mxu0  ;;  %3548 = vmatpush.bf16.msra.mxu3 %v5665_v11 }
 0x194   : > { %v1350_v27 = vadd.f32 %v1324_v19, %v1060_v6  ;;  %v1478_v2 = vpop.f32.mrf.mxu1  ;;  %v1061_v63 = vadd.f32 %v1037_v48, %v861_v7  ;;  %v1863_v15 = vshll.u32 %v6441_v58, 16  ;;  %v1867_v23 = vshrl.u32 %v6441_v58, 16  ;;  %v5618_v19 = vld [vmem:[%s6287_s12 + $0x48] sm:$0xff] }
 0x196   : > { %v6436_v12 = vadd.f32 %v1475_v4, %v1350_v27  ;;  %v1865_v51 = vrot.slane %v1863_v15, 1  ;;  %v2018_v4 = vsel %vm717_vm2, %v2015_v33, %v2017_v1  ;;  %v2019_v33 = vrot.slane %v6441_v58, 1  ;;  %v6486_v58 = vld [vmem:[%s6287_s12 + $0x8] sm:$0xff] }
 0x197   : > { %5208 = vmatmul.msk.bf16.gmra.mxu1 %vm520_vm0, %v5616_v20  ;;  %5137 = vmatmul.msk.bf16.gmra.mxu3 %vm520_vm0, %v1858_v29  ;;  %v5654_v29 = vld [vmem:[%s7030_s3 + $0x28] sm:$0xff] }
 0x198   : > { %v1866_v8 = vsel %vm426_vm1, %v1861_v49, %v1865_v51  ;;  %3348 = vmatpush.bf16.msra.mxu2 %v5654_v29  ;;  %v2164_v49 = vld [vmem:[%s6287_s12 + $0x50] sm:$0xf] }
 0x199   : > { %v839_v35 = vpop.f32.mrf.mxu2 }
 0x19a   : > { %v1918_v52 = vpop.f32.mrf.mxu3 }
 0x19b   : > { %v1327_v40 = vpop.f32.mrf.mxu0 }
 0x19c   : > { %v1351_v18 = vadd.f32 %v1327_v40, %v1061_v63  ;;  %v1480_v46 = vpop.f32.mrf.mxu1  ;;  %v1523_v63 = vld [vmem:[%s5971_s30 + $0x60] sm:$0xf] }
 0x19d   : > { %v1568_v35 = vunpack.c.l.b16 %v1523_v63  ;;  %v2020_v46 = vsel %vm717_vm2, %v2017_v1, %v2019_v33 }
 0x19e   : > { %5153 = vmatmul.msk.bf16.gmra.mxu0 %vm520_vm0, %v2016_v10  ;;  %v6448_v62 = vadd.f32 %v1478_v2, %v1351_v18  ;;  %5080 = vmatmul.msk.bf16.gmra.mxu2 %vm520_vm0, %v5594_v16  ;;  %v1869_v2 = vor.u32 %v1867_v23, %v1865_v51  ;;  %v5763_v10 = vld [vmem:[%s6287_s12] sm:$0xf0]  ;;  %v5764_v16 = vld [vmem:[%s6287_s12] sm:$0xe] }
 0x19f   : > { %v1579_v45 = vpack.c.b16 %v1568_v35, %v1568_v35 }
 0x1a1   : > { %v1628_v24 = vpop.f32.mrf.mxu2 }
 0x1a2   : > { %v1682_v38 = vadd.f32 %v1628_v24, %v6230_v53  ;;  %v1920_v60 = vpop.f32.mrf.mxu3  ;;  %v5595_v53 = vld [vmem:[%s5971_s30 + $0x58] sm:$0xff]  ;;  %s342_s30 = scalar_lea.vmem %s7033_s6, %s4809_s22 }
 0x1a3   : > { %v1329_v42 = vpop.f32.mrf.mxu0 }
 0x1a4   : > { %v2268_v31 = vpop.f32.mrf.mxu1  ;;  %v1972_v30 = vadd.f32 %v1918_v52, %v1682_v38  ;;  %v5691_v42 = vld [vmem:[%s6287_s12] sm:$0xff]  }
 0x1a7   : > { %5209 = vmatmul.msk.bf16.gmra.mxu1 %vm520_vm0, %v5617_v57  ;;  %5138 = vmatmul.msk.bf16.gmra.mxu3 %vm520_vm0, %v1866_v8  ;;  %v5765_v57 = vor.u32 %v5764_v16, %v5763_v10  ;;  %v5677_v8 = vld [vmem:[%s7030_s3 + $0x40] sm:$0xff] }
 0x1a8   : > { %3989 = vmatpush.bf16.msra.mxu1 %v5677_v8 }
 0x1a9   : > { %v1630_v36 = vpop.f32.mrf.mxu2  ;;  %v2640_v1 = vrot.slane %v5765_v57, 1 }
 0x1aa   : > { %v1683_v48 = vadd.f32 %v1630_v36, %v6244_v17  ;;  %v1923_v6 = vpop.f32.mrf.mxu3  ;;  %v2641_v36 = vrot.slane %v6486_v58, 1 }
 0x1ab   : > { %v2069_v56 = vpop.f32.mrf.mxu0 }
 0x1ac   : > { %v2123_v9 = vadd.f32 %v2069_v56, %v1972_v30  ;;  %v2270_v21 = vpop.f32.mrf.mxu1  ;;  %v1973_v47 = vadd.f32 %v1920_v60, %v1683_v48  ;;  %v2208_v60 = vunpack.c.l.b16 %v2164_v49  ;;  %v2426_v30 = vshll.u32 %v5691_v42, 16 }
 0x1ae   : > { %5154 = vmatmul.msk.bf16.gmra.mxu0 %vm520_vm0, %v2018_v4  ;;  %v6461_v22 = vadd.f32 %v2268_v31, %v2123_v9  ;;  %5081 = vmatmul.msk.bf16.gmra.mxu2 %vm520_vm0, %v5595_v53  ;;  %v2219_v56 = vpack.c.b16 %v2208_v60, %v2208_v60  ;;  %v2424_v9 = vshrl.u32 %v5691_v42, 16 }
 0x1b1   : > { %v1633_v5 = vpop.f32.mrf.mxu2 }
 0x1b2   : > { %v1684_v17 = vadd.f32 %v1633_v5, %v6258_v43  ;;  %v1925_v20 = vpop.f32.mrf.mxu3 }
 0x1b3   : > { %v2071_v7 = vpop.f32.mrf.mxu0 }
 0x1b4   : > { %v2124_v26 = vadd.f32 %v2071_v7, %v1973_v47  ;;  %v2273_v27 = vpop.f32.mrf.mxu1  ;;  %v1974_v32 = vadd.f32 %v1923_v6, %v1684_v17  ;;  %v2431_v47 = vshll.u32 %v6486_v58, 16  ;;  %v2642_v7 = vsel %vm717_vm2, %v2640_v1, %v2641_v36 }
 0x1b6   : > { %v6474_v43 = vadd.f32 %v2270_v21, %v2124_v26  ;;  %v2428_v21 = vrot.slane %v2426_v30, 1 }
 0x1b7   : > { %5210 = vmatmul.msk.bf16.gmra.mxu1 %vm520_vm0, %v5618_v19  ;;  %5139 = vmatmul.msk.bf16.gmra.mxu3 %vm520_vm0, %v1869_v2  ;;  %v5766_v19 = vld [vmem:[%s6287_s12 + $0x8] sm:$0xff]  }
 0x1b8   : > { %v2429_v26 = vor.u32 %v2428_v21, %v2424_v9  ;;  %v3067_v2 = vshll.u32 %v5766_v19, 16  ;;  %v3065_v16 = vshrl.u32 %v5766_v19, 16  ;;  %v5632_v9 = vld [vmem:[%s6287_s12 + $0x8] sm:$0xff] }
 0x1b9   : > { %v1635_v40 = vpop.f32.mrf.mxu2 }
 0x1ba   : > { %v1685_v52 = vadd.f32 %v1635_v40, %v6267_v61  ;;  %v1928_v15 = vpop.f32.mrf.mxu3  ;;  %v5676_v61 = vld [vmem:[%s7030_s3 + $0x38] sm:$0xff] }
 0x1bb   : > { %v2074_v18 = vpop.f32.mrf.mxu0  ;;  %3838 = vmatpush.bf16.msra.mxu0 %v5676_v61 }
 0x1bc   : > { %v2125_v51 = vadd.f32 %v2074_v18, %v1974_v32  ;;  %v2275_v24 = vpop.f32.mrf.mxu1  ;;  %v1975_v38 = vadd.f32 %v1925_v20, %v1685_v52  ;;  %v3069_v52 = vrot.slane %v3067_v2, 1 }
 0x1be   : > { %5155 = vmatmul.msk.bf16.gmra.mxu0 %vm520_vm0, %v2020_v46  ;;  %v6492_v31 = vadd.f32 %v2273_v27, %v2125_v51  ;;  %5082 = vmatmul.msk.bf16.gmra.mxu2 %vm520_vm0, %v1579_v45  ;;  %v6508_v27 = vld [vmem:[%s6287_s12 + $0x10] sm:$0xff]  ;;  %v3070_v49 = vor.u32 %v3069_v52, %v3065_v16 }
 0x1bf   : > { %v3072_v18 = vshll.u32 %v6508_v27, 16  ;;  %v5621_v45 = vld [vmem:[%s6287_s12 + $0x10] sm:$0xff] }
 0x1c0   : > { %v2643_v51 = vrot.slane %v5621_v45, 1  ;;  %v2439_v8 = vshll.u32 %v5621_v45, 16  ;;  %v2443_v52 = vshrl.u32 %v5621_v45, 16 }
 0x1c1   : > { %v1638_v48 = vpop.f32.mrf.mxu2 }
 0x1c2   : > { %v1686_v4 = vadd.f32 %v1638_v48, %v6279_v13  ;;  %v1930_v6 = vpop.f32.mrf.mxu3  ;;  %v2433_v13 = vrot.slane %v2431_v47, 1  ;;  %v2644_v48 = vsel %vm717_vm2, %v2641_v36, %v2643_v51 }
 0x1c3   : > { %v2076_v53 = vpop.f32.mrf.mxu0 }
 0x1c4   : > { %v2126_v23 = vadd.f32 %v2076_v53, %v1975_v38  ;;  %v2278_v5 = vpop.f32.mrf.mxu1  ;;  %v1976_v17 = vadd.f32 %v1928_v15, %v1686_v4  ;;  %v2434_v32 = vsel %vm426_vm1, %v2429_v26, %v2433_v13  ;;  %v2441_v4 = vrot.slane %v2439_v8, 1  ;;  %v6527_v53 = vld [vmem:[%s6287_s12 + $0x18] sm:$0xff] }
 0x1c5   : > { %v5622_v26 = vld [vmem:[%s6287_s12 + $0x18] sm:$0xff]  ;;  %v3084_v8 = vshrl.u32 %v6527_v53, 16 }
 0x1c6   : > { %v6503_v20 = vadd.f32 %v2275_v24, %v2126_v23 }
 0x1c7   : > { %5211 = vmatmul.msk.bf16.gmra.mxu1 %vm520_vm0, %v2219_v56  ;;  %5275 = vmatmul.msk.bf16.vlgmr.msrb.gmra.mxu3 %vm520_vm0, %v2642_v7  ;;  %v3080_v7 = vshll.u32 %v6527_v53, 16 }
 0x1c9   : > { %v1640_v63 = vpop.f32.mrf.mxu2 }
 0x1ca   : > { %v1687_v29 = vadd.f32 %v1640_v63, %v6294_v39  ;;  %v1933_v35 = vpop.f32.mrf.mxu3  ;;  %v3074_v39 = vrot.slane %v3072_v18, 1  ;;  %v2645_v63 = vrot.slane %v5622_v26, 1  ;;  %v2447_v18 = vshll.u32 %v5622_v26, 16 }
 0x1cb   : > { %v2079_v11 = vpop.f32.mrf.mxu0 }
 0x1cc   : > { %v2127_v40 = vadd.f32 %v2079_v11, %v1976_v17  ;;  %v2280_v10 = vpop.f32.mrf.mxu1  ;;  %v1977_v46 = vadd.f32 %v1930_v6, %v1687_v29  ;;  %v3075_v30 = vsel %vm426_vm1, %v3070_v49, %v3074_v39  ;;  %v3076_v17 = vshrl.u32 %v6508_v27, 16 }
 0x1cd   : > { %v2646_v49 = vsel %vm717_vm2, %v2643_v51, %v2645_v63 }
 0x1ce   : > { %5156 = vmatmul.msk.bf16.gmra.mxu0 %vm520_vm0, %v2019_v33  ;;  %v6515_v15 = vadd.f32 %v2278_v5, %v2127_v40  ;;  %5258 = vmatmul.msk.bf16.vlgmr.msrb.gmra.mxu2 %vm520_vm0, %v2434_v32  ;;  %v2435_v33 = vshrl.u32 %v6486_v58, 16  ;;  %v3078_v2 = vor.u32 %v3076_v17, %v3074_v39  ;;  %v2449_v39 = vrot.slane %v2447_v18, 1 }
 0x1d1   : > { %v1643_v24 = vpop.f32.mrf.mxu2 }
 0x1d2   : > { %v1688_v42 = vadd.f32 %v1643_v24, %v6308_v25  ;;  %v1935_v57 = vpop.f32.mrf.mxu3  ;;  %v2437_v25 = vor.u32 %v2435_v33, %v2433_v13 }
 0x1d3   : > { %v2081_v38 = vpop.f32.mrf.mxu0 }
 0x1d4   : > { %v2128_v60 = vadd.f32 %v2081_v38, %v1977_v46  ;;  %v2283_v61 = vpop.f32.mrf.mxu1  ;;  %v1978_v1 = vadd.f32 %v1933_v35, %v1688_v42  ;;  %v2442_v36 = vsel %vm426_vm1, %v2437_v25, %v2441_v4  ;;  %v6547_v42 = vld [vmem:[%s6287_s12 + $0x20] sm:$0xff] }
 0x1d5   : > { %v5623_v25 = vld [vmem:[%s6287_s12 + $0x20] sm:$0xff] }
 0x1d6   : > { %v6522_v56 = vadd.f32 %v2280_v10, %v2128_v60 }
 0x1d7   : > { %5389 = vmatmul.msk.bf16.vlgmr.msrb.gmra.mxu1 %vm520_vm0, %v3075_v30  ;;  %5276 = vmatmul.msk.bf16.gmra.mxu3 %vm520_vm0, %v2644_v48 }
 0x1d9   : > { %v1645_v6 = vpop.f32.mrf.mxu2 }
 0x1da   : > { %v1689_v21 = vadd.f32 %v1645_v6, %v6314_v55  ;;  %v1938_v47 = vpop.f32.mrf.mxu3  ;;  %v3082_v55 = vrot.slane %v3080_v7, 1  ;;  %v2451_v7 = vshrl.u32 %v5622_v26, 16 }
 0x1db   : > { %v2084_v58 = vpop.f32.mrf.mxu0 }
 0x1dc   : > { %v2129_v23 = vadd.f32 %v2084_v58, %v1978_v1  ;;  %v2285_v5 = vpop.f32.mrf.mxu1  ;;  %v1979_v19 = vadd.f32 %v1935_v57, %v1689_v21  ;;  %v3083_v16 = vsel %vm426_vm1, %v3078_v2, %v3082_v55  ;;  %v5633_v57 = vld [vmem:[%s6287_s12 + $0x10] sm:$0xff]  ;;  %v3088_v1 = vshll.u32 %v6547_v42, 16 }
 0x1dd   : > { %v3086_v6 = vor.u32 %v3084_v8, %v3082_v55 }
 0x1de   : > { %5332 = vmatmul.msk.bf16.vlgmr.msrb.gmra.mxu0 %vm520_vm0, %v5632_v9  ;;  %v6536_v13 = vadd.f32 %v2283_v61, %v2129_v23  ;;  %5259 = vmatmul.msk.bf16.gmra.mxu2 %vm520_vm0, %v2442_v36  ;;  %v2647_v9 = vrot.slane %v5623_v25, 1 }
 0x1e1   : > { %v1648_v29 = vpop.f32.mrf.mxu2 }
 0x1e2   : > { %v1690_v11 = vadd.f32 %v1648_v29, %v6328_v28  ;;  %v1940_v35 = vpop.f32.mrf.mxu3  ;;  %v2445_v28 = vor.u32 %v2443_v52, %v2441_v4  ;;  %v2648_v29 = vsel %vm717_vm2, %v2645_v63, %v2647_v9 }
 0x1e3   : > { %v2086_v32 = vpop.f32.mrf.mxu0 }
 0x1e4   : > { %v2130_v40 = vadd.f32 %v2086_v32, %v1979_v19  ;;  %v2288_v10 = vpop.f32.mrf.mxu1  ;;  %v1980_v46 = vadd.f32 %v1938_v47, %v1690_v11  ;;  %v2450_v51 = vsel %vm426_vm1, %v2445_v28, %v2449_v39  ;;  %v2455_v19 = vshll.u32 %v5623_v25, 16  ;;  %v6567_v32 = vld [vmem:[%s6287_s12 + $0x28] sm:$0xff] }
 0x1e6   : > { %v6542_v24 = vadd.f32 %v2285_v5, %v2130_v40  ;;  %v2457_v55 = vrot.slane %v2455_v19, 1  ;;  %v5634_v40 = vld [vmem:[%s6287_s12 + $0x18] sm:$0xff] }
 0x1e7   : > { %5390 = vmatmul.msk.bf16.gmra.mxu1 %vm520_vm0, %v3083_v16  ;;  %5277 = vmatmul.msk.bf16.gmra.mxu3 %vm520_vm0, %v2646_v49  ;;  %v3096_v49 = vshll.u32 %v6567_v32, 16 }
 0x1e9   : > { %v1650_v38 = vpop.f32.mrf.mxu2 }
 0x1ea   : > { %v1691_v60 = vadd.f32 %v1650_v38, %v6334_v44  ;;  %v1943_v61 = vpop.f32.mrf.mxu3  ;;  %v3090_v44 = vrot.slane %v3088_v1, 1  ;;  %v5624_v38 = vld [vmem:[%s6287_s12 + $0x28] sm:$0xff] }
 0x1eb   : > { %v2089_v45 = vpop.f32.mrf.mxu0 }
 0x1ec   : > { %v2131_v30 = vadd.f32 %v2089_v45, %v1980_v46  ;;  %v2290_v33 = vpop.f32.mrf.mxu1  ;;  %v1981_v48 = vadd.f32 %v1940_v35, %v1691_v60  ;;  %v3091_v17 = vsel %vm426_vm1, %v3086_v6, %v3090_v44  ;;  %v3092_v46 = vshrl.u32 %v6547_v42, 16 }
 0x1ed   : > { %v2649_v60 = vrot.slane %v5624_v38, 1  ;;  %v2463_v6 = vshll.u32 %v5624_v38, 16 }
 0x1ee   : > { %5333 = vmatmul.msk.bf16.gmra.mxu0 %vm520_vm0, %v5633_v57  ;;  %v6556_v4 = vadd.f32 %v2288_v10, %v2131_v30  ;;  %5260 = vmatmul.msk.bf16.gmra.mxu2 %vm520_vm0, %v2450_v51  ;;  %v3094_v57 = vor.u32 %v3092_v46, %v3090_v44 }
 0x1ef   : > { %v2465_v44 = vrot.slane %v2463_v6, 1 }
 0x1f1   : > { %v1653_v21 = vpop.f32.mrf.mxu2 }
 0x1f2   : > { %v1692_v58 = vadd.f32 %v1653_v21, %v6348_v59  ;;  %v1945_v23 = vpop.f32.mrf.mxu3  ;;  %v2453_v59 = vor.u32 %v2451_v7, %v2449_v39 }
 0x1f3   : > { %v2091_v47 = vpop.f32.mrf.mxu0 }
 0x1f4   : > { %v2132_v5 = vadd.f32 %v2091_v47, %v1981_v48  ;;  %v2293_v36 = vpop.f32.mrf.mxu1  ;;  %v1982_v2 = vadd.f32 %v1943_v61, %v1692_v58  ;;  %v2458_v63 = vsel %vm426_vm1, %v2453_v59, %v2457_v55  ;;  %v2459_v48 = vshrl.u32 %v5623_v25, 16 }
 0x1f5   : > { %v2650_v58 = vsel %vm717_vm2, %v2647_v9, %v2649_v60 }
 0x1f6   : > { %v6562_v11 = vadd.f32 %v2290_v33, %v2132_v5 }
 0x1f7   : > { %5391 = vmatmul.msk.bf16.gmra.mxu1 %vm520_vm0, %v3091_v17  ;;  %5278 = vmatmul.msk.bf16.gmra.mxu3 %vm520_vm0, %v2648_v29  ;;  %v3100_v29 = vshrl.u32 %v6567_v32, 16 }
 0x1f9   : > { %v1655_v35 = vpop.f32.mrf.mxu2 }
 0x1fa   : > { %v1693_v10 = vadd.f32 %v1655_v35, %v6354_v14  ;;  %v1948_v16 = vpop.f32.mrf.mxu3  ;;  %v3098_v14 = vrot.slane %v3096_v49, 1 }
 0x1fb   : > { %v2094_v26 = vpop.f32.mrf.mxu0 }
 0x1fc   : > { %v2133_v52 = vadd.f32 %v2094_v26, %v1982_v2  ;;  %v2295_v18 = vpop.f32.mrf.mxu1  ;;  %v1983_v28 = vadd.f32 %v1945_v23, %v1693_v10  ;;  %v3099_v1 = vsel %vm426_vm1, %v3094_v57, %v3098_v14  ;;  %v6587_v23 = vld [vmem:[%s6287_s12 + $0x30] sm:$0xff]  ;;  %v3102_v10 = vor.u32 %v3100_v29, %v3098_v14 }
 0x1fd   : > { %v3104_v59 = vshll.u32 %v6587_v23, 16  ;;  %v2467_v57 = vshrl.u32 %v5624_v38, 16 }
 0x1fe   : > { %5334 = vmatmul.msk.bf16.gmra.mxu0 %vm520_vm0, %v5634_v40  ;;  %v6576_v39 = vadd.f32 %v2293_v36, %v2133_v52  ;;  %5261 = vmatmul.msk.bf16.gmra.mxu2 %vm520_vm0, %v2458_v63  ;;  %v5635_v36 = vld [vmem:[%s6287_s12 + $0x20] sm:$0xff]  ;;  %v5625_v40 = vld [vmem:[%s6287_s12 + $0x30] sm:$0xff] }
 0x1ff   : > { %v2651_v26 = vrot.slane %v5625_v40, 1 }
 0x201   : > { %v1658_v45 = vpop.f32.mrf.mxu2 }
 0x202   : > { %v1694_v61 = vadd.f32 %v1658_v45, %v6368_v34  ;;  %v1950_v33 = vpop.f32.mrf.mxu3  ;;  %v2461_v34 = vor.u32 %v2459_v48, %v2457_v55  ;;  %v2471_v45 = vshll.u32 %v5625_v40, 16 }
 0x203   : > { %v2096_v30 = vpop.f32.mrf.mxu0 }
 0x204   : > { %v2134_v51 = vadd.f32 %v2096_v30, %v1983_v28  ;;  %v2298_v8 = vpop.f32.mrf.mxu1  ;;  %v1984_v21 = vadd.f32 %v1948_v16, %v1694_v61  ;;  %v2466_v9 = vsel %vm426_vm1, %v2461_v34, %v2465_v44  ;;  %v2652_v30 = vsel %vm717_vm2, %v2649_v60, %v2651_v26 }
 0x205   : > { %v2473_v14 = vrot.slane %v2471_v45, 1  ;;  %v3108_v34 = vshrl.u32 %v6587_v23, 16 }
 0x206   : > { %v6582_v47 = vadd.f32 %v2295_v18, %v2134_v51  ;;  %v6607_v51 = vld [vmem:[%s6287_s12 + $0x38] sm:$0xff] }
 0x207   : > { %5392 = vmatmul.msk.bf16.gmra.mxu1 %vm520_vm0, %v3099_v1  ;;  %5279 = vmatmul.msk.bf16.gmra.mxu3 %vm520_vm0, %v2650_v58  ;;  %v5636_v1 = vld [vmem:[%s6287_s12 + $0x28] sm:$0xff] }
 0x209   : > { %v1660_v5 = vpop.f32.mrf.mxu2 }
 0x20a   : > { %v1695_v17 = vadd.f32 %v1660_v5, %v6374_v54  ;;  %v1953_v7 = vpop.f32.mrf.mxu3  ;;  %v3106_v54 = vrot.slane %v3104_v59, 1  ;;  %v3112_v5 = vshll.u32 %v6607_v51, 16 }
 0x20b   : > { %v2099_v25 = vpop.f32.mrf.mxu0 }
 0x20c   : > { %v2135_v19 = vadd.f32 %v2099_v25, %v1984_v21  ;;  %v2300_v2 = vpop.f32.mrf.mxu1  ;;  %v1985_v35 = vadd.f32 %v1950_v33, %v1695_v17  ;;  %v3107_v28 = vsel %vm426_vm1, %v3102_v10, %v3106_v54  ;;  %v5626_v17 = vld [vmem:[%s6287_s12 + $0x38] sm:$0xff]  ;;  %v3110_v25 = vor.u32 %v3108_v34, %v3106_v54 }
 0x20e   : > { %5335 = vmatmul.msk.bf16.gmra.mxu0 %vm520_vm0, %v5635_v36  ;;  %v6596_v55 = vadd.f32 %v2298_v8, %v2135_v19  ;;  %5262 = vmatmul.msk.bf16.gmra.mxu2 %vm520_vm0, %v2466_v9 }
 0x211   : > { %v1663_v16 = vpop.f32.mrf.mxu2 }
 0x212   : > { %v1696_v52 = vadd.f32 %v1663_v16, %v6388_v3  ;;  %v1955_v63 = vpop.f32.mrf.mxu3  ;;  %v2469_v3 = vor.u32 %v2467_v57, %v2465_v44  ;;  %v2475_v16 = vshrl.u32 %v5625_v40, 16  ;;  %v5637_v57 = vld [vmem:[%s6287_s12 + $0x30] sm:$0xff] }
 0x213   : > { %v2101_v18 = vpop.f32.mrf.mxu0 }
 0x214   : > { %v2136_v46 = vadd.f32 %v2101_v18, %v1985_v35  ;;  %v2303_v49 = vpop.f32.mrf.mxu1  ;;  %v1986_v61 = vadd.f32 %v1953_v7, %v1696_v52  ;;  %v2474_v60 = vsel %vm426_vm1, %v2469_v3, %v2473_v14  ;;  %v2653_v7 = vrot.slane %v5626_v17, 1 }
 0x215   : > { %v2479_v52 = vshll.u32 %v5626_v17, 16 }
 0x216   : > { %v6602_v33 = vadd.f32 %v2300_v2, %v2136_v46 }
 0x217   : > { %5393 = vmatmul.msk.bf16.gmra.mxu1 %vm520_vm0, %v3107_v28  ;;  %5280 = vmatmul.msk.bf16.gmra.mxu3 %vm520_vm0, %v2652_v30  ;;  %v2481_v54 = vrot.slane %v2479_v52, 1  ;;  %v5638_v52 = vld [vmem:[%s6287_s12 + $0x38] sm:$0xff] }
 0x219   : > { %v1665_v8 = vpop.f32.mrf.mxu2 }
 0x21a   : > { %v1697_v48 = vadd.f32 %v1665_v8, %v6394_v37  ;;  %v1958_v6 = vpop.f32.mrf.mxu3  ;;  %v3114_v37 = vrot.slane %v3112_v5, 1  ;;  %v3116_v8 = vshrl.u32 %v6607_v51, 16 }
 0x21b   : > { %v2104_v38 = vpop.f32.mrf.mxu0 }
 0x21c   : > { %v2137_v21 = vadd.f32 %v2104_v38, %v1986_v61  ;;  %v2305_v58 = vpop.f32.mrf.mxu1  ;;  %v1987_v36 = vadd.f32 %v1955_v63, %v1697_v48  ;;  %v3115_v10 = vsel %vm426_vm1, %v3110_v25, %v3114_v37  ;;  %v2654_v63 = vsel %vm717_vm2, %v2651_v26, %v2653_v7  ;;  %v5627_v38 = vld [vmem:[%s6287_s12 + $0x40] sm:$0xff] }
 0x21e   : > { %5336 = vmatmul.msk.bf16.gmra.mxu0 %vm520_vm0, %v5636_v1  ;;  %v6616_v44 = vadd.f32 %v2303_v49, %v2137_v21  ;;  %5263 = vmatmul.msk.bf16.gmra.mxu2 %vm520_vm0, %v2474_v60  ;;  %v6627_v49 = vld [vmem:[%s6287_s12 + $0x40] sm:$0xff]  ;;  %v2655_v21 = vrot.slane %v5627_v38, 1 }
 0x21f   : > { %v3120_v1 = vshll.u32 %v6627_v49, 16 }
 0x221   : > { %v1668_v19 = vpop.f32.mrf.mxu2 }
 0x222   : > { %v1698_v2 = vadd.f32 %v1668_v19, %v6408_v41  ;;  %v1960_v29 = vpop.f32.mrf.mxu3  ;;  %v2477_v41 = vor.u32 %v2475_v16, %v2473_v14 }
 0x223   : > { %v2106_v9 = vpop.f32.mrf.mxu0 }
 0x224   : > { %v2138_v59 = vadd.f32 %v2106_v9, %v1987_v36  ;;  %v2308_v35 = vpop.f32.mrf.mxu1  ;;  %v1988_v18 = vadd.f32 %v1958_v6, %v1698_v2  ;;  %v2482_v26 = vsel %vm426_vm1, %v2477_v41, %v2481_v54  ;;  %v3118_v6 = vor.u32 %v3116_v8, %v3114_v37 }
 0x225   : > { %v2483_v2 = vshrl.u32 %v5626_v17, 16  ;;  %v2487_v9 = vshll.u32 %v5627_v38, 16 }
 0x226   : > { %v6622_v46 = vadd.f32 %v2305_v58, %v2138_v59  ;;  %v2656_v59 = vsel %vm717_vm2, %v2653_v7, %v2655_v21 }
 0x227   : > { %5394 = vmatmul.msk.bf16.gmra.mxu1 %vm520_vm0, %v3115_v10  ;;  %5281 = vmatmul.msk.bf16.gmra.mxu3 %vm520_vm0, %v2654_v63  ;;  %v2489_v37 = vrot.slane %v2487_v9, 1  ;;  %v6647_v10 = vld [vmem:[%s6287_s12 + $0x48] sm:$0xff] }
 0x229   : > { %v1670_v28 = vpop.f32.mrf.mxu2 }
 0x22a   : > { %v1699_v45 = vadd.f32 %v1670_v28, %v6414_v0  ;;  %v1963_v61 = vpop.f32.mrf.mxu3  ;;  %v3122_v0 = vrot.slane %v3120_v1, 1 }
 0x22b   : > { %v2109_v40 = vpop.f32.mrf.mxu0 }
 0x22c   : > { %v2139_v30 = vadd.f32 %v2109_v40, %v1988_v18  ;;  %v2310_v3 = vpop.f32.mrf.mxu1  ;;  %v1989_v48 = vadd.f32 %v1960_v29, %v1699_v45  ;;  %v3123_v19 = vsel %vm426_vm1, %v3118_v6, %v3122_v0  ;;  %v3128_v45 = vshll.u32 %v6647_v10, 16 }
 0x22e   : > { %5337 = vmatmul.msk.bf16.gmra.mxu0 %vm520_vm0, %v5637_v57  ;;  %v6636_v14 = vadd.f32 %v2308_v35, %v2139_v30  ;;  %5264 = vmatmul.msk.bf16.gmra.mxu2 %vm520_vm0, %v2482_v26  ;;  %v3124_v57 = vshrl.u32 %v6627_v49, 16 }
 0x230   : > { %v3126_v30 = vor.u32 %v3124_v57, %v3122_v0 }
 0x231   : > { %v1673_v58 = vpop.f32.mrf.mxu2 }
 0x232   : > { %v1700_v60 = vadd.f32 %v1673_v58, %v6428_v50  ;;  %v1965_v5 = vpop.f32.mrf.mxu3  ;;  %v2485_v50 = vor.u32 %v2483_v2, %v2481_v54  ;;  %v6667_v2 = vld [vmem:[%s6287_s12 + $0x50] sm:$0xff] }
 0x233   : > { %v2111_v34 = vpop.f32.mrf.mxu0 }
 0x234   : > { %v2140_v36 = vadd.f32 %v2111_v34, %v1989_v48  ;;  %v2313_v25 = vpop.f32.mrf.mxu1  ;;  %v1990_v29 = vadd.f32 %v1963_v61, %v1700_v60  ;;  %v2490_v7 = vsel %vm426_vm1, %v2485_v50, %v2489_v37  ;;  %v5628_v61 = vld [vmem:[%s6287_s12 + $0x48] sm:$0xff]  ;;  %v2491_v34 = vshrl.u32 %v5627_v38, 16  ;;  %v5629_v50 = vld [vmem:[%s6287_s12 + $0x50] sm:$0x10] }
 0x236   : > { %v6642_v35 = vadd.f32 %v2310_v3, %v2140_v36  ;;  %v2657_v3 = vrot.slane %v5628_v61, 1 }
 0x237   : > { %5395 = vmatmul.msk.bf16.gmra.mxu1 %vm520_vm0, %v3123_v19  ;;  %5282 = vmatmul.msk.bf16.gmra.mxu3 %vm520_vm0, %v2656_v59  ;;  %v5252_v59 = vld [vmem:[%s6287_s12 + $0x50] sm:$0xf] }
 0x238   : > { %v2658_v0 = vsel %vm717_vm2, %v2655_v21, %v2657_v3 }
 0x239   : > { %v1675_v16 = vpop.f32.mrf.mxu2 }
 0x23a   : > { %v1701_v18 = vadd.f32 %v1675_v16, %v6436_v12  ;;  %v1968_v63 = vpop.f32.mrf.mxu3  ;;  %v3130_v12 = vrot.slane %v3128_v45, 1 }
 0x23b   : > { %v2114_v17 = vpop.f32.mrf.mxu0 }
 0x23c   : > { %v2141_v41 = vadd.f32 %v2114_v17, %v1990_v29  ;;  %v2315_v28 = vpop.f32.mrf.mxu1  ;;  %v1991_v40 = vadd.f32 %v1965_v5, %v1701_v18  ;;  %v3131_v60 = vsel %vm426_vm1, %v3126_v30, %v3130_v12  ;;  %v2495_v5 = vshll.u32 %v5628_v61, 16  ;;  %v5639_v29 = vld [vmem:[%s6287_s12 + $0x40] sm:$0xff] }
 0x23d   : > { %v3132_v17 = vshrl.u32 %v6647_v10, 16 }
 0x23e   : > { %5338 = vmatmul.msk.bf16.gmra.mxu0 %vm520_vm0, %v5638_v52  ;;  %v6656_v54 = vadd.f32 %v2313_v25, %v2141_v41  ;;  %5265 = vmatmul.msk.bf16.gmra.mxu2 %vm520_vm0, %v2490_v7  ;;  %v2497_v19 = vrot.slane %v2495_v5, 1  ;;  %v5253_v41 = vor.u32 %v5629_v50, %v5252_v59  ;;  %v5652_v5 = vld [vmem:[%s6287_s12 + $0x58] sm:$0x10] }
 0x240   : > { %v2659_v57 = vrot.slane %v5253_v41, 1 }
 0x241   : > { %v1678_v26 = vpop.f32.mrf.mxu2 }
 0x242   : > { %v1702_v8 = vadd.f32 %v1678_v26, %v6448_v62  ;;  %v1970_v48 = vpop.f32.mrf.mxu3  ;;  %v2493_v62 = vor.u32 %v2491_v34, %v2489_v37  ;;  %v5383_v34 = vld [vmem:[%s6287_s12 + $0x58] sm:$0xf] }
 0x243   : > { %v2116_v1 = vpop.f32.mrf.mxu0  ;;  %v2499_v48 = vshrl.u32 %v5628_v61, 16 }
 0x244   : > { %v2142_v6 = vadd.f32 %v2116_v1, %v1991_v40  ;;  %v2318_v58 = vpop.f32.mrf.mxu1  ;;  %v1992_v36 = vadd.f32 %v1968_v63, %v1702_v8  ;;  %v2498_v21 = vsel %vm426_vm1, %v2493_v62, %v2497_v19  ;;  %v3136_v63 = vshll.u32 %v6667_v2, 16  ;;  %v5640_v62 = vld [vmem:[%s6287_s12 + $0x48] sm:$0xff] }
 0x246   : > { %v6662_v25 = vadd.f32 %v2315_v28, %v2142_v6  ;;  %v3134_v28 = vor.u32 %v3132_v17, %v3130_v12  ;;  %v3138_v7 = vrot.slane %v3136_v63, 1  ;;  %v2503_v6 = vshll.u32 %v5253_v41, 16 }
 0x247   : > { %5396 = vmatmul.msk.bf16.gmra.mxu1 %vm520_vm0, %v3131_v60  ;;  %5283 = vmatmul.msk.bf16.gmra.mxu3 %vm520_vm0, %v2658_v0  ;;  %v2501_v12 = vor.u32 %v2499_v48, %v2497_v19  ;;  %v6686_v0 = vor.u32 %v5652_v5, %v5383_v34  ;;  %v5641_v48 = vld [vmem:[%s6287_s12 + $0x50] sm:$0xff] }
 0x248   : > { %v3139_v1 = vsel %vm426_vm1, %v3134_v28, %v3138_v7 }
 0x249   : > { %v1680_v9 = vpop.f32.mrf.mxu2 }
 0x24a   : > { %v2709_v38 = vpop.f32.mrf.mxu3 }
 0x24b   : > { %v2119_v16 = vpop.f32.mrf.mxu0 }
 0x24c   : > { %v2143_v52 = vadd.f32 %v2119_v16, %v1992_v36  ;;  %v2320_v18 = vpop.f32.mrf.mxu1  ;;  %v2505_v36 = vrot.slane %v2503_v6, 1  ;;  %v3140_v16 = vshrl.u32 %v6667_v2, 16 }
 0x24e   : > { %5339 = vmatmul.msk.bf16.gmra.mxu0 %vm520_vm0, %v5639_v29  ;;  %v6676_v37 = vadd.f32 %v2318_v58, %v2143_v52  ;;  %5266 = vmatmul.msk.bf16.gmra.mxu2 %vm520_vm0, %v2498_v21  ;;  %v2660_v58 = vsel %vm717_vm2, %v2657_v3, %v2659_v57  ;;  %v2506_v3 = vsel %vm426_vm1, %v2501_v12, %v2505_v36 }
 0x24f   : > { %v3142_v18 = vor.u32 %v3140_v16, %v3138_v7  ;;  %v5655_v16 = vld [vmem:[%s6287_s12 + $0x10] sm:$0xff] }
 0x251   : > { %v2558_v45 = vpop.f32.mrf.mxu2 }
 0x252   : > { %v2612_v30 = vadd.f32 %v2558_v45, %v6461_v22  ;;  %v2711_v26 = vpop.f32.mrf.mxu3 }
 0x253   : > { %v2121_v40 = vpop.f32.mrf.mxu0 }
 0x254   : > { %v3199_v8 = vpop.f32.mrf.mxu1  ;;  %v2763_v60 = vadd.f32 %v2709_v38, %v2612_v30  ;;  %v3144_v38 = vshll.u32 %v6686_v0, 16 }
 0x257   : > { %5397 = vmatmul.msk.bf16.gmra.mxu1 %vm520_vm0, %v3139_v1  ;;  %5284 = vmatmul.msk.bf16.gmra.mxu3 %vm520_vm0, %v2660_v58 }
 0x259   : > { %v2560_v22 = vpop.f32.mrf.mxu2 }
 0x25a   : > { %v2613_v9 = vadd.f32 %v2560_v22, %v6474_v43  ;;  %v2714_v61 = vpop.f32.mrf.mxu3  ;;  %v3146_v43 = vrot.slane %v3144_v38, 1 }
 0x25b   : > { %v2909_v29 = vpop.f32.mrf.mxu0 }
 0x25c   : > { %v2963_v59 = vadd.f32 %v2909_v29, %v2763_v60  ;;  %v3201_v50 = vpop.f32.mrf.mxu1  ;;  %v2764_v52 = vadd.f32 %v2711_v26, %v2613_v9  ;;  %v3147_v30 = vsel %vm426_vm1, %v3142_v18, %v3146_v43 }
 0x25e   : > { %5340 = vmatmul.msk.bf16.gmra.mxu0 %vm520_vm0, %v5640_v62  ;;  %v6694_v19 = vadd.f32 %v3199_v8, %v2963_v59  ;;  %5267 = vmatmul.msk.bf16.gmra.mxu2 %vm520_vm0, %v2506_v3  ;;  %v2507_v8 = vshrl.u32 %v5253_v41, 16  ;;  %v3148_v41 = vshrl.u32 %v6686_v0, 16  ;;  %v5768_v62 = vld [vmem:[%s6287_s12 + $0x8] sm:$0xe]  ;;  %v2804_v59 = vld [vmem:[%s6287_s12 + $0x58] sm:$0xf] }
 0x25f   : > { %v2849_v18 = vunpack.c.l.b16 %v2804_v59 }
 0x260   : > { %v2509_v60 = vor.u32 %v2507_v8, %v2505_v36  ;;  %v3150_v29 = vor.u32 %v3148_v41, %v3146_v43  ;;  %v5771_v43 = vld [vmem:[%s6287_s12 + $0x10] sm:$0xf0] }
 0x261   : > { %v2563_v21 = vpop.f32.mrf.mxu2 }
 0x262   : > { %v2614_v17 = vadd.f32 %v2563_v21, %v6492_v31  ;;  %v2716_v28 = vpop.f32.mrf.mxu3 }
 0x263   : > { %v2911_v63 = vpop.f32.mrf.mxu0 }
 0x264   : > { %v2964_v45 = vadd.f32 %v2911_v63, %v2764_v52  ;;  %v3204_v40 = vpop.f32.mrf.mxu1  ;;  %v2765_v1 = vadd.f32 %v2714_v61, %v2614_v17  ;;  %v3282_v17 = vrot.slane %v6508_v27, 1  ;;  %v5772_v63 = vld [vmem:[%s6287_s12 + $0x10] sm:$0xe] }
 0x266   : > { %v6699_v26 = vadd.f32 %v3201_v50, %v2964_v45  ;;  %v2860_v45 = vpack.c.b16 %v2849_v18, %v2849_v18 }
 0x267   : > { %5398 = vmatmul.msk.bf16.gmra.mxu1 %vm520_vm0, %v3147_v30  ;;  %5285 = vmatmul.msk.bf16.gmra.mxu3 %vm520_vm0, %v2659_v57  ;;  %v5767_v57 = vld [vmem:[%s6287_s12 + $0x8] sm:$0xf0] }
 0x268   : > { %v5769_v38 = vor.u32 %v5768_v62, %v5767_v57 }
 0x269   : > { %v2565_v7 = vpop.f32.mrf.mxu2 }
 0x26a   : > { %v2615_v31 = vadd.f32 %v2565_v7, %v6503_v20  ;;  %v2719_v58 = vpop.f32.mrf.mxu3 }
 0x26b   : > { %v2914_v6 = vpop.f32.mrf.mxu0 }
 0x26c   : > { %v2965_v34 = vadd.f32 %v2914_v6, %v2765_v1  ;;  %v3206_v5 = vpop.f32.mrf.mxu1  ;;  %v2766_v12 = vadd.f32 %v2716_v28, %v2615_v31  ;;  %v5666_v31 = vld [vmem:[%s6287_s12 + $0x18] sm:$0xff]  ;;  %v5773_v6 = vor.u32 %v5772_v63, %v5771_v43 }
 0x26e   : > { %5341 = vmatmul.msk.bf16.gmra.mxu0 %vm520_vm0, %v5641_v48  ;;  %v6706_v22 = vadd.f32 %v3204_v40, %v2965_v34  ;;  %5268 = vmatmul.msk.bf16.gmra.mxu2 %vm520_vm0, %v2509_v60  ;;  %v5770_v60 = vld [vmem:[%s6287_s12 + $0x10] sm:$0xff]  }
 0x26f   : > { %v3708_v34 = vshll.u32 %v5770_v60, 16 }
 0x271   : > { %v2568_v9 = vpop.f32.mrf.mxu2 }
 0x272   : > { %v2616_v20 = vadd.f32 %v2568_v9, %v6515_v15  ;;  %v2721_v61 = vpop.f32.mrf.mxu3  ;;  %v3281_v15 = vrot.slane %v5769_v38, 1  ;;  %v3706_v9 = vshrl.u32 %v5770_v60, 16 }
 0x273   : > { %v2916_v36 = vpop.f32.mrf.mxu0 }
 0x274   : > { %v2966_v50 = vadd.f32 %v2916_v36, %v2766_v12  ;;  %v3209_v3 = vpop.f32.mrf.mxu1  ;;  %v2767_v52 = vadd.f32 %v2719_v58, %v2616_v20  ;;  %v3283_v48 = vsel %vm717_vm2, %v3281_v15, %v3282_v17  ;;  %v3710_v20 = vrot.slane %v3708_v34, 1 }
 0x275   : > { %v3713_v36 = vshll.u32 %v5666_v31, 16 }
 0x276   : > { %v6715_v21 = vadd.f32 %v3206_v5, %v2966_v50  ;;  %v3922_v5 = vrot.slane %v5773_v6, 1  ;;  %v5656_v50 = vld [vmem:[%s6287_s12 + $0x18] sm:$0xff]  ;;  %v3711_v38 = vor.u32 %v3710_v20, %v3706_v9 }
 0x277   : > { %5399 = vmatmul.msk.bf16.gmra.mxu1 %vm520_vm0, %v3150_v29  ;;  %5463 = vmatmul.msk.bf16.vlgmr.msra.gmra.mxu3 %vm520_vm0, %v5655_v16 }
 0x279   : > { %v2570_v28 = vpop.f32.mrf.mxu2 }
 0x27a   : > { %v2617_v40 = vadd.f32 %v2570_v28, %v6522_v56  ;;  %v2724_v1 = vpop.f32.mrf.mxu3  ;;  %v3923_v56 = vrot.slane %v5666_v31, 1 }
 0x27b   : > { %v2919_v30 = vpop.f32.mrf.mxu0 }
 0x27c   : > { %v2967_v8 = vadd.f32 %v2919_v30, %v2767_v52  ;;  %v3211_v7 = vpop.f32.mrf.mxu1  ;;  %v2768_v58 = vadd.f32 %v2721_v61, %v2617_v40  ;;  %v3924_v59 = vsel %vm717_vm2, %v3922_v5, %v3923_v56  ;;  %v3715_v52 = vrot.slane %v3713_v36, 1 }
 0x27e   : > { %5342 = vmatmul.msk.bf16.gmra.mxu0 %vm520_vm0, %v2860_v45  ;;  %v6727_v27 = vadd.f32 %v3209_v3, %v2967_v8  ;;  %5406 = vmatmul.msk.bf16.vlgmr.msra.gmra.mxu2 %vm520_vm0, %v3283_v48  ;;  %v3716_v63 = vsel %vm426_vm1, %v3711_v38, %v3715_v52  ;;  %v5668_v38 = vld [vmem:[%s6287_s12 + $0x28] sm:$0xff] }
 0x281   : > { %v2573_v12 = vpop.f32.mrf.mxu2 }
 0x282   : > { %v2618_v41 = vadd.f32 %v2573_v12, %v6536_v13  ;;  %v2726_v62 = vpop.f32.mrf.mxu3  ;;  %v3284_v13 = vrot.slane %v6527_v53, 1 }
 0x283   : > { %v2921_v57 = vpop.f32.mrf.mxu0 }
 0x284   : > { %v2968_v29 = vadd.f32 %v2921_v57, %v2768_v58  ;;  %v3214_v61 = vpop.f32.mrf.mxu1  ;;  %v2769_v3 = vadd.f32 %v2724_v1, %v2618_v41  ;;  %v3285_v30 = vsel %vm717_vm2, %v3282_v17, %v3284_v13  ;;  %v5667_v1 = vld [vmem:[%s6287_s12 + $0x20] sm:$0xff]  ;;  %v3717_v58 = vshrl.u32 %v5666_v31, 16 }
 0x285   : > { %v3925_v53 = vrot.slane %v5667_v1, 1  ;;  %v3721_v34 = vshll.u32 %v5667_v1, 16  ;;  %v5657_v41 = vld [vmem:[%s6287_s12 + $0x20] sm:$0xff] }
 0x286   : > { %v6733_v16 = vadd.f32 %v3211_v7, %v2968_v29  ;;  %v3719_v9 = vor.u32 %v3717_v58, %v3715_v52 }
 0x287   : > { %5537 = vmatmul.msk.bf16.vlgmr.msra.gmra.mxu1 %vm520_vm0, %v3924_v59  ;;  %5464 = vmatmul.msk.bf16.gmra.mxu3 %vm520_vm0, %v5656_v50  ;;  %v3926_v17 = vsel %vm717_vm2, %v3923_v56, %v3925_v53  ;;  %v3723_v20 = vrot.slane %v3721_v34, 1 }
 0x289   : > { %v2575_v18 = vpop.f32.mrf.mxu2 }
 0x28a   : > { %v2619_v15 = vadd.f32 %v2575_v18, %v6542_v24  ;;  %v2729_v28 = vpop.f32.mrf.mxu3 }
 0x28b   : > { %v2924_v43 = vpop.f32.mrf.mxu0 }
 0x28c   : > { %v2969_v45 = vadd.f32 %v2924_v43, %v2769_v3  ;;  %v3216_v40 = vpop.f32.mrf.mxu1  ;;  %v2770_v8 = vadd.f32 %v2726_v62, %v2619_v15 }
 0x28e   : > { %5520 = vmatmul.msk.bf16.vlgmr.msra.gmra.mxu0 %vm520_vm0, %v3716_v63  ;;  %v6743_v7 = vadd.f32 %v3214_v61, %v2969_v45  ;;  %5407 = vmatmul.msk.bf16.gmra.mxu2 %vm520_vm0, %v3285_v30  ;;  %v3724_v61 = vsel %vm426_vm1, %v3719_v9, %v3723_v20  ;;  %v3729_v45 = vshll.u32 %v5668_v38, 16 }
 0x291   : > { %v2578_v48 = vpop.f32.mrf.mxu2 }
 0x292   : > { %v2620_v24 = vadd.f32 %v2578_v48, %v6556_v4  ;;  %v2731_v60 = vpop.f32.mrf.mxu3  ;;  %v3286_v4 = vrot.slane %v6547_v42, 1  ;;  %v3927_v42 = vrot.slane %v5668_v38, 1 }
 0x293   : > { %v2926_v6 = vpop.f32.mrf.mxu0 }
 0x294   : > { %v2970_v5 = vadd.f32 %v2926_v6, %v2770_v8  ;;  %v3219_v12 = vpop.f32.mrf.mxu1  ;;  %v2771_v57 = vadd.f32 %v2729_v28, %v2620_v24  ;;  %v3287_v3 = vsel %vm717_vm2, %v3284_v13, %v3286_v4  ;;  %v3725_v28 = vshrl.u32 %v5667_v1, 16  ;;  %v5658_v8 = vld [vmem:[%s6287_s12 + $0x28] sm:$0xff] }
 0x295   : > { %v3928_v13 = vsel %vm717_vm2, %v3925_v53, %v3927_v42 }
 0x296   : > { %v6749_v62 = vadd.f32 %v3216_v40, %v2970_v5  ;;  %v3727_v6 = vor.u32 %v3725_v28, %v3723_v20 }
 0x297   : > { %5538 = vmatmul.msk.bf16.gmra.mxu1 %vm520_vm0, %v3926_v17  ;;  %5465 = vmatmul.msk.bf16.gmra.mxu3 %vm520_vm0, %v5657_v41 }
 0x299   : > { %v2580_v36 = vpop.f32.mrf.mxu2 }
 0x29a   : > { %v2621_v31 = vadd.f32 %v2580_v36, %v6562_v11  ;;  %v2734_v56 = vpop.f32.mrf.mxu3 }
 0x29b   : > { %v2929_v29 = vpop.f32.mrf.mxu0 }
 0x29c   : > { %v2971_v59 = vadd.f32 %v2929_v29, %v2771_v57  ;;  %v3221_v50 = vpop.f32.mrf.mxu1  ;;  %v2772_v18 = vadd.f32 %v2731_v60, %v2621_v31  ;;  %v3731_v60 = vrot.slane %v3729_v45, 1  ;;  %v5669_v57 = vld [vmem:[%s6287_s12 + $0x30] sm:$0xff] }
 0x29e   : > { %5521 = vmatmul.msk.bf16.gmra.mxu0 %vm520_vm0, %v3724_v61  ;;  %v6759_v52 = vadd.f32 %v3219_v12, %v2971_v59  ;;  %5408 = vmatmul.msk.bf16.gmra.mxu2 %vm520_vm0, %v3287_v3  ;;  %v3732_v5 = vsel %vm426_vm1, %v3727_v6, %v3731_v60  ;;  %v3733_v61 = vshrl.u32 %v5668_v38, 16  ;;  %v5659_v3 = vld [vmem:[%s6287_s12 + $0x30] sm:$0xff] }
 0x2a1   : > { %v2583_v15 = vpop.f32.mrf.mxu2 }
 0x2a2   : > { %v2622_v11 = vadd.f32 %v2583_v15, %v6576_v39  ;;  %v2736_v63 = vpop.f32.mrf.mxu3  ;;  %v3288_v39 = vrot.slane %v6567_v32, 1  ;;  %v3929_v32 = vrot.slane %v5669_v57, 1 }
 0x2a3   : > { %v2931_v43 = vpop.f32.mrf.mxu0 }
 0x2a4   : > { %v2972_v40 = vadd.f32 %v2931_v43, %v2772_v18  ;;  %v3224_v30 = vpop.f32.mrf.mxu1  ;;  %v2773_v48 = vadd.f32 %v2734_v56, %v2622_v11  ;;  %v3289_v41 = vsel %vm717_vm2, %v3286_v4, %v3288_v39  ;;  %v3737_v56 = vshll.u32 %v5669_v57, 16 }
 0x2a5   : > { %v3930_v4 = vsel %vm717_vm2, %v3927_v42, %v3929_v32  ;;  %v3735_v11 = vor.u32 %v3733_v61, %v3731_v60 }
 0x2a6   : > { %v6765_v24 = vadd.f32 %v3221_v50, %v2972_v40  ;;  %v3739_v43 = vrot.slane %v3737_v56, 1 }
 0x2a7   : > { %5539 = vmatmul.msk.bf16.gmra.mxu1 %vm520_vm0, %v3928_v13  ;;  %5466 = vmatmul.msk.bf16.gmra.mxu3 %vm520_vm0, %v5658_v8  ;;  %v5670_v8 = vld [vmem:[%s6287_s12 + $0x38] sm:$0xff] }
 0x2a8   : > { %v3740_v45 = vsel %vm426_vm1, %v3735_v11, %v3739_v43 }
 0x2a9   : > { %v2585_v58 = vpop.f32.mrf.mxu2 }
 0x2aa   : > { %v2623_v1 = vadd.f32 %v2585_v58, %v6582_v47  ;;  %v2739_v53 = vpop.f32.mrf.mxu3 }
 0x2ab   : > { %v2934_v34 = vpop.f32.mrf.mxu0 }
 0x2ac   : > { %v2973_v12 = vadd.f32 %v2934_v34, %v2773_v48  ;;  %v3226_v17 = vpop.f32.mrf.mxu1  ;;  %v2774_v9 = vadd.f32 %v2736_v63, %v2623_v1  ;;  %v3741_v34 = vshrl.u32 %v5669_v57, 16 }
 0x2ae   : > { %5522 = vmatmul.msk.bf16.gmra.mxu0 %vm520_vm0, %v3732_v5  ;;  %v6775_v20 = vadd.f32 %v3224_v30, %v2973_v12  ;;  %5409 = vmatmul.msk.bf16.gmra.mxu2 %vm520_vm0, %v3289_v41  ;;  %v3745_v5 = vshll.u32 %v5670_v8, 16 }
 0x2b1   : > { %v2588_v36 = vpop.f32.mrf.mxu2 }
 0x2b2   : > { %v2624_v47 = vadd.f32 %v2588_v36, %v6596_v55  ;;  %v2741_v29 = vpop.f32.mrf.mxu3  ;;  %v3290_v55 = vrot.slane %v6587_v23, 1  ;;  %v3931_v23 = vrot.slane %v5670_v8, 1  ;;  %v3743_v36 = vor.u32 %v3741_v34, %v3739_v43 }
 0x2b3   : > { %v2936_v31 = vpop.f32.mrf.mxu0 }
 0x2b4   : > { %v2974_v59 = vadd.f32 %v2936_v31, %v2774_v9  ;;  %v3229_v50 = vpop.f32.mrf.mxu1  ;;  %v2775_v18 = vadd.f32 %v2739_v53, %v2624_v47  ;;  %v3291_v13 = vsel %vm717_vm2, %v3288_v39, %v3290_v55  ;;  %v3932_v39 = vsel %vm717_vm2, %v3929_v32, %v3931_v23 }
 0x2b5   : > { %v3747_v47 = vrot.slane %v3745_v5, 1 }
 0x2b6   : > { %v6781_v15 = vadd.f32 %v3226_v17, %v2974_v59  ;;  %v5660_v17 = vld [vmem:[%s6287_s12 + $0x38] sm:$0xff] }
 0x2b7   : > { %5540 = vmatmul.msk.bf16.gmra.mxu1 %vm520_vm0, %v3930_v4  ;;  %5467 = vmatmul.msk.bf16.gmra.mxu3 %vm520_vm0, %v5659_v3  ;;  %v3748_v61 = vsel %vm426_vm1, %v3743_v36, %v3747_v47  ;;  %v5671_v4 = vld [vmem:[%s6287_s12 + $0x40] sm:$0xff] }
 0x2b9   : > { %v2590_v63 = vpop.f32.mrf.mxu2 }
 0x2ba   : > { %v2625_v38 = vadd.f32 %v2590_v63, %v6602_v33  ;;  %v2744_v42 = vpop.f32.mrf.mxu3 }
 0x2bb   : > { %v2939_v28 = vpop.f32.mrf.mxu0 }
 0x2bc   : > { %v2975_v40 = vadd.f32 %v2939_v28, %v2775_v18  ;;  %v3231_v30 = vpop.f32.mrf.mxu1  ;;  %v2776_v48 = vadd.f32 %v2741_v29, %v2625_v38  ;;  %v3749_v38 = vshrl.u32 %v5670_v8, 16  ;;  %v3753_v28 = vshll.u32 %v5671_v4, 16 }
 0x2be   : > { %5523 = vmatmul.msk.bf16.gmra.mxu0 %vm520_vm0, %v3740_v45  ;;  %v6791_v6 = vadd.f32 %v3229_v50, %v2975_v40  ;;  %5410 = vmatmul.msk.bf16.gmra.mxu2 %vm520_vm0, %v3291_v13  ;;  %v5661_v40 = vld [vmem:[%s6287_s12 + $0x40] sm:$0xff] }
 0x2c1   : > { %v2593_v60 = vpop.f32.mrf.mxu2 }
 0x2c2   : > { %v2626_v33 = vadd.f32 %v2593_v60, %v6616_v44  ;;  %v2746_v1 = vpop.f32.mrf.mxu3  ;;  %v3292_v44 = vrot.slane %v6607_v51, 1  ;;  %v3933_v51 = vrot.slane %v5671_v4, 1  ;;  %v3755_v60 = vrot.slane %v3753_v28, 1 }
 0x2c3   : > { %v2941_v58 = vpop.f32.mrf.mxu0 }
 0x2c4   : > { %v2976_v53 = vadd.f32 %v2941_v58, %v2776_v48  ;;  %v3234_v12 = vpop.f32.mrf.mxu1  ;;  %v2777_v41 = vadd.f32 %v2744_v42, %v2626_v33  ;;  %v3293_v50 = vsel %vm717_vm2, %v3290_v55, %v3292_v44  ;;  %v3934_v55 = vsel %vm717_vm2, %v3931_v23, %v3933_v51 }
 0x2c5   : > { %v3751_v48 = vor.u32 %v3749_v38, %v3747_v47 }
 0x2c6   : > { %v6797_v9 = vadd.f32 %v3231_v30, %v2976_v53 }
 0x2c7   : > { %5541 = vmatmul.msk.bf16.gmra.mxu1 %vm520_vm0, %v3932_v39  ;;  %5468 = vmatmul.msk.bf16.gmra.mxu3 %vm520_vm0, %v5660_v17 }
 0x2c9   : > { %v2595_v31 = vpop.f32.mrf.mxu2 }
 0x2ca   : > { %v2627_v57 = vadd.f32 %v2595_v31, %v6622_v46  ;;  %v2749_v32 = vpop.f32.mrf.mxu3  ;;  %v3757_v31 = vshrl.u32 %v5671_v4, 16 }
 0x2cb   : > { %v2944_v29 = vpop.f32.mrf.mxu0 }
 0x2cc   : > { %v2977_v56 = vadd.f32 %v2944_v29, %v2777_v41  ;;  %v3236_v59 = vpop.f32.mrf.mxu1  ;;  %v2778_v3 = vadd.f32 %v2746_v1, %v2627_v57  ;;  %v3756_v1 = vsel %vm426_vm1, %v3751_v48, %v3755_v60 }
 0x2ce   : > { %5524 = vmatmul.msk.bf16.gmra.mxu0 %vm520_vm0, %v3748_v61  ;;  %v6807_v18 = vadd.f32 %v3234_v12, %v2977_v56  ;;  %5411 = vmatmul.msk.bf16.gmra.mxu2 %vm520_vm0, %v3293_v50  ;;  %v5672_v12 = vld [vmem:[%s6287_s12 + $0x48] sm:$0xff]  ;;  %v3759_v50 = vor.u32 %v3757_v31, %v3755_v60  ;;  %v6853_v31 = vld [vmem:[%s6287_s12 + $0x58] sm:$0xff] }
 0x2cf   : > { %v3761_v57 = vshll.u32 %v5672_v12, 16  ;;  %v3765_v60 = vshrl.u32 %v5672_v12, 16 }
 0x2d1   : > { %v2598_v11 = vpop.f32.mrf.mxu2 }
 0x2d2   : > { %v2628_v46 = vadd.f32 %v2598_v11, %v6636_v14  ;;  %v2751_v63 = vpop.f32.mrf.mxu3  ;;  %v3294_v14 = vrot.slane %v6627_v49, 1  ;;  %v3935_v49 = vrot.slane %v5672_v12, 1 }
 0x2d3   : > { %v2946_v43 = vpop.f32.mrf.mxu0 }
 0x2d4   : > { %v2978_v45 = vadd.f32 %v2946_v43, %v2778_v3  ;;  %v3239_v42 = vpop.f32.mrf.mxu1  ;;  %v2779_v30 = vadd.f32 %v2749_v32, %v2628_v46  ;;  %v3295_v53 = vsel %vm717_vm2, %v3292_v44, %v3294_v14  ;;  %v3936_v44 = vsel %vm717_vm2, %v3933_v51, %v3935_v49  ;;  %v5662_v32 = vld [vmem:[%s6287_s12 + $0x48] sm:$0xff] }
 0x2d5   : > { %v3763_v3 = vrot.slane %v3761_v57, 1 }
 0x2d6   : > { %v6813_v13 = vadd.f32 %v3236_v59, %v2978_v45  ;;  %v5673_v45 = vld [vmem:[%s6287_s12 + $0x50] sm:$0xff] }
 0x2d7   : > { %5542 = vmatmul.msk.bf16.gmra.mxu1 %vm520_vm0, %v3934_v55  ;;  %5469 = vmatmul.msk.bf16.gmra.mxu3 %vm520_vm0, %v5661_v40  ;;  %v3764_v43 = vsel %vm426_vm1, %v3759_v50, %v3763_v3 }
 0x2d9   : > { %v2600_v33 = vpop.f32.mrf.mxu2 }
 0x2da   : > { %v2629_v8 = vadd.f32 %v2600_v33, %v6642_v35  ;;  %v2754_v23 = vpop.f32.mrf.mxu3  ;;  %v3769_v33 = vshll.u32 %v5673_v45, 16 }
 0x2db   : > { %v2949_v58 = vpop.f32.mrf.mxu0 }
 0x2dc   : > { %v2979_v34 = vadd.f32 %v2949_v58, %v2779_v30  ;;  %v3241_v5 = vpop.f32.mrf.mxu1  ;;  %v2780_v39 = vadd.f32 %v2751_v63, %v2629_v8 }
 0x2de   : > { %5525 = vmatmul.msk.bf16.gmra.mxu0 %vm520_vm0, %v3756_v1  ;;  %v6823_v17 = vadd.f32 %v3239_v42, %v2979_v34  ;;  %5412 = vmatmul.msk.bf16.gmra.mxu2 %vm520_vm0, %v3295_v53  ;;  %v5663_v1 = vld [vmem:[%s6287_s12 + $0x50] sm:$0xff]  ;;  %v3771_v53 = vrot.slane %v3769_v33, 1 }
 0x2e1   : > { %v2603_v41 = vpop.f32.mrf.mxu2 }
 0x2e2   : > { %v2630_v35 = vadd.f32 %v2603_v41, %v6656_v54  ;;  %v2756_v47 = vpop.f32.mrf.mxu3  ;;  %v3296_v54 = vrot.slane %v6647_v10, 1  ;;  %v3937_v10 = vrot.slane %v5673_v45, 1 }
 0x2e3   : > { %v2951_v36 = vpop.f32.mrf.mxu0 }
 0x2e4   : > { %v2980_v29 = vadd.f32 %v2951_v36, %v2780_v39  ;;  %v3244_v61 = vpop.f32.mrf.mxu1  ;;  %v2781_v56 = vadd.f32 %v2754_v23, %v2630_v35  ;;  %v3297_v28 = vsel %vm717_vm2, %v3294_v14, %v3296_v54  ;;  %v3938_v14 = vsel %vm717_vm2, %v3935_v49, %v3937_v10 }
 0x2e6   : > { %v6829_v59 = vadd.f32 %v3241_v5, %v2980_v29  ;;  %v3767_v5 = vor.u32 %v3765_v60, %v3763_v3 }
 0x2e7   : > { %5543 = vmatmul.msk.bf16.gmra.mxu1 %vm520_vm0, %v3936_v44  ;;  %5470 = vmatmul.msk.bf16.gmra.mxu3 %vm520_vm0, %v5662_v32  ;;  %v3773_v32 = vshrl.u32 %v5673_v45, 16 }
 0x2e8   : > { %v3772_v41 = vsel %vm426_vm1, %v3767_v5, %v3771_v53 }
 0x2e9   : > { %v2605_v11 = vpop.f32.mrf.mxu2 }
 0x2ea   : > { %v2631_v4 = vadd.f32 %v2605_v11, %v6662_v25  ;;  %v2759_v51 = vpop.f32.mrf.mxu3 }
 0x2eb   : > { %v2954_v46 = vpop.f32.mrf.mxu0 }
 0x2ec   : > { %v2981_v63 = vadd.f32 %v2954_v46, %v2781_v56  ;;  %v3246_v38 = vpop.f32.mrf.mxu1  ;;  %v2782_v42 = vadd.f32 %v2756_v47, %v2631_v4  ;;  %v3777_v56 = vshll.u32 %v6853_v31, 16  ;;  %v4112_v4 = vlaneseq }
 0x2ed   : > { %v3775_v46 = vor.u32 %v3773_v32, %v3771_v53 }
 0x2ee   : > { %5526 = vmatmul.msk.bf16.gmra.mxu0 %vm520_vm0, %v3764_v43  ;;  %v6839_v55 = vadd.f32 %v3244_v61, %v2981_v63  ;;  %5413 = vmatmul.msk.bf16.gmra.mxu2 %vm520_vm0, %v3297_v28  ;;  %v3779_v43 = vrot.slane %v3777_v56, 1  ;;  %v5514_v63 = vld [vmem:[%s6287_s12 + $0x60] sm:$0xf] }
 0x2f1   : > { %v2608_v40 = vpop.f32.mrf.mxu2 }
 0x2f2   : > { %v2632_v25 = vadd.f32 %v2608_v40, %v6676_v37  ;;  %v2761_v48 = vpop.f32.mrf.mxu3  ;;  %v3298_v37 = vrot.slane %v6667_v2, 1  ;;  %v3939_v2 = vrot.slane %v6853_v31, 1 }
 0x2f3   : > { %v2956_v30 = vpop.f32.mrf.mxu0 }
 0x2f4   : > { %v2982_v8 = vadd.f32 %v2956_v30, %v2782_v42  ;;  %v3249_v58 = vpop.f32.mrf.mxu1  ;;  %v2783_v23 = vadd.f32 %v2759_v51, %v2632_v25  ;;  %v3299_v47 = vsel %vm717_vm2, %v3296_v54, %v3298_v37  ;;  %v3940_v3 = vsel %vm717_vm2, %v3937_v10, %v3939_v2  ;;  %v5664_v54 = vld [vmem:[%s6287_s12 + $0x58] sm:$0xff] }
 0x2f5   : > { %v3300_v51 = vrot.slane %v6686_v0, 1  ;;  %v6869_v10 = vshrl.u32 %v4112_v4, 7 }
 0x2f6   : > { %v6845_v34 = vadd.f32 %v3246_v38, %v2982_v8  ;;  %v5675_v38 = vld [vmem:[%s6287_s12 + $0x60] sm:$0x10]  ;;  %v3445_v8 = vld [vmem:[%s6287_s12 + $0x60] sm:$0xf] }
 0x2f7   : > { %5544 = vmatmul.msk.bf16.gmra.mxu1 %vm520_vm0, %v3938_v14  ;;  %5471 = vmatmul.msk.bf16.gmra.mxu3 %vm520_vm0, %v5663_v1  ;;  %v3301_v48 = vsel %vm717_vm2, %v3298_v37, %v3300_v51  ;;  %v6875_v60 = vor.u32 %v5675_v38, %v5514_v63  ;;  %v4114_v33 = vadd.s32 8, %v6869_v10  ;;  %v6884_v1 = vld [vmem:[%s7031_s4] ss:$0 sm:$0xff]  ;;  %v3490_v53 = vunpack.c.l.b16 %v3445_v8 }
 0x2f9   : > { %v2610_v39 = vpop.f32.mrf.mxu2  ;;  %v3941_v5 = vrot.slane %v6875_v60, 1  ;;  %v4145_v37 = vand.u32 15, %v4114_v33 }
 0x2fa   : > { %v3550_v35 = vpop.f32.mrf.mxu3 }
 0x2fb   : > { %v2959_v12 = vpop.f32.mrf.mxu0  ;;  %v3942_v56 = vsel %vm717_vm2, %v3939_v2, %v3941_v5  ;;  %vm4387_vm3 = vcmp.lt.s32.totalorder %v4145_v37, 14 }
 0x2fc   : > { %v2983_v49 = vadd.f32 %v2959_v12, %v2783_v23  ;;  %v3251_v36 = vpop.f32.mrf.mxu1  ;;  %v6888_v23 = vstv %s5548_s28 }
 0x2fe   : > { %5527 = vmatmul.msk.bf16.gmra.mxu0 %vm520_vm0, %v3772_v41  ;;  %v6856_v57 = vadd.f32 %v3249_v58, %v2983_v49  ;;  %5414 = vmatmul.msk.bf16.gmra.mxu2 %vm520_vm0, %v3299_v47  ;;  %v4410_v41 = vadd.s32 %v6888_v23, %v4114_v33  ;;  %v3781_v47 = vshrl.u32 %v6853_v31, 16 }
 0x300   : > { %vm4431_vm4 = vcmp.lt.s32.totalorder %v4410_v41, 224  ;;  %v3783_v31 = vor.u32 %v3781_v47, %v3779_v43 }
 0x301   : > { %v3350_v29 = vpop.f32.mrf.mxu2  ;;  %vm4452_vm6 = vmand %vm4387_vm3, %vm4431_vm4 }
 0x302   : > { %v3552_v44 = vpop.f32.mrf.mxu3  ;;  %v3404_v11 = vadd.f32 %v3350_v29, %v6694_v19  ;;  %v3780_v19 = vsel %vm426_vm1, %v3775_v46, %v3779_v43  ;;  %v3785_v29 = vshll.u32 %v6875_v60, 16  ;;  %v4115_v46 = vadd.s32 16, %v6869_v10 }
 0x303   : > { %v2961_v61 = vpop.f32.mrf.mxu0 }
 0x304   : > { %v3991_v50 = vpop.f32.mrf.mxu1  ;;  %v3604_v45 = vadd.f32 %v3550_v35, %v3404_v11  ;;  %v4409_v35 = vadd.s32 %v6888_v23, %v6869_v10  ;;  %v3787_v11 = vrot.slane %v3785_v29, 1 }
 0x306   : > { %vm4430_vm5 = vcmp.lt.s32.totalorder %v4409_v35, 224 }
 0x307   : > { %5545 = vmatmul.msk.bf16.gmra.mxu1 %vm520_vm0, %v3940_v3  ;;  %5472 = vmatmul.msk.bf16.gmra.mxu3 %vm520_vm0, %v5664_v54 }
 0x309   : > { %v3352_v28 = vpop.f32.mrf.mxu2 }
 0x30a   : > { %v3555_v40 = vpop.f32.mrf.mxu3  ;;  %v3405_v58 = vadd.f32 %v3352_v28, %v6699_v26 }
 0x30b   : > { %v3840_v42 = vpop.f32.mrf.mxu0 }
 0x30c   : > { %v3894_v25 = vadd.f32 %v3840_v42, %v3604_v45  ;;  %v3993_v30 = vpop.f32.mrf.mxu1  ;;  %v3605_v12 = vadd.f32 %v3552_v44, %v3405_v58  ;;  %v3788_v45 = vsel %vm426_vm1, %v3783_v31, %v3787_v11 }
 0x30e   : > { %v4045_v14 = vadd.f32 %v3991_v50, %v3894_v25  ;;  %5528 = vmatmul.msk.bf16.gmra.mxu0 %vm520_vm0, %v3780_v19  ;;  %5415 = vmatmul.msk.bf16.gmra.mxu2 %vm520_vm0, %v3301_v48  ;;  %v3501_v50 = vpack.c.b16 %v3490_v53, %v3490_v53  ;;  %v4411_v25 = vadd.s32 %v6888_v23, %v4115_v46  ;;  %v4116_v48 = vadd.s32 24, %v6869_v10 }
 0x310   : > { %v4070_v39 = vadd.f32 %v6884_v1, %v4045_v14  ;;  %vm4432_vm7 = vcmp.lt.s32.totalorder %v4411_v25, 224 }
 0x311   : > { %v3355_v26 = vpop.f32.mrf.mxu2 }
 0x312   : > { %v3557_v36 = vpop.f32.mrf.mxu3  ;;  %v4091_v44 = vmax.f32 %v4070_v39, 0.0  ;;  %v3406_v3 = vadd.f32 %v3355_v26, %v6706_v22  ;;  %v4159_v26 = vand.u32 15, %v4116_v48 }
 0x313   : > { %v3842_v49 = vpop.f32.mrf.mxu0 }
 0x314   : > { %v3895_v61 = vadd.f32 %v3842_v49, %v3605_v12  ;;  %v3996_v32 = vpop.f32.mrf.mxu1  ;;  %v4514_v2 = vsel %vm4430_vm5, %v4091_v44, 0.0  ;;  %v3606_v22 = vadd.f32 %v3555_v40, %v3406_v3  ;;  %v4412_v49 = vadd.s32 %v6888_v23, %v4116_v48 }
 0x315   : > { %v4599_v33 = vmul.f32 %v4514_v2, %v4514_v2  ;;  %vm4389_vm8 = vcmp.lt.s32.totalorder %v4159_v26, 14  ;;  %v3789_v44 = vshrl.u32 %v6875_v60, 16 }
 0x316   : > { %v4046_v54 = vadd.f32 %v3993_v30, %v3895_v61  ;;  %vm4433_vm9 = vcmp.lt.s32.totalorder %v4412_v49, 224 }
 0x317   : > { %5546 = vmatmul.msk.bf16.gmra.mxu1 %vm520_vm0, %v3942_v56  ;;  %5473 = vmatmul.msk.bf16.gmra.mxu3 %vm520_vm0, %v3501_v50  ;;  %vm4454_vm10 = vmand %vm4389_vm8, %vm4433_vm9 }
 0x318   : > { %v4071_v4 = vadd.f32 %v6884_v1, %v4046_v54  ;;  %v4117_v54 = vadd.s32 32, %v6869_v10 }
 0x319   : > { %v3357_v38 = vpop.f32.mrf.mxu2 }
 0x31a   : > { %v4092_v63 = vmax.f32 %v4071_v4, 0.0  ;;  %v3560_v42 = vpop.f32.mrf.mxu3  ;;  %v3407_v14 = vadd.f32 %v3357_v38, %v6715_v21 }
 0x31b   : > { %v3845_v28 = vpop.f32.mrf.mxu0 }
 0x31c   : > { %v4515_v43 = vsel %vm4452_vm6, %v4092_v63, 0.0  ;;  %v3896_v19 = vadd.f32 %v3845_v28, %v3606_v22  ;;  %v3998_v30 = vpop.f32.mrf.mxu1  ;;  %v3607_v35 = vadd.f32 %v3557_v36, %v3407_v14 }
 0x31d   : > { %v5705_v8 = vpack.c.bf16 %v4515_v43, %v4514_v2  ;;  %v4577_v40 = vadd.f32 %v4515_v43, %v4514_v2  ;;  %v4600_v58 = vmul.f32 %v4515_v43, %v4515_v43  ;;  %v3791_v2 = vor.u32 %v3789_v44, %v3787_v11 }
 0x31e   : > { %v4047_v53 = vadd.f32 %v3996_v32, %v3896_v19  ;;  %5529 = vmatmul.msk.bf16.gmra.mxu0 %vm520_vm0, %v3788_v45  ;;  %5416 = vmatmul.msk.bf16.gmra.mxu2 %vm520_vm0, %v3300_v51 }
 0x31f   : > { %5706 = vst [vmem:[%s6911_s19] sm:$0xff] %v5705_v8   ;;  %v4615_v37 = vadd.f32 %v4600_v58, %v4599_v33 }
 0x320   : > { %v4072_v39 = vadd.f32 %v6884_v1, %v4047_v53 }
 0x321   : > { %v3360_v41 = vpop.f32.mrf.mxu2 }
 0x322   : > { %v4093_v12 = vmax.f32 %v4072_v39, 0.0  ;;  %v3562_v21 = vpop.f32.mrf.mxu3  ;;  %v3408_v0 = vadd.f32 %v3360_v41, %v6727_v27 }
 0x323   : > { %v3847_v47 = vpop.f32.mrf.mxu0 }
 0x324   : > { %v4516_v29 = vsel %vm4432_vm7, %v4093_v12, 0.0  ;;  %v3897_v61 = vadd.f32 %v3847_v47, %v3607_v35  ;;  %v4001_v32 = vpop.f32.mrf.mxu1  ;;  %v3608_v46 = vadd.f32 %v3560_v42, %v3408_v0 }
 0x325   : > { %v4578_v56 = vadd.f32 %v4577_v40, %v4516_v29  ;;  %v4601_v50 = vmul.f32 %v4516_v29, %v4516_v29 }
 0x326   : > { %v4048_v51 = vadd.f32 %v3998_v30, %v3897_v61  ;;  %v4118_v30 = vadd.s32 40, %v6869_v10 }
 0x327   : > { %v4616_v3 = vadd.f32 %v4615_v37, %v4601_v50  ;;  %5547 = vmatmul.msk.bf16.gmra.mxu1 %vm520_vm0, %v3941_v5  ;;  %v4413_v5 = vadd.s32 %v6888_v23, %v4117_v54 }
 0x328   : > { %v4073_v36 = vadd.f32 %v6884_v1, %v4048_v51  ;;  %v4173_v40 = vand.u32 15, %v4118_v30  ;;  %v4414_v58 = vadd.s32 %v6888_v23, %v4118_v30 }
 0x329   : > { %v3362_v4 = vpop.f32.mrf.mxu2  ;;  %vm4434_vm11 = vcmp.lt.s32.totalorder %v4413_v5, 224 }
 0x32a   : > { %v4094_v31 = vmax.f32 %v4073_v36, 0.0  ;;  %v3565_v63 = vpop.f32.mrf.mxu3  ;;  %v3409_v19 = vadd.f32 %v3362_v4, %v6733_v16  ;;  %vm4391_vm12 = vcmp.lt.s32.totalorder %v4173_v40, 14  ;;  %vm4435_vm13 = vcmp.lt.s32.totalorder %v4414_v58, 224 }
 0x32b   : > { %v3850_v27 = vpop.f32.mrf.mxu0  ;;  %vm4456_vm14 = vmand %vm4391_vm12, %vm4435_vm13 }
 0x32c   : > { %v4517_v38 = vsel %vm4454_vm10, %v4094_v31, 0.0  ;;  %v3898_v22 = vadd.f32 %v3850_v27, %v3608_v46  ;;  %v4003_v28 = vpop.f32.mrf.mxu1  ;;  %v3609_v8 = vadd.f32 %v3562_v21, %v3409_v19  ;;  %v4119_v21 = vadd.s32 48, %v6869_v10 }
 0x32d   : > { %v5710_v45 = vpack.c.bf16 %v4517_v38, %v4516_v29  ;;  %v4579_v43 = vadd.f32 %v4578_v56, %v4517_v38  ;;  %v4602_v60 = vmul.f32 %v4517_v38, %v4517_v38  ;;  %v4120_v46 = vadd.s32 56, %v6869_v10 }
 0x32e   : > { %v4049_v25 = vadd.f32 %v4001_v32, %v3898_v22  ;;  %5530 = vmatmul.msk.bf16.gmra.mxu0 %vm520_vm0, %v3791_v2  ;;  %v4415_v54 = vadd.s32 %v6888_v23, %v4119_v21  ;;  %v4122_v21 = vadd.s32 72, %v6869_v10 }
 0x32f   : > { %5774 = vst [vmem:[%s6911_s19 + $0x8] sm:$0xff] %v5710_v45   ;;  %v4617_v42 = vadd.f32 %v4616_v3, %v4602_v60  ;;  %v4416_v45 = vadd.s32 %v6888_v23, %v4120_v46 }
 0x330   : > { %v4074_v11 = vadd.f32 %v6884_v1, %v4049_v25  ;;  %vm4436_vm15 = vcmp.lt.s32.totalorder %v4415_v54, 224 }
 0x331   : > { %v3365_v33 = vpop.f32.mrf.mxu2  ;;  %vm4437_vm1 = vcmp.lt.s32.totalorder %v4416_v45, 224 }
 0x332   : > { %v4095_v48 = vmax.f32 %v4074_v11, 0.0  ;;  %v3567_v53 = vpop.f32.mrf.mxu3  ;;  %v3410_v41 = vadd.f32 %v3365_v33, %v6743_v7 }
 0x333   : > { %v3852_v14 = vpop.f32.mrf.mxu0 }
 0x334   : > { %v4518_v37 = vsel %vm4434_vm11, %v4095_v48, 0.0  ;;  %v3899_v16 = vadd.f32 %v3852_v14, %v3609_v8  ;;  %v4006_v39 = vpop.f32.mrf.mxu1  ;;  %v3610_v32 = vadd.f32 %v3565_v63, %v3410_v41  ;;  %v4121_v8 = vadd.s32 64, %v6869_v10 }
 0x335   : > { %v4580_v26 = vadd.f32 %v4579_v43, %v4518_v37  ;;  %v4603_v12 = vmul.f32 %v4518_v37, %v4518_v37 }
 0x336   : > { %v4050_v35 = vadd.f32 %v4003_v28, %v3899_v16  ;;  %v4187_v28 = vand.u32 15, %v4120_v46 }
 0x337   : > { %v4618_v49 = vadd.f32 %v4617_v42, %v4603_v12 }
 0x338   : > { %v4075_v47 = vadd.f32 %v6884_v1, %v4050_v35  ;;  %vm4393_vm0 = vcmp.lt.s32.totalorder %v4187_v28, 14  ;;  %v4417_v35 = vadd.s32 %v6888_v23, %v4121_v8 }
 0x339   : > { %v3367_v61 = vpop.f32.mrf.mxu2  ;;  %vm4458_vm2 = vmand %vm4393_vm0, %vm4437_vm1 }
 0x33a   : > { %v4096_v29 = vmax.f32 %v4075_v47, 0.0  ;;  %v3570_v50 = vpop.f32.mrf.mxu3  ;;  %v3411_v31 = vadd.f32 %v3367_v61, %v6749_v62  ;;  %vm4438_vm3 = vcmp.lt.s32.totalorder %v4417_v35, 224 }
 0x33b   : > { %v3855_v56 = vpop.f32.mrf.mxu0 }
 0x33c   : > { %v4519_v0 = vsel %vm4456_vm14, %v4096_v29, 0.0  ;;  %v3900_v51 = vadd.f32 %v3855_v56, %v3610_v32  ;;  %v4008_v44 = vpop.f32.mrf.mxu1  ;;  %v3611_v22 = vadd.f32 %v3567_v53, %v3411_v31 }
 0x33d   : > { %v5715_v3 = vpack.c.bf16 %v4519_v0, %v4518_v37  ;;  %v4581_v7 = vadd.f32 %v4580_v26, %v4519_v0  ;;  %v4604_v36 = vmul.f32 %v4519_v0, %v4519_v0  ;;  %v4201_v0 = vand.u32 15, %v4122_v21 }
 0x33e   : > { %v4051_v4 = vadd.f32 %v4006_v39, %v3900_v51  ;;  %v4418_v51 = vadd.s32 %v6888_v23, %v4122_v21 }
 0x33f   : > { %5775 = vst [vmem:[%s6911_s19 + $0x10] sm:$0xff] %v5715_v3   ;;  %v4619_v2 = vadd.f32 %v4618_v49, %v4604_v36  ;;  %vm4395_vm4 = vcmp.lt.s32.totalorder %v4201_v0, 14 }
 0x340   : > { %v4076_v27 = vadd.f32 %v6884_v1, %v4051_v4  ;;  %vm4439_vm5 = vcmp.lt.s32.totalorder %v4418_v51, 224 }
 0x341   : > { %v3370_v38 = vpop.f32.mrf.mxu2  ;;  %vm4460_vm6 = vmand %vm4395_vm4, %vm4439_vm5 }
 0x342   : > { %v4097_v63 = vmax.f32 %v4076_v27, 0.0  ;;  %v3572_v60 = vpop.f32.mrf.mxu3  ;;  %v3412_v42 = vadd.f32 %v3370_v38, %v6759_v52 }
 0x343   : > { %v3857_v43 = vpop.f32.mrf.mxu0 }
 0x344   : > { %v4520_v5 = vsel %vm4436_vm15, %v4097_v63, 0.0  ;;  %v3901_v19 = vadd.f32 %v3857_v43, %v3611_v22  ;;  %v4011_v25 = vpop.f32.mrf.mxu1  ;;  %v3612_v14 = vadd.f32 %v3570_v50, %v3412_v42  ;;  %v4123_v63 = vadd.s32 80, %v6869_v10 }
 0x345   : > { %v4582_v62 = vadd.f32 %v4581_v7, %v4520_v5  ;;  %v4605_v30 = vmul.f32 %v4520_v5, %v4520_v5 }
 0x346   : > { %v4052_v11 = vadd.f32 %v4008_v44, %v3901_v19 }
 0x347   : > { %v4620_v48 = vadd.f32 %v4619_v2, %v4605_v30  ;;  %v4419_v30 = vadd.s32 %v6888_v23, %v4123_v63 }
 0x348   : > { %v4077_v33 = vadd.f32 %v6884_v1, %v4052_v11 }
 0x349   : > { %v3372_v58 = vpop.f32.mrf.mxu2  ;;  %vm4440_vm7 = vcmp.lt.s32.totalorder %v4419_v30, 224 }
 0x34a   : > { %v4098_v40 = vmax.f32 %v4077_v33, 0.0  ;;  %v3575_v37 = vpop.f32.mrf.mxu3  ;;  %v3413_v49 = vadd.f32 %v3372_v58, %v6765_v24 }
 0x34b   : > { %v3860_v53 = vpop.f32.mrf.mxu0 }
 0x34c   : > { %v4521_v16 = vsel %vm4458_vm2, %v4098_v40, 0.0  ;;  %v3902_v39 = vadd.f32 %v3860_v53, %v3612_v14  ;;  %v4013_v26 = vpop.f32.mrf.mxu1  ;;  %v3613_v50 = vadd.f32 %v3572_v60, %v3413_v49 }
 0x34d   : > { %v5720_v12 = vpack.c.bf16 %v4521_v16, %v4520_v5  ;;  %v4583_v52 = vadd.f32 %v4582_v62, %v4521_v16  ;;  %v4606_v41 = vmul.f32 %v4521_v16, %v4521_v16 }
 0x34e   : > { %v4053_v47 = vadd.f32 %v4011_v25, %v3902_v39 }
 0x34f   : > { %5776 = vst [vmem:[%s6911_s19 + $0x18] sm:$0xff] %v5720_v12   ;;  %v4621_v29 = vadd.f32 %v4620_v48, %v4606_v41  ;;  %v4124_v48 = vadd.s32 88, %v6869_v10 }
 0x350   : > { %v4078_v61 = vadd.f32 %v6884_v1, %v4053_v47 }
 0x351   : > { %v3375_v56 = vpop.f32.mrf.mxu2  ;;  %v4215_v53 = vand.u32 15, %v4124_v48 }
 0x352   : > { %v4099_v32 = vmax.f32 %v4078_v61, 0.0  ;;  %v3577_v3 = vpop.f32.mrf.mxu3  ;;  %v3414_v4 = vadd.f32 %v3375_v56, %v6775_v20 }
 0x353   : > { %v3862_v44 = vpop.f32.mrf.mxu0  ;;  %vm4397_vm8 = vcmp.lt.s32.totalorder %v4215_v53, 14 }
 0x354   : > { %v4522_v7 = vsel %vm4438_vm3, %v4099_v32, 0.0  ;;  %v3903_v36 = vadd.f32 %v3862_v44, %v3613_v50  ;;  %v4016_v54 = vpop.f32.mrf.mxu1  ;;  %v3614_v28 = vadd.f32 %v3575_v37, %v3414_v4  ;;  %v4420_v37 = vadd.s32 %v6888_v23, %v4124_v48 }
 0x355   : > { %v4584_v24 = vadd.f32 %v4583_v52, %v4522_v7  ;;  %v4607_v31 = vmul.f32 %v4522_v7, %v4522_v7  ;;  %v4126_v4 = vadd.s32 104, %v6869_v10 }
 0x356   : > { %v4054_v46 = vadd.f32 %v4013_v26, %v3903_v36  ;;  %vm4441_vm9 = vcmp.lt.s32.totalorder %v4420_v37, 224 }
 0x357   : > { %v4622_v2 = vadd.f32 %v4621_v29, %v4607_v31  ;;  %vm4462_vm10 = vmand %vm4397_vm8, %vm4441_vm9  ;;  %v4125_v29 = vadd.s32 96, %v6869_v10 }
 0x358   : > { %v4079_v27 = vadd.f32 %v6884_v1, %v4054_v46 }
 0x359   : > { %v3377_v22 = vpop.f32.mrf.mxu2 }
 0x35a   : > { %v4100_v38 = vmax.f32 %v4079_v27, 0.0  ;;  %v3580_v43 = vpop.f32.mrf.mxu3  ;;  %v3415_v42 = vadd.f32 %v3377_v22, %v6781_v15  ;;  %v4229_v22 = vand.u32 15, %v4126_v4 }
 0x35b   : > { %v3865_v45 = vpop.f32.mrf.mxu0 }
 0x35c   : > { %v4523_v60 = vsel %vm4460_vm6, %v4100_v38, 0.0  ;;  %v3904_v5 = vadd.f32 %v3865_v45, %v3614_v28  ;;  %v4018_v19 = vpop.f32.mrf.mxu1  ;;  %v3615_v14 = vadd.f32 %v3577_v3, %v3415_v42  ;;  %v4422_v28 = vadd.s32 %v6888_v23, %v4126_v4 }
 0x35d   : > { %v5725_v25 = vpack.c.bf16 %v4523_v60, %v4522_v7  ;;  %v4585_v20 = vadd.f32 %v4584_v24, %v4523_v60  ;;  %v4608_v62 = vmul.f32 %v4523_v60, %v4523_v60  ;;  %vm4399_vm12 = vcmp.lt.s32.totalorder %v4229_v22, 14 }
 0x35e   : > { %v4055_v11 = vadd.f32 %v4016_v54, %v3904_v5  ;;  %v4421_v54 = vadd.s32 %v6888_v23, %v4125_v29  ;;  %vm4443_vm13 = vcmp.lt.s32.totalorder %v4422_v28, 224 }
 0x35f   : > { %5777 = vst [vmem:[%s6911_s19 + $0x20] sm:$0xff] %v5725_v25   ;;  %v4623_v33 = vadd.f32 %v4622_v2, %v4608_v62  ;;  %vm4464_vm14 = vmand %vm4399_vm12, %vm4443_vm13 }
 0x360   : > { %v4080_v8 = vadd.f32 %v6884_v1, %v4055_v11  ;;  %vm4442_vm11 = vcmp.lt.s32.totalorder %v4421_v54, 224  ;;  %v4127_v11 = vadd.s32 112, %v6869_v10 }
 0x361   : > { %v3380_v58 = vpop.f32.mrf.mxu2 }
 0x362   : > { %v4101_v40 = vmax.f32 %v4080_v8, 0.0  ;;  %v3582_v39 = vpop.f32.mrf.mxu3  ;;  %v3416_v35 = vadd.f32 %v3380_v58, %v6791_v6 }
 0x363   : > { %v3867_v16 = vpop.f32.mrf.mxu0 }
 0x364   : > { %v4524_v26 = vsel %vm4440_vm7, %v4101_v40, 0.0  ;;  %v3905_v12 = vadd.f32 %v3867_v16, %v3615_v14  ;;  %v4021_v52 = vpop.f32.mrf.mxu1  ;;  %v3616_v56 = vadd.f32 %v3580_v43, %v3416_v35 }
 0x365   : > { %v4586_v15 = vadd.f32 %v4585_v20, %v4524_v26  ;;  %v4609_v41 = vmul.f32 %v4524_v26, %v4524_v26 }
 0x366   : > { %v4056_v49 = vadd.f32 %v4018_v19, %v3905_v12 }
 0x367   : > { %v4624_v47 = vadd.f32 %v4623_v33, %v4609_v41 }
 0x368   : > { %v4081_v21 = vadd.f32 %v6884_v1, %v4056_v49 }
 0x369   : > { %v3382_v32 = vpop.f32.mrf.mxu2 }
 0x36a   : > { %v4102_v61 = vmax.f32 %v4081_v21, 0.0  ;;  %v3585_v0 = vpop.f32.mrf.mxu3  ;;  %v3417_v24 = vadd.f32 %v3382_v32, %v6797_v9 }
 0x36b   : > { %v3870_v50 = vpop.f32.mrf.mxu0 }
 0x36c   : > { %v4525_v51 = vsel %vm4462_vm10, %v4102_v61, 0.0  ;;  %v3906_v44 = vadd.f32 %v3870_v50, %v3616_v56  ;;  %v4023_v3 = vpop.f32.mrf.mxu1  ;;  %v3617_v38 = vadd.f32 %v3582_v39, %v3417_v24 }
 0x36d   : > { %v5730_v7 = vpack.c.bf16 %v4525_v51, %v4524_v26  ;;  %v4587_v6 = vadd.f32 %v4586_v15, %v4525_v51  ;;  %v4610_v36 = vmul.f32 %v4525_v51, %v4525_v51  ;;  %v4423_v26 = vadd.s32 %v6888_v23, %v4127_v11 }
 0x36e   : > { %v4057_v31 = vadd.f32 %v4021_v52, %v3906_v44  ;;  %v4128_v15 = vadd.s32 120, %v6869_v10 }
 0x36f   : > { %5778 = vst [vmem:[%s6911_s19 + $0x28] sm:$0xff] %v5730_v7   ;;  %v4625_v46 = vadd.f32 %v4624_v47, %v4610_v36  ;;  %vm4444_vm15 = vcmp.lt.s32.totalorder %v4423_v26, 224 }
 0x370   : > { %v4082_v2 = vadd.f32 %v6884_v1, %v4057_v31  ;;  %v4243_v29 = vand.u32 15, %v4128_v15  ;;  %v4424_v61 = vadd.s32 %v6888_v23, %v4128_v15 }
 0x371   : > { %v3385_v63 = vpop.f32.mrf.mxu2 }
 0x372   : > { %v4103_v27 = vmax.f32 %v4082_v2, 0.0  ;;  %v3587_v43 = vpop.f32.mrf.mxu3  ;;  %v3418_v20 = vadd.f32 %v3385_v63, %v6807_v18  ;;  %vm4401_vm0 = vcmp.lt.s32.totalorder %v4243_v29, 14  ;;  %vm4445_vm1 = vcmp.lt.s32.totalorder %v4424_v61, 224 }
 0x373   : > { %v3872_v45 = vpop.f32.mrf.mxu0  ;;  %vm4466_vm2 = vmand %vm4401_vm0, %vm4445_vm1 }
 0x374   : > { %v4526_v60 = vsel %vm4442_vm11, %v4103_v27, 0.0  ;;  %v3907_v5 = vadd.f32 %v3872_v45, %v3617_v38  ;;  %v4026_v19 = vpop.f32.mrf.mxu1  ;;  %v3618_v8 = vadd.f32 %v3585_v0, %v3418_v20  ;;  %v4130_v45 = vadd.s32 136, %v6869_v10 }
 0x375   : > { %v4588_v9 = vadd.f32 %v4587_v6, %v4526_v60  ;;  %v4611_v25 = vmul.f32 %v4526_v60, %v4526_v60 }
 0x376   : > { %v4058_v62 = vadd.f32 %v4023_v3, %v3907_v5 }
 0x377   : > { %v4626_v30 = vadd.f32 %v4625_v46, %v4611_v25  ;;  %v4129_v25 = vadd.s32 128, %v6869_v10 }
 0x378   : > { %v4083_v42 = vadd.f32 %v6884_v1, %v4058_v62 }
 0x379   : > { %v3387_v33 = vpop.f32.mrf.mxu2 }
 0x37a   : > { %v4104_v48 = vmax.f32 %v4083_v42, 0.0  ;;  %v3590_v58 = vpop.f32.mrf.mxu3  ;;  %v3419_v12 = vadd.f32 %v3387_v33, %v6813_v13  ;;  %v4426_v42 = vadd.s32 %v6888_v23, %v4130_v45 }
 0x37b   : > { %v3875_v40 = vpop.f32.mrf.mxu0 }
 0x37c   : > { %v4527_v14 = vsel %vm4464_vm14, %v4104_v48, 0.0  ;;  %v3908_v53 = vadd.f32 %v3875_v40, %v3618_v8  ;;  %v4028_v37 = vpop.f32.mrf.mxu1  ;;  %v3619_v21 = vadd.f32 %v3587_v43, %v3419_v12  ;;  %vm4447_vm4 = vcmp.lt.s32.totalorder %v4426_v42, 224 }
 0x37d   : > { %v5735_v16 = vpack.c.bf16 %v4527_v14, %v4526_v60  ;;  %v4589_v18 = vadd.f32 %v4588_v9, %v4527_v14  ;;  %v4612_v39 = vmul.f32 %v4527_v14, %v4527_v14 }
 0x37e   : > { %v4059_v52 = vadd.f32 %v4026_v19, %v3908_v53 }
 0x37f   : > { %5779 = vst [vmem:[%s6911_s19 + $0x30] sm:$0xff] %v5735_v16   ;;  %v4627_v41 = vadd.f32 %v4626_v30, %v4612_v39  ;;  %v4257_v30 = vand.u32 15, %v4130_v45 }
 0x380   : > { %v4084_v35 = vadd.f32 %v6884_v1, %v4059_v52 }
 0x381   : > { %v3390_v47 = vpop.f32.mrf.mxu2  ;;  %vm4403_vm3 = vcmp.lt.s32.totalorder %v4257_v30, 14 }
 0x382   : > { %v4105_v49 = vmax.f32 %v4084_v35, 0.0  ;;  %v3592_v56 = vpop.f32.mrf.mxu3  ;;  %v3420_v3 = vadd.f32 %v3390_v47, %v6823_v17  ;;  %vm4468_vm6 = vmand %vm4403_vm3, %vm4447_vm4 }
 0x383   : > { %v3877_v32 = vpop.f32.mrf.mxu0 }
 0x384   : > { %v4528_v50 = vsel %vm4444_vm15, %v4105_v49, 0.0  ;;  %v3909_v0 = vadd.f32 %v3877_v32, %v3619_v21  ;;  %v4031_v51 = vpop.f32.mrf.mxu1  ;;  %v3620_v31 = vadd.f32 %v3590_v58, %v3420_v3  ;;  %v4131_v3 = vadd.s32 144, %v6869_v10 }
 0x385   : > { %v4590_v13 = vadd.f32 %v4589_v18, %v4528_v50  ;;  %v4613_v44 = vmul.f32 %v4528_v50, %v4528_v50 }
 0x386   : > { %v4060_v7 = vadd.f32 %v4028_v37, %v3909_v0  ;;  %v4425_v37 = vadd.s32 %v6888_v23, %v4129_v25 }
 0x387   : > { %v4628_v6 = vadd.f32 %v4627_v41, %v4613_v44 }
 0x388   : > { %v4085_v36 = vadd.f32 %v6884_v1, %v4060_v7  ;;  %vm4446_vm5 = vcmp.lt.s32.totalorder %v4425_v37, 224 }
 0x389   : > { %v3392_v24 = vpop.f32.mrf.mxu2 }
 0x38a   : > { %v4106_v54 = vmax.f32 %v4085_v36, 0.0  ;;  %v3595_v46 = vpop.f32.mrf.mxu3  ;;  %v3421_v28 = vadd.f32 %v3392_v24, %v6829_v59 }
 0x38b   : > { %v3880_v4 = vpop.f32.mrf.mxu0 }
 0x38c   : > { %v4529_v2 = vsel %vm4466_vm2, %v4106_v54, 0.0  ;;  %v3910_v27 = vadd.f32 %v3880_v4, %v3620_v31  ;;  %v4033_v63 = vpop.f32.mrf.mxu1  ;;  %v3621_v62 = vadd.f32 %v3592_v56, %v3421_v28 }
 0x38d   : > { %v5740_v38 = vpack.c.bf16 %v4529_v2, %v4528_v50  ;;  %v4591_v17 = vadd.f32 %v4590_v13, %v4529_v2  ;;  %v4614_v22 = vmul.f32 %v4529_v2, %v4529_v2  ;;  %v4132_v13 = vadd.s32 152, %v6869_v10 }
 0x38e   : > { %v4061_v5 = vadd.f32 %v4031_v51, %v3910_v27  ;;  %v4427_v27 = vadd.s32 %v6888_v23, %v4131_v3 }
 0x38f   : > { %5780 = vst [vmem:[%s6911_s19 + $0x38] sm:$0xff] %v5740_v38   ;;  %v4592_v43 = vrot.slane %v4591_v17, 4  ;;  %v4629_v60 = vadd.f32 %v4628_v6, %v4614_v22  ;;  %v4271_v36 = vand.u32 15, %v4132_v13  ;;  %v4428_v54 = vadd.s32 %v6888_v23, %v4132_v13 }
 0x390   : > { %v4086_v8 = vadd.f32 %v6884_v1, %v4061_v5  ;;  %vm4448_vm9 = vcmp.lt.s32.totalorder %v4427_v27, 224  ;;  %v4133_v22 = vadd.s32 160, %v6869_v10 }
 0x391   : > { %v4593_v19 = vadd.f32 %v4592_v43, %v4591_v17  ;;  %v4630_v9 = vrot.slane %v4629_v60, 4  ;;  %v3395_v20 = vpop.f32.mrf.mxu2  ;;  %vm4405_vm7 = vcmp.lt.s32.totalorder %v4271_v36, 14  ;;  %vm4449_vm8 = vcmp.lt.s32.totalorder %v4428_v54, 224 }
 0x392   : > { %v3597_v33 = vpop.f32.mrf.mxu3  ;;  %v3422_v16 = vadd.f32 %v3395_v20, %v6839_v55  ;;  %v4107_v12 = vmax.f32 %v4086_v8, 0.0  ;;  %vm4470_vm10 = vmand %vm4405_vm7, %vm4449_vm8  ;;  %v4429_v20 = vadd.s32 %v6888_v23, %v4133_v22 }
 0x393   : > { %v4594_v11 = vrot.slane %v4593_v19, 2  ;;  %v4631_v48 = vadd.f32 %v4630_v9, %v4629_v60  ;;  %v3882_v59 = vpop.f32.mrf.mxu0 }
 0x394   : > { %v3911_v40 = vadd.f32 %v3882_v59, %v3621_v62  ;;  %v4036_v58 = vpop.f32.mrf.mxu1  ;;  %v3622_v55 = vadd.f32 %v3595_v46, %v3422_v16  ;;  %v4530_v61 = vsel %vm4446_vm5, %v4107_v12, 0.0  ;;  %vm4450_vm11 = vcmp.lt.s32.totalorder %v4429_v20, 224 }
 0x395   : > { %v4595_v14 = vadd.f32 %v4594_v11, %v4593_v19  ;;  %v4632_v53 = vrot.slane %v4631_v48, 2 }
 0x396   : > { %v4062_v18 = vadd.f32 %v4033_v63, %v3911_v40 }
 0x397   : > { %v4596_v39 = vrot.slane %v4595_v14, 1  ;;  %v4633_v26 = vadd.f32 %v4632_v53, %v4631_v48 }
 0x398   : > { %v4087_v52 = vadd.f32 %v6884_v1, %v4062_v18 }
 0x399   : > { %v4597_v15 = vadd.f32 %v4596_v39, %v4595_v14  ;;  %v4634_v41 = vrot.slane %v4633_v26, 1  ;;  %v3397_v49 = vpop.f32.mrf.mxu2 }
 0x39a   : > { %v4108_v35 = vmax.f32 %v4087_v52, 0.0  ;;  %v3600_v29 = vpop.f32.mrf.mxu3  ;;  %v3423_v51 = vadd.f32 %v3397_v49, %v6845_v34 }
 0x39b   : > { %4598 = vst [vmem:[%s342_s30] sm:$0x1] %v4597_v15  ;;  %v4635_v47 = vadd.f32 %v4634_v41, %v4633_v26  ;;  %v3885_v21 = vpop.f32.mrf.mxu0 }
 0x39c   : > { %v4531_v32 = vsel %vm4468_vm6, %v4108_v35, 0.0  ;;  %v3912_v56 = vadd.f32 %v3885_v21, %v3622_v55  ;;  %v4038_v50 = vpop.f32.mrf.mxu1  ;;  %v3623_v6 = vadd.f32 %v3597_v33, %v3423_v51 }
 0x39d   : > { %4636 = vst [vmem:[%s342_s30 + $0x1] sm:$0x1] %v4635_v47  ;;  %v5745_v0 = vpack.c.bf16 %v4531_v32, %v4530_v61 }
 0x39e   : > { %v4063_v44 = vadd.f32 %v4036_v58, %v3912_v56 }
 0x39f   : > { %5781 = vst [vmem:[%s6911_s19 + $0x40] sm:$0xff] %v5745_v0  }
 0x3a0   : > { %v4088_v4 = vadd.f32 %v6884_v1, %v4063_v44 }
 0x3a1   : > { %v3400_v7 = vpop.f32.mrf.mxu2 }
 0x3a2   : > { %v3602_v31 = vpop.f32.mrf.mxu3  ;;  %v3424_v34 = vadd.f32 %v3400_v7, %v6856_v57  ;;  %v4109_v38 = vmax.f32 %v4088_v4, 0.0 }
 0x3a3   : > { %v3887_v24 = vpop.f32.mrf.mxu0 }
 0x3a4   : > { %v3913_v46 = vadd.f32 %v3887_v24, %v3623_v6  ;;  %v4041_v2 = vpop.f32.mrf.mxu1  ;;  %v3624_v43 = vadd.f32 %v3600_v29, %v3424_v34  ;;  %v4532_v5 = vsel %vm4448_vm9, %v4109_v38, 0.0 }
 0x3a6   : > { %v4064_v63 = vadd.f32 %v4038_v50, %v3913_v46 }
 0x3a8   : > { %v4089_v17 = vadd.f32 %v6884_v1, %v4064_v63 }
 0x3a9   : > { %v3402_v45 = vpop.f32.mrf.mxu2 }
 0x3aa   : > { %v4110_v28 = vmax.f32 %v4089_v17, 0.0 }
 0x3ab   : > { %v3890_v60 = vpop.f32.mrf.mxu0 }
 0x3ac   : > { %v4533_v19 = vsel %vm4470_vm10, %v4110_v28, 0.0  ;;  %v3914_v9 = vadd.f32 %v3890_v60, %v3624_v43  ;;  %v4043_v57 = vpop.f32.mrf.mxu1 }
 0x3ad   : > { %v5750_v25 = vpack.c.bf16 %v4533_v19, %v4532_v5 }
 0x3ae   : > { %v4065_v62 = vadd.f32 %v4041_v2, %v3914_v9 }
 0x3af   : > { %5782 = vst [vmem:[%s6911_s19 + $0x48] sm:$0xff] %v5750_v25  }
 0x3b0   : > { %v4090_v30 = vadd.f32 %v6884_v1, %v4065_v62 }
 0x3b2   : > { %v4111_v42 = vmax.f32 %v4090_v30, 0.0 }
 0x3b3   : > { %v3892_v11 = vpop.f32.mrf.mxu0 }
 0x3b4   : > { %v4534_v10 = vsel %vm4450_vm11, %v4111_v42, 0.0 }
 0x3b5   : > { %v4555_v48 = vpack.c.bf16 %v4534_v10, %v4534_v10 }
 0x3b7   : > { %4576 = vst [vmem:[%s6911_s19 + $0x50] sm:$0xf] %v4555_v48 }
 0x3b8 PF: > { %s17_s25 = sadd.s32 1, %s5868_s25   ;;  %s7034_s21 = smov %s5860_s23 }
 0x3b9   : > { %p14_p7 = scmp.ge.s32.totalorder %s17_s25, 6   ;;  %s7035_s22 = smov %s5864_s24 }
 0x3ba   : > { %s7036_s23 = smov %s7039_s26  ;;  %s7037_s24 = smov %s7043_s27 }
 0x3bb   :  { %16 = sbr.rel (!%p14_p7) target bundleno = 3 (0x3), region = 101 }

</bundles_post_ra>
